<compile_context>
chip_gen: v7x
topology: tpu7x:2x2x1
jax: 0.10.0
libtpu: 0.0.40
codegen_flags: <defaults>
</compile_context>

<pallas_src>
import jax
import jax.numpy as jnp
from jax import lax
from jax.experimental import pallas as pl
from jax.experimental.pallas import tpu as pltpu

INPUT_SIZE = 384
HIDDEN = INPUT_SIZE // 3     # 128
H2 = 2 * HIDDEN              # 256: both branches packed along lanes


def classifier_kernel(prompt_ref, inputs_ref, wih0p_ref, wih0i_ref, b0_ref,
                      whh0_ref, wih1_ref, b1_ref, whh1_ref, lw_ref, lb_ref,
                      out_ref, buf_ref):
    S = buf_ref.shape[0]
    unroll = True if S <= 64 else 8

    # ---- phase 1: layer-0 input->hidden for BOTH branches, batched over S ----
    pre_p = jnp.dot(prompt_ref[...], wih0p_ref[...],
                    preferred_element_type=jnp.float32)              # (S, 128)
    pre_i = jnp.dot(inputs_ref[...], wih0i_ref[...],
                    preferred_element_type=jnp.float32)              # (S, 128)
    buf_ref[...] = jnp.concatenate([pre_p, pre_i], axis=1) + b0_ref[...]

    # ---- recurrence helper: both branches via one block-diag 256-wide matmul -
    def run_recurrence(whh_ref):
        def step(t, h):                                              # h: (1, 256)
            pre = buf_ref[pl.ds(t, 1), :]                            # (1, 256)
            hn = jnp.tanh(pre + jnp.dot(h, whh_ref[...],
                                        preferred_element_type=jnp.float32))
            buf_ref[pl.ds(t, 1), :] = hn       # write hidden output in place
            return hn
        lax.fori_loop(0, S, step, jnp.zeros((1, H2), jnp.float32),
                      unroll=unroll)

    # ---- phase 2: layer-0 recurrence ----------------------------------------
    run_recurrence(whh0_ref)

    # ---- phase 3: layer-1 input->hidden hoisted out of the loop (one matmul) -
    buf_ref[...] = (jnp.dot(buf_ref[...], wih1_ref[...],
                            preferred_element_type=jnp.float32)
                    + b1_ref[...])

    # ---- phase 4: layer-1 recurrence ----------------------------------------
    run_recurrence(whh1_ref)

    # ---- phase 5: combine branches + 128->1 linear head ----------------------
    z = buf_ref[...]                                                 # (S, 256)
    xstack = jnp.tanh(0.5 * (z[:, :HIDDEN] + z[:, HIDDEN:]))         # (S, 128)
    out_ref[...] = (jnp.dot(xstack, lw_ref[...],
                            preferred_element_type=jnp.float32)
                    + lb_ref[...])                                   # (S, 1)


def _block_diag(a, b):
    h = a.shape[0]
    z = jnp.zeros((h, h), jnp.float32)
    top = jnp.concatenate([a, z], axis=1)
    bot = jnp.concatenate([z, b], axis=1)
    return jnp.concatenate([top, bot], axis=0)


def classifier_forward(prompt, inputs, params):
    S = prompt.shape[0]
    pp, pi = params["prompt"], params["input"]

    wih0p = pp["wih0"]                                        # (384, 128)
    wih0i = pi["wih0"]                                        # (384, 128)
    b0 = jnp.concatenate([pp["b0"], pi["b0"]])[None, :]       # (1, 256)
    whh0 = _block_diag(pp["whh0"], pi["whh0"])                # (256, 256)
    wih1 = _block_diag(pp["wih1"], pi["wih1"])                # (256, 256)
    b1 = jnp.concatenate([pp["b1"], pi["b1"]])[None, :]       # (1, 256)
    whh1 = _block_diag(pp["whh1"], pi["whh1"])                # (256, 256)
    lw = params["lw"].T                                       # (128, 1)
    lb = params["lb"]                                         # (1, 1)

    vspec = pl.BlockSpec(memory_space=pltpu.MemorySpace.VMEM)
    out = pl.pallas_call(
        classifier_kernel,
        out_shape=jax.ShapeDtypeStruct((S, 1), jnp.float32),
        in_specs=[vspec] * 11,
        out_specs=vspec,
        scratch_shapes=[pltpu.VMEM((S, H2), jnp.float32)],    # shared pre/h buffer
    )(prompt.astype(jnp.float32), inputs.astype(jnp.float32),
      wih0p, wih0i, b0, whh0, wih1, b1, whh1, lw, lb)
    return out[:, 0]                                          # (S,)


# ---------------- deterministic parameter init (PyTorch-style uniform) -------
def init_params(key):
    scale = 1.0 / jnp.sqrt(jnp.float32(HIDDEN))

    def u(k, shape):
        return jax.random.uniform(k, shape, jnp.float32, -scale, scale)

    keys = jax.random.split(key, 14)

    def rnn_branch(ks):
        return dict(
            wih0=u(ks[0], (INPUT_SIZE, HIDDEN)),   # W_ih_l0^T
            whh0=u(ks[1], (HIDDEN, HIDDEN)),       # W_hh_l0^T
            b0=u(ks[2], (HIDDEN,)),                # b_ih_l0 + b_hh_l0 combined
            wih1=u(ks[3], (HIDDEN, HIDDEN)),       # W_ih_l1^T
            whh1=u(ks[4], (HIDDEN, HIDDEN)),       # W_hh_l1^T
            b1=u(ks[5], (HIDDEN,)),                # b_ih_l1 + b_hh_l1 combined
        )

    return dict(
        prompt=rnn_branch(keys[0:6]),
        input=rnn_branch(keys[6:12]),
        lw=u(keys[12], (1, HIDDEN)),               # Linear weight (out=1, in=128)
        lb=u(keys[13], (1, 1)),                    # Linear bias
    )


# ---------------- pure-JAX reference for correctness check -------------------
def _rnn_ref(x, p):
    def layer(inp, wih, whh, b):
        def step(h, xt):
            hn = jnp.tanh(xt @ wih + h @ whh + b)
            return hn, hn
        _, ys = lax.scan(step, jnp.zeros((HIDDEN,), jnp.float32), inp)
        return ys
    h0 = layer(x, p["wih0"], p["whh0"], p["b0"])
    h1 = layer(h0, p["wih1"], p["whh1"], p["b1"])
    return h1


def classifier_ref(prompt, inputs, params):
    zp = _rnn_ref(prompt, params["prompt"])
    xi = _rnn_ref(inputs, params["input"])
    xstack = jnp.tanh(0.5 * (zp + xi))
    return xstack @ params["lw"][0] + params["lb"][0, 0]


if __name__ == "__main__":
    key = jax.random.PRNGKey(0)
    kp, ki, kw = jax.random.split(key, 3)
    S = 8  # small sequence length; feature size 384 fixed by the module config
    prompt = jax.random.normal(kp, (S, INPUT_SIZE), jnp.float32)
    inputs = jax.random.normal(ki, (S, INPUT_SIZE), jnp.float32)
    params = init_params(kw)

    out = classifier_forward(prompt, inputs, params)
    out = jax.block_until_ready(out)

    ref = classifier_ref(prompt, inputs, params)
    assert out.shape == (S,), out.shape
    assert jnp.allclose(out, ref, atol=1e-5, rtol=1e-5), (out, ref)
    print("KERNEL_OK")
</pallas_src>

<mosaic_0001>
module attributes {stable_mosaic.version = 11 : i64} {
  func.func @classifier_kernel(%arg0: memref<8x384xf32, #tpu.memory_space<vmem>>, %arg1: memref<8x384xf32, #tpu.memory_space<vmem>>, %arg2: memref<384x128xf32, #tpu.memory_space<vmem>>, %arg3: memref<384x128xf32, #tpu.memory_space<vmem>>, %arg4: memref<1x256xf32, #tpu.memory_space<vmem>>, %arg5: memref<256x256xf32, #tpu.memory_space<vmem>>, %arg6: memref<256x256xf32, #tpu.memory_space<vmem>>, %arg7: memref<1x256xf32, #tpu.memory_space<vmem>>, %arg8: memref<256x256xf32, #tpu.memory_space<vmem>>, %arg9: memref<128x1xf32, #tpu.memory_space<vmem>>, %arg10: memref<1x1xf32, #tpu.memory_space<vmem>>, %arg11: memref<8x1xf32, #tpu.memory_space<vmem>>, %arg12: memref<8x256xf32, #tpu.memory_space<vmem>>) attributes {dimension_semantics = [], scalar_prefetch = 0 : i64, scratch_operands = 1 : i64, tpu.core_type = #tpu.core_type<tc>} {
    %c0 = arith.constant 0 : index
    %c0_0 = arith.constant 0 : index
    %0 = vector.load %arg0[%c0, %c0_0] : memref<8x384xf32, #tpu.memory_space<vmem>>, vector<8x384xf32>
    %c0_1 = arith.constant 0 : index
    %c0_2 = arith.constant 0 : index
    %1 = vector.load %arg2[%c0_1, %c0_2] : memref<384x128xf32, #tpu.memory_space<vmem>>, vector<384x128xf32>
    %cst = arith.constant dense<0.000000e+00> : vector<8x128xf32>
    %2 = tpu.matmul %0, %1, %cst {dimension_numbers = #tpu.dot_dimension_numbers<[1], [0], [0], [1], [0, 0, 1, 1], [], []>} : vector<8x384xf32>, vector<384x128xf32>, vector<8x128xf32> -> vector<8x128xf32>
    %c0_3 = arith.constant 0 : index
    %c0_4 = arith.constant 0 : index
    %3 = vector.load %arg1[%c0_3, %c0_4] : memref<8x384xf32, #tpu.memory_space<vmem>>, vector<8x384xf32>
    %c0_5 = arith.constant 0 : index
    %c0_6 = arith.constant 0 : index
    %4 = vector.load %arg3[%c0_5, %c0_6] : memref<384x128xf32, #tpu.memory_space<vmem>>, vector<384x128xf32>
    %cst_7 = arith.constant dense<0.000000e+00> : vector<8x128xf32>
    %5 = tpu.matmul %3, %4, %cst_7 {dimension_numbers = #tpu.dot_dimension_numbers<[1], [0], [0], [1], [0, 0, 1, 1], [], []>} : vector<8x384xf32>, vector<384x128xf32>, vector<8x128xf32> -> vector<8x128xf32>
    %6 = tpu.concatenate %2, %5 in 1 : vector<8x128xf32>, vector<8x128xf32> -> vector<8x256xf32>
    %c0_8 = arith.constant 0 : index
    %c0_9 = arith.constant 0 : index
    %7 = vector.load %arg4[%c0_8, %c0_9] : memref<1x256xf32, #tpu.memory_space<vmem>>, vector<1x256xf32>
    %8 = vector.broadcast %7 : vector<1x256xf32> to vector<8x256xf32>
    %9 = arith.addf %6, %8 : vector<8x256xf32>
    %c0_10 = arith.constant 0 : index
    %c0_11 = arith.constant 0 : index
    %10 = vector.load %arg12[%c0_10, %c0_11] : memref<8x256xf32, #tpu.memory_space<vmem>>, vector<8x256xf32>
    tpu.vector_store %arg12[%c0_10, %c0_11], %9 {strides = array<i32>} : memref<8x256xf32, #tpu.memory_space<vmem>>, vector<8x256xf32>,
    %cst_12 = arith.constant 0.000000e+00 : f32
    %11 = vector.broadcast %cst_12 : f32 to vector<1x256xf32>
    %c0_i32 = arith.constant 0 : i32
    %12 = arith.index_cast %c0_i32 : i32 to index
    %c0_13 = arith.constant 0 : index
    %13 = vector.load %arg12[%12, %c0_13] : memref<8x256xf32, #tpu.memory_space<vmem>>, vector<1x256xf32>
    %c0_14 = arith.constant 0 : index
    %c0_15 = arith.constant 0 : index
    %14 = vector.load %arg5[%c0_14, %c0_15] : memref<256x256xf32, #tpu.memory_space<vmem>>, vector<256x256xf32>
    %cst_16 = arith.constant dense<0.000000e+00> : vector<1x256xf32>
    %15 = tpu.matmul %11, %14, %cst_16 {dimension_numbers = #tpu.dot_dimension_numbers<[1], [0], [0], [1], [0, 0, 1, 1], [], []>} : vector<1x256xf32>, vector<256x256xf32>, vector<1x256xf32> -> vector<1x256xf32>
    %16 = arith.addf %13, %15 : vector<1x256xf32>
    %17 = math.tanh %16 : vector<1x256xf32>
    %18 = arith.index_cast %c0_i32 : i32 to index
    %c0_17 = arith.constant 0 : index
    %19 = vector.load %arg12[%18, %c0_17] : memref<8x256xf32, #tpu.memory_space<vmem>>, vector<1x256xf32>
    tpu.vector_store %arg12[%18, %c0_17], %17 {strides = array<i32>} : memref<8x256xf32, #tpu.memory_space<vmem>>, vector<1x256xf32>,
    %c1_i32 = arith.constant 1 : i32
    %20 = arith.index_cast %c1_i32 : i32 to index
    %c0_18 = arith.constant 0 : index
    %21 = vector.load %arg12[%20, %c0_18] : memref<8x256xf32, #tpu.memory_space<vmem>>, vector<1x256xf32>
    %c0_19 = arith.constant 0 : index
    %c0_20 = arith.constant 0 : index
    %22 = vector.load %arg5[%c0_19, %c0_20] : memref<256x256xf32, #tpu.memory_space<vmem>>, vector<256x256xf32>
    %cst_21 = arith.constant dense<0.000000e+00> : vector<1x256xf32>
    %23 = tpu.matmul %17, %22, %cst_21 {dimension_numbers = #tpu.dot_dimension_numbers<[1], [0], [0], [1], [0, 0, 1, 1], [], []>} : vector<1x256xf32>, vector<256x256xf32>, vector<1x256xf32> -> vector<1x256xf32>
    %24 = arith.addf %21, %23 : vector<1x256xf32>
    %25 = math.tanh %24 : vector<1x256xf32>
    %26 = arith.index_cast %c1_i32 : i32 to index
    %c0_22 = arith.constant 0 : index
    %27 = vector.load %arg12[%26, %c0_22] : memref<8x256xf32, #tpu.memory_space<vmem>>, vector<1x256xf32>
    tpu.vector_store %arg12[%26, %c0_22], %25 {strides = array<i32>} : memref<8x256xf32, #tpu.memory_space<vmem>>, vector<1x256xf32>,
    %c2_i32 = arith.constant 2 : i32
    %28 = arith.index_cast %c2_i32 : i32 to index
    %c0_23 = arith.constant 0 : index
    %29 = vector.load %arg12[%28, %c0_23] : memref<8x256xf32, #tpu.memory_space<vmem>>, vector<1x256xf32>
    %c0_24 = arith.constant 0 : index
    %c0_25 = arith.constant 0 : index
    %30 = vector.load %arg5[%c0_24, %c0_25] : memref<256x256xf32, #tpu.memory_space<vmem>>, vector<256x256xf32>
    %cst_26 = arith.constant dense<0.000000e+00> : vector<1x256xf32>
    %31 = tpu.matmul %25, %30, %cst_26 {dimension_numbers = #tpu.dot_dimension_numbers<[1], [0], [0], [1], [0, 0, 1, 1], [], []>} : vector<1x256xf32>, vector<256x256xf32>, vector<1x256xf32> -> vector<1x256xf32>
    %32 = arith.addf %29, %31 : vector<1x256xf32>
    %33 = math.tanh %32 : vector<1x256xf32>
    %34 = arith.index_cast %c2_i32 : i32 to index
    %c0_27 = arith.constant 0 : index
    %35 = vector.load %arg12[%34, %c0_27] : memref<8x256xf32, #tpu.memory_space<vmem>>, vector<1x256xf32>
    tpu.vector_store %arg12[%34, %c0_27], %33 {strides = array<i32>} : memref<8x256xf32, #tpu.memory_space<vmem>>, vector<1x256xf32>,
    %c3_i32 = arith.constant 3 : i32
    %36 = arith.index_cast %c3_i32 : i32 to index
    %c0_28 = arith.constant 0 : index
    %37 = vector.load %arg12[%36, %c0_28] : memref<8x256xf32, #tpu.memory_space<vmem>>, vector<1x256xf32>
    %c0_29 = arith.constant 0 : index
    %c0_30 = arith.constant 0 : index
    %38 = vector.load %arg5[%c0_29, %c0_30] : memref<256x256xf32, #tpu.memory_space<vmem>>, vector<256x256xf32>
    %cst_31 = arith.constant dense<0.000000e+00> : vector<1x256xf32>
    %39 = tpu.matmul %33, %38, %cst_31 {dimension_numbers = #tpu.dot_dimension_numbers<[1], [0], [0], [1], [0, 0, 1, 1], [], []>} : vector<1x256xf32>, vector<256x256xf32>, vector<1x256xf32> -> vector<1x256xf32>
    %40 = arith.addf %37, %39 : vector<1x256xf32>
    %41 = math.tanh %40 : vector<1x256xf32>
    %42 = arith.index_cast %c3_i32 : i32 to index
    %c0_32 = arith.constant 0 : index
    %43 = vector.load %arg12[%42, %c0_32] : memref<8x256xf32, #tpu.memory_space<vmem>>, vector<1x256xf32>
    tpu.vector_store %arg12[%42, %c0_32], %41 {strides = array<i32>} : memref<8x256xf32, #tpu.memory_space<vmem>>, vector<1x256xf32>,
    %c4_i32 = arith.constant 4 : i32
    %44 = arith.index_cast %c4_i32 : i32 to index
    %c0_33 = arith.constant 0 : index
    %45 = vector.load %arg12[%44, %c0_33] : memref<8x256xf32, #tpu.memory_space<vmem>>, vector<1x256xf32>
    %c0_34 = arith.constant 0 : index
    %c0_35 = arith.constant 0 : index
    %46 = vector.load %arg5[%c0_34, %c0_35] : memref<256x256xf32, #tpu.memory_space<vmem>>, vector<256x256xf32>
    %cst_36 = arith.constant dense<0.000000e+00> : vector<1x256xf32>
    %47 = tpu.matmul %41, %46, %cst_36 {dimension_numbers = #tpu.dot_dimension_numbers<[1], [0], [0], [1], [0, 0, 1, 1], [], []>} : vector<1x256xf32>, vector<256x256xf32>, vector<1x256xf32> -> vector<1x256xf32>
    %48 = arith.addf %45, %47 : vector<1x256xf32>
    %49 = math.tanh %48 : vector<1x256xf32>
    %50 = arith.index_cast %c4_i32 : i32 to index
    %c0_37 = arith.constant 0 : index
    %51 = vector.load %arg12[%50, %c0_37] : memref<8x256xf32, #tpu.memory_space<vmem>>, vector<1x256xf32>
    tpu.vector_store %arg12[%50, %c0_37], %49 {strides = array<i32>} : memref<8x256xf32, #tpu.memory_space<vmem>>, vector<1x256xf32>,
    %c5_i32 = arith.constant 5 : i32
    %52 = arith.index_cast %c5_i32 : i32 to index
    %c0_38 = arith.constant 0 : index
    %53 = vector.load %arg12[%52, %c0_38] : memref<8x256xf32, #tpu.memory_space<vmem>>, vector<1x256xf32>
    %c0_39 = arith.constant 0 : index
    %c0_40 = arith.constant 0 : index
    %54 = vector.load %arg5[%c0_39, %c0_40] : memref<256x256xf32, #tpu.memory_space<vmem>>, vector<256x256xf32>
    %cst_41 = arith.constant dense<0.000000e+00> : vector<1x256xf32>
    %55 = tpu.matmul %49, %54, %cst_41 {dimension_numbers = #tpu.dot_dimension_numbers<[1], [0], [0], [1], [0, 0, 1, 1], [], []>} : vector<1x256xf32>, vector<256x256xf32>, vector<1x256xf32> -> vector<1x256xf32>
    %56 = arith.addf %53, %55 : vector<1x256xf32>
    %57 = math.tanh %56 : vector<1x256xf32>
    %58 = arith.index_cast %c5_i32 : i32 to index
    %c0_42 = arith.constant 0 : index
    %59 = vector.load %arg12[%58, %c0_42] : memref<8x256xf32, #tpu.memory_space<vmem>>, vector<1x256xf32>
    tpu.vector_store %arg12[%58, %c0_42], %57 {strides = array<i32>} : memref<8x256xf32, #tpu.memory_space<vmem>>, vector<1x256xf32>,
    %c6_i32 = arith.constant 6 : i32
    %60 = arith.index_cast %c6_i32 : i32 to index
    %c0_43 = arith.constant 0 : index
    %61 = vector.load %arg12[%60, %c0_43] : memref<8x256xf32, #tpu.memory_space<vmem>>, vector<1x256xf32>
    %c0_44 = arith.constant 0 : index
    %c0_45 = arith.constant 0 : index
    %62 = vector.load %arg5[%c0_44, %c0_45] : memref<256x256xf32, #tpu.memory_space<vmem>>, vector<256x256xf32>
    %cst_46 = arith.constant dense<0.000000e+00> : vector<1x256xf32>
    %63 = tpu.matmul %57, %62, %cst_46 {dimension_numbers = #tpu.dot_dimension_numbers<[1], [0], [0], [1], [0, 0, 1, 1], [], []>} : vector<1x256xf32>, vector<256x256xf32>, vector<1x256xf32> -> vector<1x256xf32>
    %64 = arith.addf %61, %63 : vector<1x256xf32>
    %65 = math.tanh %64 : vector<1x256xf32>
    %66 = arith.index_cast %c6_i32 : i32 to index
    %c0_47 = arith.constant 0 : index
    %67 = vector.load %arg12[%66, %c0_47] : memref<8x256xf32, #tpu.memory_space<vmem>>, vector<1x256xf32>
    tpu.vector_store %arg12[%66, %c0_47], %65 {strides = array<i32>} : memref<8x256xf32, #tpu.memory_space<vmem>>, vector<1x256xf32>,
    %c7_i32 = arith.constant 7 : i32
    %68 = arith.index_cast %c7_i32 : i32 to index
    %c0_48 = arith.constant 0 : index
    %69 = vector.load %arg12[%68, %c0_48] : memref<8x256xf32, #tpu.memory_space<vmem>>, vector<1x256xf32>
    %c0_49 = arith.constant 0 : index
    %c0_50 = arith.constant 0 : index
    %70 = vector.load %arg5[%c0_49, %c0_50] : memref<256x256xf32, #tpu.memory_space<vmem>>, vector<256x256xf32>
    %cst_51 = arith.constant dense<0.000000e+00> : vector<1x256xf32>
    %71 = tpu.matmul %65, %70, %cst_51 {dimension_numbers = #tpu.dot_dimension_numbers<[1], [0], [0], [1], [0, 0, 1, 1], [], []>} : vector<1x256xf32>, vector<256x256xf32>, vector<1x256xf32> -> vector<1x256xf32>
    %72 = arith.addf %69, %71 : vector<1x256xf32>
    %73 = math.tanh %72 : vector<1x256xf32>
    %74 = arith.index_cast %c7_i32 : i32 to index
    %c0_52 = arith.constant 0 : index
    %75 = vector.load %arg12[%74, %c0_52] : memref<8x256xf32, #tpu.memory_space<vmem>>, vector<1x256xf32>
    tpu.vector_store %arg12[%74, %c0_52], %73 {strides = array<i32>} : memref<8x256xf32, #tpu.memory_space<vmem>>, vector<1x256xf32>,
    %c8_i32 = arith.constant 8 : i32
    %c0_53 = arith.constant 0 : index
    %c0_54 = arith.constant 0 : index
    %76 = vector.load %arg12[%c0_53, %c0_54] : memref<8x256xf32, #tpu.memory_space<vmem>>, vector<8x256xf32>
    %c0_55 = arith.constant 0 : index
    %c0_56 = arith.constant 0 : index
    %77 = vector.load %arg6[%c0_55, %c0_56] : memref<256x256xf32, #tpu.memory_space<vmem>>, vector<256x256xf32>
    %cst_57 = arith.constant dense<0.000000e+00> : vector<8x256xf32>
    %78 = tpu.matmul %76, %77, %cst_57 {dimension_numbers = #tpu.dot_dimension_numbers<[1], [0], [0], [1], [0, 0, 1, 1], [], []>} : vector<8x256xf32>, vector<256x256xf32>, vector<8x256xf32> -> vector<8x256xf32>
    %c0_58 = arith.constant 0 : index
    %c0_59 = arith.constant 0 : index
    %79 = vector.load %arg7[%c0_58, %c0_59] : memref<1x256xf32, #tpu.memory_space<vmem>>, vector<1x256xf32>
    %80 = vector.broadcast %79 : vector<1x256xf32> to vector<8x256xf32>
    %81 = arith.addf %78, %80 : vector<8x256xf32>
    %c0_60 = arith.constant 0 : index
    %c0_61 = arith.constant 0 : index
    %82 = vector.load %arg12[%c0_60, %c0_61] : memref<8x256xf32, #tpu.memory_space<vmem>>, vector<8x256xf32>
    tpu.vector_store %arg12[%c0_60, %c0_61], %81 {strides = array<i32>} : memref<8x256xf32, #tpu.memory_space<vmem>>, vector<8x256xf32>,
    %cst_62 = arith.constant 0.000000e+00 : f32
    %83 = vector.broadcast %cst_62 : f32 to vector<1x256xf32>
    %c0_i32_63 = arith.constant 0 : i32
    %84 = arith.index_cast %c0_i32_63 : i32 to index
    %c0_64 = arith.constant 0 : index
    %85 = vector.load %arg12[%84, %c0_64] : memref<8x256xf32, #tpu.memory_space<vmem>>, vector<1x256xf32>
    %c0_65 = arith.constant 0 : index
    %c0_66 = arith.constant 0 : index
    %86 = vector.load %arg8[%c0_65, %c0_66] : memref<256x256xf32, #tpu.memory_space<vmem>>, vector<256x256xf32>
    %cst_67 = arith.constant dense<0.000000e+00> : vector<1x256xf32>
    %87 = tpu.matmul %83, %86, %cst_67 {dimension_numbers = #tpu.dot_dimension_numbers<[1], [0], [0], [1], [0, 0, 1, 1], [], []>} : vector<1x256xf32>, vector<256x256xf32>, vector<1x256xf32> -> vector<1x256xf32>
    %88 = arith.addf %85, %87 : vector<1x256xf32>
    %89 = math.tanh %88 : vector<1x256xf32>
    %90 = arith.index_cast %c0_i32_63 : i32 to index
    %c0_68 = arith.constant 0 : index
    %91 = vector.load %arg12[%90, %c0_68] : memref<8x256xf32, #tpu.memory_space<vmem>>, vector<1x256xf32>
    tpu.vector_store %arg12[%90, %c0_68], %89 {strides = array<i32>} : memref<8x256xf32, #tpu.memory_space<vmem>>, vector<1x256xf32>,
    %c1_i32_69 = arith.constant 1 : i32
    %92 = arith.index_cast %c1_i32_69 : i32 to index
    %c0_70 = arith.constant 0 : index
    %93 = vector.load %arg12[%92, %c0_70] : memref<8x256xf32, #tpu.memory_space<vmem>>, vector<1x256xf32>
    %c0_71 = arith.constant 0 : index
    %c0_72 = arith.constant 0 : index
    %94 = vector.load %arg8[%c0_71, %c0_72] : memref<256x256xf32, #tpu.memory_space<vmem>>, vector<256x256xf32>
    %cst_73 = arith.constant dense<0.000000e+00> : vector<1x256xf32>
    %95 = tpu.matmul %89, %94, %cst_73 {dimension_numbers = #tpu.dot_dimension_numbers<[1], [0], [0], [1], [0, 0, 1, 1], [], []>} : vector<1x256xf32>, vector<256x256xf32>, vector<1x256xf32> -> vector<1x256xf32>
    %96 = arith.addf %93, %95 : vector<1x256xf32>
    %97 = math.tanh %96 : vector<1x256xf32>
    %98 = arith.index_cast %c1_i32_69 : i32 to index
    %c0_74 = arith.constant 0 : index
    %99 = vector.load %arg12[%98, %c0_74] : memref<8x256xf32, #tpu.memory_space<vmem>>, vector<1x256xf32>
    tpu.vector_store %arg12[%98, %c0_74], %97 {strides = array<i32>} : memref<8x256xf32, #tpu.memory_space<vmem>>, vector<1x256xf32>,
    %c2_i32_75 = arith.constant 2 : i32
    %100 = arith.index_cast %c2_i32_75 : i32 to index
    %c0_76 = arith.constant 0 : index
    %101 = vector.load %arg12[%100, %c0_76] : memref<8x256xf32, #tpu.memory_space<vmem>>, vector<1x256xf32>
    %c0_77 = arith.constant 0 : index
    %c0_78 = arith.constant 0 : index
    %102 = vector.load %arg8[%c0_77, %c0_78] : memref<256x256xf32, #tpu.memory_space<vmem>>, vector<256x256xf32>
    %cst_79 = arith.constant dense<0.000000e+00> : vector<1x256xf32>
    %103 = tpu.matmul %97, %102, %cst_79 {dimension_numbers = #tpu.dot_dimension_numbers<[1], [0], [0], [1], [0, 0, 1, 1], [], []>} : vector<1x256xf32>, vector<256x256xf32>, vector<1x256xf32> -> vector<1x256xf32>
    %104 = arith.addf %101, %103 : vector<1x256xf32>
    %105 = math.tanh %104 : vector<1x256xf32>
    %106 = arith.index_cast %c2_i32_75 : i32 to index
    %c0_80 = arith.constant 0 : index
    %107 = vector.load %arg12[%106, %c0_80] : memref<8x256xf32, #tpu.memory_space<vmem>>, vector<1x256xf32>
    tpu.vector_store %arg12[%106, %c0_80], %105 {strides = array<i32>} : memref<8x256xf32, #tpu.memory_space<vmem>>, vector<1x256xf32>,
    %c3_i32_81 = arith.constant 3 : i32
    %108 = arith.index_cast %c3_i32_81 : i32 to index
    %c0_82 = arith.constant 0 : index
    %109 = vector.load %arg12[%108, %c0_82] : memref<8x256xf32, #tpu.memory_space<vmem>>, vector<1x256xf32>
    %c0_83 = arith.constant 0 : index
    %c0_84 = arith.constant 0 : index
    %110 = vector.load %arg8[%c0_83, %c0_84] : memref<256x256xf32, #tpu.memory_space<vmem>>, vector<256x256xf32>
    %cst_85 = arith.constant dense<0.000000e+00> : vector<1x256xf32>
    %111 = tpu.matmul %105, %110, %cst_85 {dimension_numbers = #tpu.dot_dimension_numbers<[1], [0], [0], [1], [0, 0, 1, 1], [], []>} : vector<1x256xf32>, vector<256x256xf32>, vector<1x256xf32> -> vector<1x256xf32>
    %112 = arith.addf %109, %111 : vector<1x256xf32>
    %113 = math.tanh %112 : vector<1x256xf32>
    %114 = arith.index_cast %c3_i32_81 : i32 to index
    %c0_86 = arith.constant 0 : index
    %115 = vector.load %arg12[%114, %c0_86] : memref<8x256xf32, #tpu.memory_space<vmem>>, vector<1x256xf32>
    tpu.vector_store %arg12[%114, %c0_86], %113 {strides = array<i32>} : memref<8x256xf32, #tpu.memory_space<vmem>>, vector<1x256xf32>,
    %c4_i32_87 = arith.constant 4 : i32
    %116 = arith.index_cast %c4_i32_87 : i32 to index
    %c0_88 = arith.constant 0 : index
    %117 = vector.load %arg12[%116, %c0_88] : memref<8x256xf32, #tpu.memory_space<vmem>>, vector<1x256xf32>
    %c0_89 = arith.constant 0 : index
    %c0_90 = arith.constant 0 : index
    %118 = vector.load %arg8[%c0_89, %c0_90] : memref<256x256xf32, #tpu.memory_space<vmem>>, vector<256x256xf32>
    %cst_91 = arith.constant dense<0.000000e+00> : vector<1x256xf32>
    %119 = tpu.matmul %113, %118, %cst_91 {dimension_numbers = #tpu.dot_dimension_numbers<[1], [0], [0], [1], [0, 0, 1, 1], [], []>} : vector<1x256xf32>, vector<256x256xf32>, vector<1x256xf32> -> vector<1x256xf32>
    %120 = arith.addf %117, %119 : vector<1x256xf32>
    %121 = math.tanh %120 : vector<1x256xf32>
    %122 = arith.index_cast %c4_i32_87 : i32 to index
    %c0_92 = arith.constant 0 : index
    %123 = vector.load %arg12[%122, %c0_92] : memref<8x256xf32, #tpu.memory_space<vmem>>, vector<1x256xf32>
    tpu.vector_store %arg12[%122, %c0_92], %121 {strides = array<i32>} : memref<8x256xf32, #tpu.memory_space<vmem>>, vector<1x256xf32>,
    %c5_i32_93 = arith.constant 5 : i32
    %124 = arith.index_cast %c5_i32_93 : i32 to index
    %c0_94 = arith.constant 0 : index
    %125 = vector.load %arg12[%124, %c0_94] : memref<8x256xf32, #tpu.memory_space<vmem>>, vector<1x256xf32>
    %c0_95 = arith.constant 0 : index
    %c0_96 = arith.constant 0 : index
    %126 = vector.load %arg8[%c0_95, %c0_96] : memref<256x256xf32, #tpu.memory_space<vmem>>, vector<256x256xf32>
    %cst_97 = arith.constant dense<0.000000e+00> : vector<1x256xf32>
    %127 = tpu.matmul %121, %126, %cst_97 {dimension_numbers = #tpu.dot_dimension_numbers<[1], [0], [0], [1], [0, 0, 1, 1], [], []>} : vector<1x256xf32>, vector<256x256xf32>, vector<1x256xf32> -> vector<1x256xf32>
    %128 = arith.addf %125, %127 : vector<1x256xf32>
    %129 = math.tanh %128 : vector<1x256xf32>
    %130 = arith.index_cast %c5_i32_93 : i32 to index
    %c0_98 = arith.constant 0 : index
    %131 = vector.load %arg12[%130, %c0_98] : memref<8x256xf32, #tpu.memory_space<vmem>>, vector<1x256xf32>
    tpu.vector_store %arg12[%130, %c0_98], %129 {strides = array<i32>} : memref<8x256xf32, #tpu.memory_space<vmem>>, vector<1x256xf32>,
    %c6_i32_99 = arith.constant 6 : i32
    %132 = arith.index_cast %c6_i32_99 : i32 to index
    %c0_100 = arith.constant 0 : index
    %133 = vector.load %arg12[%132, %c0_100] : memref<8x256xf32, #tpu.memory_space<vmem>>, vector<1x256xf32>
    %c0_101 = arith.constant 0 : index
    %c0_102 = arith.constant 0 : index
    %134 = vector.load %arg8[%c0_101, %c0_102] : memref<256x256xf32, #tpu.memory_space<vmem>>, vector<256x256xf32>
    %cst_103 = arith.constant dense<0.000000e+00> : vector<1x256xf32>
    %135 = tpu.matmul %129, %134, %cst_103 {dimension_numbers = #tpu.dot_dimension_numbers<[1], [0], [0], [1], [0, 0, 1, 1], [], []>} : vector<1x256xf32>, vector<256x256xf32>, vector<1x256xf32> -> vector<1x256xf32>
    %136 = arith.addf %133, %135 : vector<1x256xf32>
    %137 = math.tanh %136 : vector<1x256xf32>
    %138 = arith.index_cast %c6_i32_99 : i32 to index
    %c0_104 = arith.constant 0 : index
    %139 = vector.load %arg12[%138, %c0_104] : memref<8x256xf32, #tpu.memory_space<vmem>>, vector<1x256xf32>
    tpu.vector_store %arg12[%138, %c0_104], %137 {strides = array<i32>} : memref<8x256xf32, #tpu.memory_space<vmem>>, vector<1x256xf32>,
    %c7_i32_105 = arith.constant 7 : i32
    %140 = arith.index_cast %c7_i32_105 : i32 to index
    %c0_106 = arith.constant 0 : index
    %141 = vector.load %arg12[%140, %c0_106] : memref<8x256xf32, #tpu.memory_space<vmem>>, vector<1x256xf32>
    %c0_107 = arith.constant 0 : index
    %c0_108 = arith.constant 0 : index
    %142 = vector.load %arg8[%c0_107, %c0_108] : memref<256x256xf32, #tpu.memory_space<vmem>>, vector<256x256xf32>
    %cst_109 = arith.constant dense<0.000000e+00> : vector<1x256xf32>
    %143 = tpu.matmul %137, %142, %cst_109 {dimension_numbers = #tpu.dot_dimension_numbers<[1], [0], [0], [1], [0, 0, 1, 1], [], []>} : vector<1x256xf32>, vector<256x256xf32>, vector<1x256xf32> -> vector<1x256xf32>
    %144 = arith.addf %141, %143 : vector<1x256xf32>
    %145 = math.tanh %144 : vector<1x256xf32>
    %146 = arith.index_cast %c7_i32_105 : i32 to index
    %c0_110 = arith.constant 0 : index
    %147 = vector.load %arg12[%146, %c0_110] : memref<8x256xf32, #tpu.memory_space<vmem>>, vector<1x256xf32>
    tpu.vector_store %arg12[%146, %c0_110], %145 {strides = array<i32>} : memref<8x256xf32, #tpu.memory_space<vmem>>, vector<1x256xf32>,
    %c8_i32_111 = arith.constant 8 : i32
    %c0_112 = arith.constant 0 : index
    %c0_113 = arith.constant 0 : index
    %148 = vector.load %arg12[%c0_112, %c0_113] : memref<8x256xf32, #tpu.memory_space<vmem>>, vector<8x256xf32>
    %149 = vector.extract_strided_slice %148 {offsets = [0, 0], sizes = [8, 128], strides = [1, 1]} : vector<8x256xf32> to vector<8x128xf32>
    %150 = vector.extract_strided_slice %148 {offsets = [0, 128], sizes = [8, 128], strides = [1, 1]} : vector<8x256xf32> to vector<8x128xf32>
    %151 = arith.addf %149, %150 : vector<8x128xf32>
    %cst_114 = arith.constant 5.000000e-01 : f32
    %152 = vector.broadcast %cst_114 : f32 to vector<8x128xf32>
    %153 = arith.mulf %152, %151 : vector<8x128xf32>
    %154 = math.tanh %153 : vector<8x128xf32>
    %c0_115 = arith.constant 0 : index
    %c0_116 = arith.constant 0 : index
    %155 = vector.load %arg9[%c0_115, %c0_116] : memref<128x1xf32, #tpu.memory_space<vmem>>, vector<128x1xf32>
    %cst_117 = arith.constant dense<0.000000e+00> : vector<8x1xf32>
    %156 = tpu.matmul %154, %155, %cst_117 {dimension_numbers = #tpu.dot_dimension_numbers<[1], [0], [0], [1], [0, 0, 1, 1], [], []>} : vector<8x128xf32>, vector<128x1xf32>, vector<8x1xf32> -> vector<8x1xf32>
    %c0_118 = arith.constant 0 : index
    %c0_119 = arith.constant 0 : index
    %157 = vector.load %arg10[%c0_118, %c0_119] : memref<1x1xf32, #tpu.memory_space<vmem>>, vector<1x1xf32>
    %158 = vector.broadcast %157 : vector<1x1xf32> to vector<8x1xf32>
    %159 = arith.addf %156, %158 : vector<8x1xf32>
    %c0_120 = arith.constant 0 : index
    %c0_121 = arith.constant 0 : index
    %160 = vector.load %arg11[%c0_120, %c0_121] : memref<8x1xf32, #tpu.memory_space<vmem>>, vector<8x1xf32>
    tpu.vector_store %arg11[%c0_120, %c0_121], %159 {strides = array<i32>} : memref<8x1xf32, #tpu.memory_space<vmem>>, vector<8x1xf32>,
    return
  }
}

</mosaic_0001>

<bundles_post_ra>
// kernel: tpu_custom_call.1
= control target key start
LH: loop header
LB: loop body
LE: loop exit
PB: predicated region body
PF: predicated region fallthrough
CT: control target
= control target key end

     0   :  { %s6194_s0 = inlined_call_operand.vmem [shape: f32[8,384], index: 0, kind: input, shape index: {}]   ;;  %s6195_s1 = inlined_call_operand.vmem [shape: f32[8,384], index: 1, kind: input, shape index: {}]   ;;  %s6196_s2 = inlined_call_operand.hbm [shape: f32[384,128], index: 2, kind: input, shape index: {}]   ;;  %s6197_s3 = inlined_call_operand.hbm [shape: f32[384,128], index: 3, kind: input, shape index: {}]   ;;  %s6198_s4 = inlined_call_operand.vmem [shape: f32[1,256], index: 4, kind: input, shape index: {}]   ;;  %s6199_s5 = inlined_call_operand.hbm [shape: f32[256,256], index: 5, kind: input, shape index: {}]   ;;  %s6200_s6 = inlined_call_operand.hbm [shape: f32[256,256], index: 6, kind: input, shape index: {}]   ;;  %s6201_s7 = inlined_call_operand.vmem [shape: f32[1,256], index: 7, kind: input, shape index: {}]   ;;  %s6202_s8 = inlined_call_operand.hbm [shape: f32[256,256], index: 8, kind: input, shape index: {}]   ;;  %s6203_s9 = inlined_call_operand.vmem [shape: f32[128,1], index: 9, kind: input, shape index: {}]   ;;  %s6204_s10 = inlined_call_operand.<no memory space> [shape: f32[1,1], index: 10, kind: input, shape index: {}]   ;;  %s6205_s11 = inlined_call_operand.vmem [shape: f32[8,1], index: 11, kind: output, shape index: {}]  }
   0x1   :  { %v16_v0 = vstv %s6204_s10 }
   0x2   :  { %17 = vst [vmem:[#allocation3] sm:$0x1] %v16_v0 }
   0x3   :  { %18 = vsyncpa [#allocation5], 0 }
   0x4   :  { %19 = vsyncpa [#allocation7], 0 }
   0x5   :  { %20 = vsyncpa [#allocation10], 0  ;;  %s5071_s19 = smov [#allocation6]   ;;  %s4955_s23 = scalar_lea.hbm %s6197_s3, 6144 }
   0x6   :  { %s42_s20 = sshll.u32 %s5071_s19, 4  ;;  %p4956_p0 = scmp.ne.s32.totalorder %s6197_s3, %s4955_s23  ;;  %s43_s20 = int_to_ptr.vmem [resolvable:$true] %s42_s20 }
   0x7   :  { %p4959_p1 = scmp.lt.u32.totalorder %s4955_s23, %s6197_s3 }
   0x9   :  { %p4961_p2 = pnand %p4959_p1, %p4956_p0 }
   0xb   :  { %4964 = shalt.err (!%p4961_p2)
}
   0xc   :  { %s4965_s10 = scalar_lea.vmem %s43_s20, 6144  ;;  %p4970_p4 = scmp.lt.s32.totalorder %s43_s20, %s43_s20 }
   0xd   :  { %p4966_p3 = scmp.ne.s32.totalorder %s43_s20, %s4965_s10  ;;  %p4971_p5 = scmp.lt.s32.totalorder %s4965_s10, %s4965_s10 }
   0xf   :  { %p4972_p6 = por %p4971_p5, %p4970_p4 }
  0x11   :  { %p4973_p7 = pnand %p4972_p6, %p4966_p3 }
  0x13   :  { %4976 = shalt.err (!%p4973_p7)
}
  0x14   :  { %s5072_s28 = smov 128   ;;  %s5073_s29 = smov 8  }
  0x15   :  { %48 = dma.hbm_to_vmem [thread:$0]  %s6197_s3, 6144, %s43_s20, [#allocation7], %s5072_s28, %s5072_s28, %s5073_s29  }
  0x16   :  { %s5074_s13 = smov [#allocation9]   ;;  %s5075_s15 = smov [#allocation4]  }
  0x17   :  { %s68_s14 = sshll.u32 %s5074_s13, 4  ;;  %s30_s16 = sshll.u32 %s5075_s15, 4  ;;  %s69_s14 = int_to_ptr.vmem [resolvable:$true] %s68_s14  ;;  %s31_s16 = int_to_ptr.vmem [resolvable:$true] %s30_s16 }
  0x18   :  { %s4977_s19 = scalar_lea.hbm %s6200_s6, 8192 }
  0x19   :  { %p4978_p8 = scmp.ne.s32.totalorder %s6200_s6, %s4977_s19  ;;  %p4981_p9 = scmp.lt.u32.totalorder %s4977_s19, %s6200_s6 }
  0x1b   :  { %p4983_p10 = pnand %p4981_p9, %p4978_p8 }
  0x1d   :  { %4986 = shalt.err (!%p4983_p10)
}
  0x1e   :  { %s4987_s3 = scalar_lea.vmem %s69_s14, 8192  ;;  %p4992_p12 = scmp.lt.s32.totalorder %s69_s14, %s69_s14 }
  0x1f   :  { %p4988_p11 = scmp.ne.s32.totalorder %s69_s14, %s4987_s3  ;;  %p4993_p13 = scmp.lt.s32.totalorder %s4987_s3, %s4987_s3 }
  0x21   :  { %p4994_p0 = por %p4993_p13, %p4992_p12 }
  0x23   :  { %p4995_p1 = pnand %p4994_p0, %p4988_p11 }
  0x25   :  { %4998 = shalt.err (!%p4995_p1)
}
  0x26   :  { %s5076_s20 = smov 256   ;;  %s5077_s25 = smov 16  }
  0x27   :  { %74 = dma.hbm_to_vmem [thread:$0]  %s6200_s6, 8192, %s69_s14, [#allocation10], %s5076_s20, %s5076_s20, %s5077_s25  }
  0x28   :  { %s4999_s12 = scalar_lea.hbm %s6196_s2, 6144 }
  0x29   :  { %p5000_p2 = scmp.ne.s32.totalorder %s6196_s2, %s4999_s12  ;;  %p5003_p3 = scmp.lt.u32.totalorder %s4999_s12, %s6196_s2 }
  0x2b   :  { %p5005_p4 = pnand %p5003_p3, %p5000_p2 }
  0x2d   :  { %5008 = shalt.err (!%p5005_p4)
}
  0x2e   :  { %s5009_s19 = scalar_lea.vmem %s31_s16, 6144  ;;  %p5014_p6 = scmp.lt.s32.totalorder %s31_s16, %s31_s16 }
  0x2f   :  { %p5010_p5 = scmp.ne.s32.totalorder %s31_s16, %s5009_s19  ;;  %p5015_p7 = scmp.lt.s32.totalorder %s5009_s19, %s5009_s19 }
  0x31   :  { %p5016_p8 = por %p5015_p7, %p5014_p6 }
  0x33   :  { %p5017_p9 = pnand %p5016_p8, %p5010_p5 }
  0x35   :  { %5020 = shalt.err (!%p5017_p9)
}
  0x36   :  { %36 = dma.hbm_to_vmem [thread:$0]  %s6196_s2, 6144, %s31_s16, [#allocation5], %s5072_s28, %s5072_s28, %s5073_s29  }
  0x37   :  { %s5078_s21 = smov [#allocation8]   ;;  %s5079_s23 = smov [#allocation11]  }
  0x38   :  { %s56_s22 = sshll.u32 %s5078_s21, 4  ;;  %s82_s24 = sshll.u32 %s5079_s23, 4  ;;  %s57_s22 = int_to_ptr.vmem [resolvable:$true] %s56_s22  ;;  %s83_s24 = int_to_ptr.vmem [resolvable:$true] %s82_s24 }
  0x39   :  { %s5021_s27 = scalar_lea.hbm %s6199_s5, 8192 }
  0x3a   :  { %p5022_p10 = scmp.ne.s32.totalorder %s6199_s5, %s5021_s27  ;;  %p5025_p11 = scmp.lt.u32.totalorder %s5021_s27, %s6199_s5 }
  0x3c   :  { %p5027_p12 = pnand %p5025_p11, %p5022_p10 }
  0x3e   :  { %5030 = shalt.err (!%p5027_p12)
}
  0x3f   :  { %s5031_s2 = scalar_lea.vmem %s57_s22, 8192  ;;  %p5036_p0 = scmp.lt.s32.totalorder %s57_s22, %s57_s22 }
  0x40   :  { %p5032_p13 = scmp.ne.s32.totalorder %s57_s22, %s5031_s2  ;;  %p5037_p1 = scmp.lt.s32.totalorder %s5031_s2, %s5031_s2 }
  0x42   :  { %p5038_p2 = por %p5037_p1, %p5036_p0 }
  0x44   :  { %p5039_p3 = pnand %p5038_p2, %p5032_p13 }
  0x46   :  { %5042 = shalt.err (!%p5039_p3)
}
  0x47   :  { %62 = dma.hbm_to_vmem [thread:$0]  %s6199_s5, 8192, %s57_s22, [#allocation7], %s5076_s20, %s5076_s20, %s5077_s25  }
  0x48   :  { %s5043_s17 = scalar_lea.hbm %s6202_s8, 8192 }
  0x49   :  { %p5044_p4 = scmp.ne.s32.totalorder %s6202_s8, %s5043_s17  ;;  %p5047_p5 = scmp.lt.u32.totalorder %s5043_s17, %s6202_s8 }
  0x4b   :  { %p5049_p6 = pnand %p5047_p5, %p5044_p4 }
  0x4d   :  { %5052 = shalt.err (!%p5049_p6)
}
  0x4e   :  { %s5053_s21 = scalar_lea.vmem %s83_s24, 8192  ;;  %p5058_p8 = scmp.lt.s32.totalorder %s83_s24, %s83_s24 }
  0x4f   :  { %p5054_p7 = scmp.ne.s32.totalorder %s83_s24, %s5053_s21  ;;  %p5059_p9 = scmp.lt.s32.totalorder %s5053_s21, %s5053_s21 }
  0x51   :  { %p5060_p10 = por %p5059_p9, %p5058_p8 }
  0x53   :  { %p5061_p11 = pnand %p5060_p10, %p5054_p7 }
  0x55   :  { %5064 = shalt.err (!%p5061_p11)
}
  0x56   :  { %88 = dma.hbm_to_vmem [thread:$0]  %s6202_s8, 8192, %s83_s24, [#allocation10], %s5076_s20, %s5076_s20, %s5077_s25  }
  0x57   :  { %5065 = dma.done.wait [#allocation5], 6144  }
  0x58   :  { %5066 = vsyncadd [#allocation5], 4294961152 }
  0x59   :  { %5067 = dma.done.wait [#allocation7], 14336  }
  0x5a   :  { %5068 = vsyncadd [#allocation7], 4294952960 }
  0x5b   :  { %5069 = dma.done.wait [#allocation10], 16384  }
  0x5c   :  { %5070 = vsyncadd [#allocation10], 4294950912  ;;  %v5080_v1 = vmov 0.0|0.0   ;;  %vm5081_vm0 = vmmov 0   ;;  %v5082_v2 = vmov 0.0   ;;  %v127_v3 = vld [vmem:[#allocation4 + $0x80] sm:$0xff] }
  0x5d   :  { %3716 = vmatprep.subr.bf16.mxu1 %v5080_v1  ;;  %3611 = vmatprep.mubr.msk.f32.mxu1 %vm5081_vm0, %v5082_v2  ;;  %v128_v4 = vld [vmem:[#allocation4 + $0x88] sm:$0xff]  ;;  %v111_v5 = vld [vmem:[#allocation4] sm:$0xff]  ;;  %v129_v8 = vld [vmem:[#allocation4 + $0x90] sm:$0xff]  ;;  %vm3448_vm2 = vcmask 7168  }
  0x5e   :  { %v3684_v6 = vpack.c.bf16 %v128_v4, %v127_v3  ;;  %v112_v7 = vld [vmem:[#allocation4 + $0x8] sm:$0xff]  ;;  %v130_v9 = vld [vmem:[#allocation4 + $0x98] sm:$0xff]  ;;  %v143_v12 = vld [vmem:[#allocation4 + $0x100] sm:$0xff] }
  0x5f   :  { %v3686_v10 = vpack.c.bf16 %v112_v7, %v111_v5  ;;  %v3688_v11 = vpack.c.bf16 %v130_v9, %v129_v8  ;;  %v144_v13 = vld [vmem:[#allocation4 + $0x108] sm:$0xff]  ;;  %v113_v14 = vld [vmem:[#allocation4 + $0x10] sm:$0xff]  ;;  %v114_v16 = vld [vmem:[#allocation4 + $0x18] sm:$0xff] }
  0x60   :  { %3685 = vmatprep.subr.bf16.mxu0 %v3684_v6  ;;  %v3717_v15 = vpack.c.bf16 %v144_v13, %v143_v12  ;;  %v131_v17 = vld [vmem:[#allocation4 + $0xa0] sm:$0xff]  ;;  %v132_v18 = vld [vmem:[#allocation4 + $0xa8] sm:$0xff]  ;;  %v3690_v19 = vpack.c.bf16 %v114_v16, %v113_v14  ;;  %v145_v20 = vld [vmem:[#allocation4 + $0x110] sm:$0xff] }
  0x61   :  { %3687 = vmatpush3.bf16.msra.mxu0 %v3686_v10  ;;  %v146_v21 = vld [vmem:[#allocation4 + $0x118] sm:$0xff]  ;;  %v3692_v22 = vpack.c.bf16 %v132_v18, %v131_v17  ;;  %v115_v24 = vld [vmem:[#allocation4 + $0x20] sm:$0xff]  ;;  %v116_v25 = vld [vmem:[#allocation4 + $0x28] sm:$0xff] }
  0x62   :  { %3689 = vmatprep.subr.bf16.mxu0 %v3688_v11  ;;  %3718 = vmatpush3.bf16.msra.mxu1 %v3717_v15  ;;  %v3720_v23 = vpack.c.bf16 %v146_v21, %v145_v20  ;;  %v133_v26 = vld [vmem:[#allocation4 + $0xb0] sm:$0xff]  ;;  %v134_v27 = vld [vmem:[#allocation4 + $0xb8] sm:$0xff]  ;;  %v147_v28 = vld [vmem:[#allocation4 + $0x120] sm:$0xff]  ;;  %v3694_v30 = vpack.c.bf16 %v116_v25, %v115_v24 }
  0x63   :  { %3719 = vmatprep.subr.bf16.mxu1 %v5080_v1  ;;  %v148_v29 = vld [vmem:[#allocation4 + $0x128] sm:$0xff]  ;;  %v3696_v31 = vpack.c.bf16 %v134_v27, %v133_v26  ;;  %v117_v33 = vld [vmem:[#allocation4 + $0x30] sm:$0xff]  ;;  %v118_v34 = vld [vmem:[#allocation4 + $0x38] sm:$0xff] }
  0x64   :  { %v3723_v32 = vpack.c.bf16 %v148_v29, %v147_v28  ;;  %v135_v35 = vld [vmem:[#allocation4 + $0xc0] sm:$0xff]  ;;  %v136_v36 = vld [vmem:[#allocation4 + $0xc8] sm:$0xff]  ;;  %v149_v37 = vld [vmem:[#allocation4 + $0x130] sm:$0xff]  ;;  %v3698_v39 = vpack.c.bf16 %v118_v34, %v117_v33 }
  0x65   :  { %3691 = vmatpush3.bf16.msra.mxu0 %v3690_v19  ;;  %v150_v38 = vld [vmem:[#allocation4 + $0x138] sm:$0xff]  ;;  %v3700_v40 = vpack.c.bf16 %v136_v36, %v135_v35  ;;  %v119_v42 = vld [vmem:[#allocation4 + $0x40] sm:$0xff]  ;;  %v120_v43 = vld [vmem:[#allocation4 + $0x48] sm:$0xff] }
  0x66   :  { %3693 = vmatprep.subr.bf16.mxu0 %v3692_v22  ;;  %3721 = vmatpush3.bf16.msra.mxu1 %v3720_v23  ;;  %v3726_v41 = vpack.c.bf16 %v150_v38, %v149_v37  ;;  %v137_v44 = vld [vmem:[#allocation4 + $0xd0] sm:$0xff]  ;;  %v138_v45 = vld [vmem:[#allocation4 + $0xd8] sm:$0xff]  ;;  %v151_v46 = vld [vmem:[#allocation4 + $0x140] sm:$0xff]  ;;  %v3702_v49 = vpack.c.bf16 %v120_v43, %v119_v42 }
  0x67   :  { %3722 = vmatprep.subr.bf16.mxu1 %v5080_v1  ;;  %v152_v47 = vld [vmem:[#allocation4 + $0x148] sm:$0xff]  ;;  %v109_v48 = vld [vmem:[%s6194_s0 + $0x8] sm:$0xff]  ;;  %v3704_v50 = vpack.c.bf16 %v138_v45, %v137_v44  ;;  %v139_v54 = vld [vmem:[#allocation4 + $0xe0] sm:$0xff] }
  0x68   :  { %223 = vmatprep.mubr.f32.mxu0 %v109_v48  ;;  %v3729_v51 = vpack.c.bf16 %v152_v47, %v151_v46  ;;  %v121_v52 = vld [vmem:[#allocation4 + $0x50] sm:$0xff]  ;;  %v122_v53 = vld [vmem:[#allocation4 + $0x58] sm:$0xff]  ;;  %v140_v55 = vld [vmem:[#allocation4 + $0xe8] sm:$0xff] }
  0x69   :  { %3695 = vmatpush3.bf16.msra.mxu0 %v3694_v30  ;;  %v153_v56 = vld [vmem:[#allocation4 + $0x150] sm:$0xff]  ;;  %v154_v57 = vld [vmem:[#allocation4 + $0x158] sm:$0xff]  ;;  %v3706_v58 = vpack.c.bf16 %v122_v53, %v121_v52  ;;  %v3708_v59 = vpack.c.bf16 %v140_v55, %v139_v54  ;;  %v123_v61 = vld [vmem:[#allocation4 + $0x60] sm:$0xff] }
  0x6a   :  { %3697 = vmatprep.subr.bf16.mxu0 %v3696_v31  ;;  %3724 = vmatpush3.bf16.msra.mxu1 %v3723_v32  ;;  %v3732_v60 = vpack.c.bf16 %v154_v57, %v153_v56  ;;  %v124_v62 = vld [vmem:[#allocation4 + $0x68] sm:$0xff]  ;;  %v141_v63 = vld [vmem:[#allocation4 + $0xf0] sm:$0xff]  ;;  %v142_v0 = vld [vmem:[#allocation4 + $0xf8] sm:$0xff] }
  0x6b   :  { %3725 = vmatprep.subr.bf16.mxu1 %v5080_v1  ;;  %v155_v3 = vld [vmem:[#allocation4 + $0x160] sm:$0xff]  ;;  %v156_v4 = vld [vmem:[#allocation4 + $0x168] sm:$0xff]  ;;  %v3710_v5 = vpack.c.bf16 %v124_v62, %v123_v61  ;;  %v3712_v6 = vpack.c.bf16 %v142_v0, %v141_v63  ;;  %v125_v8 = vld [vmem:[#allocation4 + $0x70] sm:$0xff] }
  0x6c   :  { %v3735_v7 = vpack.c.bf16 %v156_v4, %v155_v3  ;;  %v126_v9 = vld [vmem:[#allocation4 + $0x78] sm:$0xff]  ;;  %v157_v10 = vld [vmem:[#allocation4 + $0x170] sm:$0xff]  ;;  %v318_v12 = vld [vmem:[#allocation6 + $0x80] sm:$0xff] }
  0x6d   :  { %3699 = vmatpush3.bf16.msra.mxu0 %v3698_v39  ;;  %v158_v11 = vld [vmem:[#allocation4 + $0x178] sm:$0xff]  ;;  %v319_v13 = vld [vmem:[#allocation6 + $0x88] sm:$0xff]  ;;  %v3714_v14 = vpack.c.bf16 %v126_v9, %v125_v8  ;;  %v302_v17 = vld [vmem:[#allocation6] sm:$0xff] }
  0x6e   :  { %3701 = vmatprep.subr.bf16.mxu0 %v3700_v40  ;;  %3727 = vmatpush3.bf16.msra.mxu1 %v3726_v41  ;;  %v3738_v15 = vpack.c.bf16 %v158_v11, %v157_v10  ;;  %v3740_v16 = vpack.c.bf16 %v319_v13, %v318_v12  ;;  %v303_v18 = vld [vmem:[#allocation6 + $0x8] sm:$0xff]  ;;  %v320_v19 = vld [vmem:[#allocation6 + $0x90] sm:$0xff]  ;;  %v321_v20 = vld [vmem:[#allocation6 + $0x98] sm:$0xff] }
  0x6f   :  { %3728 = vmatprep.subr.bf16.mxu1 %v5080_v1  ;;  %v334_v21 = vld [vmem:[#allocation6 + $0x100] sm:$0xff]  ;;  %v335_v22 = vld [vmem:[#allocation6 + $0x108] sm:$0xff]  ;;  %v3742_v24 = vpack.c.bf16 %v303_v18, %v302_v17  ;;  %v3744_v26 = vpack.c.bf16 %v321_v20, %v320_v19  ;;  %v304_v28 = vld [vmem:[#allocation6 + $0x10] sm:$0xff] }
  0x70   :  { %v108_v23 = vld [vmem:[%s6194_s0] sm:$0xff]  ;;  %v110_v25 = vld [vmem:[%s6194_s0 + $0x10] sm:$0xff]  ;;  %v3773_v27 = vpack.c.bf16 %v335_v22, %v334_v21  ;;  %v300_v34 = vld [vmem:[%s6195_s1 + $0x8] sm:$0xff] }
  0x71   :  { %3703 = vmatpush3.bf16.msra.mxu0 %v3702_v49  ;;  %v305_v29 = vld [vmem:[#allocation6 + $0x18] sm:$0xff]  ;;  %v322_v30 = vld [vmem:[#allocation6 + $0xa0] sm:$0xff]  ;;  %v323_v31 = vld [vmem:[#allocation6 + $0xa8] sm:$0xff] }
  0x72   :  { %3705 = vmatprep.subr.bf16.mxu0 %v3704_v50  ;;  %3730 = vmatpush3.bf16.msra.mxu1 %v3729_v51  ;;  %v336_v32 = vld [vmem:[#allocation6 + $0x110] sm:$0xff]  ;;  %v337_v33 = vld [vmem:[#allocation6 + $0x118] sm:$0xff]  ;;  %v3746_v35 = vpack.c.bf16 %v305_v29, %v304_v28  ;;  %v3748_v36 = vpack.c.bf16 %v323_v31, %v322_v30  ;;  %v306_v38 = vld [vmem:[#allocation6 + $0x20] sm:$0xff] }
  0x73   :  { %3731 = vmatprep.subr.bf16.mxu1 %v5080_v1  ;;  %v3776_v37 = vpack.c.bf16 %v337_v33, %v336_v32  ;;  %v307_v39 = vld [vmem:[#allocation6 + $0x28] sm:$0xff]  ;;  %v324_v40 = vld [vmem:[#allocation6 + $0xb0] sm:$0xff]  ;;  %v325_v41 = vld [vmem:[#allocation6 + $0xb8] sm:$0xff] }
  0x74   :  { %v338_v42 = vld [vmem:[#allocation6 + $0x120] sm:$0xff]  ;;  %v339_v43 = vld [vmem:[#allocation6 + $0x128] sm:$0xff]  ;;  %v3750_v44 = vpack.c.bf16 %v307_v39, %v306_v38  ;;  %v3752_v45 = vpack.c.bf16 %v325_v41, %v324_v40  ;;  %v308_v47 = vld [vmem:[#allocation6 + $0x30] sm:$0xff] }
  0x75   :  { %3707 = vmatpush3.bf16.msra.mxu0 %v3706_v58  ;;  %v3779_v46 = vpack.c.bf16 %v339_v43, %v338_v42  ;;  %v309_v48 = vld [vmem:[#allocation6 + $0x38] sm:$0xff]  ;;  %v326_v49 = vld [vmem:[#allocation6 + $0xc0] sm:$0xff]  ;;  %v327_v50 = vld [vmem:[#allocation6 + $0xc8] sm:$0xff] }
  0x76   :  { %3709 = vmatprep.subr.bf16.mxu0 %v3708_v59  ;;  %3733 = vmatpush3.bf16.msra.mxu1 %v3732_v60  ;;  %v340_v51 = vld [vmem:[#allocation6 + $0x130] sm:$0xff]  ;;  %v341_v52 = vld [vmem:[#allocation6 + $0x138] sm:$0xff]  ;;  %v3754_v53 = vpack.c.bf16 %v309_v48, %v308_v47  ;;  %v3756_v54 = vpack.c.bf16 %v327_v50, %v326_v49  ;;  %v310_v56 = vld [vmem:[#allocation6 + $0x40] sm:$0xff] }
  0x77   :  { %3734 = vmatprep.subr.bf16.mxu1 %v5080_v1  ;;  %v3782_v55 = vpack.c.bf16 %v341_v52, %v340_v51  ;;  %v311_v57 = vld [vmem:[#allocation6 + $0x48] sm:$0xff]  ;;  %v328_v58 = vld [vmem:[#allocation6 + $0xd0] sm:$0xff]  ;;  %v329_v59 = vld [vmem:[#allocation6 + $0xd8] sm:$0xff] }
  0x78   :  { %v342_v60 = vld [vmem:[#allocation6 + $0x140] sm:$0xff]  ;;  %v343_v61 = vld [vmem:[#allocation6 + $0x148] sm:$0xff]  ;;  %v3758_v62 = vpack.c.bf16 %v311_v57, %v310_v56  ;;  %v3760_v63 = vpack.c.bf16 %v329_v59, %v328_v58  ;;  %v312_v3 = vld [vmem:[#allocation6 + $0x50] sm:$0xff] }
  0x79   :  { %3711 = vmatpush3.bf16.msra.mxu0 %v3710_v5  ;;  %v3785_v0 = vpack.c.bf16 %v343_v61, %v342_v60  ;;  %v313_v4 = vld [vmem:[#allocation6 + $0x58] sm:$0xff]  ;;  %v330_v5 = vld [vmem:[#allocation6 + $0xe0] sm:$0xff]  ;;  %v315_v13 = vld [vmem:[#allocation6 + $0x68] sm:$0xff] }
  0x7a   :  { %3713 = vmatprep.subr.bf16.mxu0 %v3712_v6  ;;  %3736 = vmatpush3.bf16.msra.mxu1 %v3735_v7  ;;  %v331_v6 = vld [vmem:[#allocation6 + $0xe8] sm:$0xff]  ;;  %v344_v7 = vld [vmem:[#allocation6 + $0x150] sm:$0xff]  ;;  %v345_v8 = vld [vmem:[#allocation6 + $0x158] sm:$0xff]  ;;  %v3762_v9 = vpack.c.bf16 %v313_v4, %v312_v3 }
  0x7b   :  { %3737 = vmatprep.subr.bf16.mxu1 %v5080_v1  ;;  %v3764_v10 = vpack.c.bf16 %v331_v6, %v330_v5  ;;  %v3788_v11 = vpack.c.bf16 %v345_v8, %v344_v7  ;;  %v314_v12 = vld [vmem:[#allocation6 + $0x60] sm:$0xff]  ;;  %v347_v17 = vld [vmem:[#allocation6 + $0x168] sm:$0xff]  ;;  %v316_v21 = vld [vmem:[#allocation6 + $0x70] sm:$0xff] }
  0x7c   :  { %v3766_v18 = vpack.c.bf16 %v315_v13, %v314_v12  ;;  %v317_v22 = vld [vmem:[#allocation6 + $0x78] sm:$0xff]  ;;  %v507_v30 = vld [vmem:[#allocation8] sm:$0xff]  ;;  %v509_v31 = vld [vmem:[#allocation8 + $0x10] sm:$0xff] }
  0x7d   :  { %3715 = vmatpush3.bf16.msra.mxu0 %v3714_v14  ;;  %v332_v14 = vld [vmem:[#allocation6 + $0xf0] sm:$0xff]  ;;  %v512_v32 = vld [vmem:[#allocation8 + $0x28] sm:$0xff]  ;;  %v514_v33 = vld [vmem:[#allocation8 + $0x38] sm:$0xff] }
  0x7e   :  { %3739 = vmatpush3.bf16.msra.mxu1 %v3738_v15  ;;  %3741 = vmatprep.subr.bf16.mxu0 %v3740_v16  ;;  %v333_v15 = vld [vmem:[#allocation6 + $0xf8] sm:$0xff]  ;;  %v346_v16 = vld [vmem:[#allocation6 + $0x160] sm:$0xff]  ;;  %v513_v39 = vld [vmem:[#allocation8 + $0x30] sm:$0xff] }
  0x7f   :  { %3772 = vmatprep.subr.bf16.mxu1 %v5080_v1  ;;  %v3768_v19 = vpack.c.bf16 %v333_v15, %v332_v14  ;;  %v3791_v20 = vpack.c.bf16 %v347_v17, %v346_v16  ;;  %v511_v38 = vld [vmem:[#allocation8 + $0x20] sm:$0xff]  ;;  %v516_v40 = vld [vmem:[#allocation8 + $0x48] sm:$0xff]  ;;  %v518_v41 = vld [vmem:[#allocation8 + $0x58] sm:$0xff] }
  0x80   :  { %224 = vmatmul.mubr.f32.vlgmr.msra.gmra.mrb[0].mxu0 %v108_v23  ;;  %v348_v23 = vld [vmem:[#allocation6 + $0x170] sm:$0xff]  ;;  %v5269_v42 = vpack.c.bf16 %v513_v39, %v511_v38  ;;  %v5272_v43 = vpack.c.bf16 %v518_v41, %v516_v40  ;;  %v522_v47 = vld [vmem:[#allocation8 + $0x78] sm:$0xff]  ;;  %v519_v50 = vld [vmem:[#allocation8 + $0x60] sm:$0xff] }
  0x81   :  { %3743 = vmatpush3.bf16.msra.mxu0 %v3742_v24  ;;  %3612 = vmatmul.mubr.f32.vlgmr.msra.gmra.mrb[0].mxu1 %v110_v25  ;;  %v349_v24 = vld [vmem:[#allocation6 + $0x178] sm:$0xff]  ;;  %v508_v25 = vld [vmem:[#allocation8 + $0x8] sm:$0xff]  ;;  %v521_v51 = vld [vmem:[#allocation8 + $0x70] sm:$0xff] }
  0x82   :  { %3745 = vmatprep.subr.bf16.mxu0 %v3744_v26  ;;  %3774 = vmatpush3.bf16.msra.mxu1 %v3773_v27  ;;  %v510_v26 = vld [vmem:[#allocation8 + $0x18] sm:$0xff]  ;;  %v3770_v27 = vpack.c.bf16 %v317_v22, %v316_v21  ;;  %v3794_v28 = vpack.c.bf16 %v349_v24, %v348_v23  ;;  %v524_v52 = vld [vmem:[#allocation8 + $0x88] sm:$0xff]  ;;  %v523_v56 = vld [vmem:[#allocation8 + $0x80] sm:$0xff] }
  0x83   :  { %3775 = vmatprep.subr.bf16.mxu1 %v5080_v1  ;;  %414 = vmatprep.mubr.f32.mxu0 %v300_v34  ;;  %v5253_v29 = vpack.c.bf16 %v510_v26, %v508_v25  ;;  %v299_v34 = vld [vmem:[%s6195_s1] sm:$0xff]  ;;  %v530_v59 = vld [vmem:[#allocation8 + $0xb8] sm:$0xff]  ;;  %v531_v6 = vld [vmem:[#allocation8 + $0xc0] sm:$0xff] }
  0x84   :  { %3646 = vmatprep.mubr.msk.f32.mxu1 %vm5081_vm0, %v5082_v2  ;;  %v525_v57 = vld [vmem:[#allocation8 + $0x90] sm:$0xff]  ;;  %v528_v58 = vld [vmem:[#allocation8 + $0xa8] sm:$0xff]  ;;  %v534_v3 = vld [vmem:[#allocation8 + $0xd8] sm:$0xff] }
  0x85   :  { %3747 = vmatpush3.bf16.msra.mxu0 %v3746_v35  ;;  %v5259_v35 = vpack.c.bf16 %v509_v31, %v507_v30  ;;  %v5294_v60 = vpack.c.bf16 %v525_v57, %v523_v56  ;;  %v5297_v61 = vpack.c.bf16 %v530_v59, %v528_v58  ;;  %v533_v7 = vld [vmem:[#allocation8 + $0xd0] sm:$0xff]  ;;  %v536_v8 = vld [vmem:[#allocation8 + $0xe8] sm:$0xff]  ;;  %v535_v12 = vld [vmem:[#allocation8 + $0xe0] sm:$0xff] }
  0x86   :  { %3749 = vmatprep.subr.bf16.mxu0 %v3748_v36  ;;  %3777 = vmatpush3.bf16.msra.mxu1 %v3776_v37  ;;  %v301_v36 = vld [vmem:[%s6195_s1 + $0x10] sm:$0xff]  ;;  %v5265_v37 = vpack.c.bf16 %v514_v33, %v512_v32  ;;  %v537_v13 = vld [vmem:[#allocation8 + $0xf0] sm:$0xff]  ;;  %v540_v14 = vld [vmem:[#allocation8 + $0x108] sm:$0xff] }
  0x87   :  { %3778 = vmatprep.subr.bf16.mxu1 %v5080_v1  ;;  %v542_v15 = vld [vmem:[#allocation8 + $0x118] sm:$0xff]  ;;  %v5318_v16 = vpack.c.bf16 %v537_v13, %v535_v12  ;;  %v543_v24 = vld [vmem:[#allocation8 + $0x120] sm:$0xff]  ;;  %v545_v25 = vld [vmem:[#allocation8 + $0x130] sm:$0xff] }
  0x88   :  { %v5321_v17 = vpack.c.bf16 %v542_v15, %v540_v14  ;;  %v546_v21 = vld [vmem:[#allocation8 + $0x138] sm:$0xff]  ;;  %v548_v26 = vld [vmem:[#allocation8 + $0x148] sm:$0xff]  ;;  %v547_v31 = vld [vmem:[#allocation8 + $0x140] sm:$0xff] }
  0x89   :  { %3751 = vmatpush3.bf16.msra.mxu0 %v3750_v44  ;;  %v515_v44 = vld [vmem:[#allocation8 + $0x40] sm:$0xff]  ;;  %v549_v32 = vld [vmem:[#allocation8 + $0x150] sm:$0xff]  ;;  %v552_v33 = vld [vmem:[#allocation8 + $0x168] sm:$0xff] }
  0x8a   :  { %3753 = vmatprep.subr.bf16.mxu0 %v3752_v45  ;;  %3780 = vmatpush3.bf16.msra.mxu1 %v3779_v46  ;;  %v517_v45 = vld [vmem:[#allocation8 + $0x50] sm:$0xff]  ;;  %v520_v46 = vld [vmem:[#allocation8 + $0x68] sm:$0xff]  ;;  %v551_v39 = vld [vmem:[#allocation8 + $0x160] sm:$0xff] }
  0x8b   :  { %3781 = vmatprep.subr.bf16.mxu1 %v5080_v1  ;;  %v5278_v48 = vpack.c.bf16 %v517_v45, %v515_v44  ;;  %v5281_v49 = vpack.c.bf16 %v522_v47, %v520_v46  ;;  %v553_v40 = vld [vmem:[#allocation8 + $0x170] sm:$0xff]  ;;  %v556_v41 = vld [vmem:[#allocation8 + $0x188] sm:$0xff]  ;;  %v558_v44 = vld [vmem:[#allocation8 + $0x198] sm:$0xff] }
  0x8c   :  { %v5350_v45 = vpack.c.bf16 %v553_v40, %v551_v39  ;;  %v5353_v46 = vpack.c.bf16 %v558_v44, %v556_v41  ;;  %v555_v47 = vld [vmem:[#allocation8 + $0x180] sm:$0xff]  ;;  %v561_v58 = vld [vmem:[#allocation8 + $0x1b0] sm:$0xff]  ;;  %v564_v59 = vld [vmem:[#allocation8 + $0x1c8] sm:$0xff] }
  0x8d   :  { %3755 = vmatpush3.bf16.msra.mxu0 %v3754_v53  ;;  %v526_v53 = vld [vmem:[#allocation8 + $0x98] sm:$0xff]  ;;  %v559_v57 = vld [vmem:[#allocation8 + $0x1a0] sm:$0xff]  ;;  %v569_v14 = vld [vmem:[#allocation8 + $0x1f0] sm:$0xff] }
  0x8e   :  { %3757 = vmatprep.subr.bf16.mxu0 %v3756_v54  ;;  %3783 = vmatpush3.bf16.msra.mxu1 %v3782_v55  ;;  %v5286_v54 = vpack.c.bf16 %v521_v51, %v519_v50  ;;  %v5289_v55 = vpack.c.bf16 %v526_v53, %v524_v52  ;;  %v557_v50 = vld [vmem:[#allocation8 + $0x190] sm:$0xff]  ;;  %v560_v51 = vld [vmem:[#allocation8 + $0x1a8] sm:$0xff]  ;;  %v562_v52 = vld [vmem:[#allocation8 + $0x1b8] sm:$0xff] }
  0x8f   :  { %3784 = vmatprep.subr.bf16.mxu1 %v5080_v1  ;;  %v5358_v53 = vpack.c.bf16 %v557_v50, %v555_v47  ;;  %v5361_v56 = vpack.c.bf16 %v562_v52, %v560_v51  ;;  %v567_v13 = vld [vmem:[#allocation8 + $0x1e0] sm:$0xff] }
  0x90   :  { %v5382_v15 = vpack.c.bf16 %v569_v14, %v567_v13 }
  0x91   :  { %3759 = vmatpush3.bf16.msra.mxu0 %v3758_v62  ;;  %v527_v62 = vld [vmem:[#allocation8 + $0xa0] sm:$0xff] }
  0x92   :  { %3761 = vmatprep.subr.bf16.mxu0 %v3760_v63  ;;  %3786 = vmatpush3.bf16.msra.mxu1 %v3785_v0  ;;  %v529_v63 = vld [vmem:[#allocation8 + $0xb0] sm:$0xff]  ;;  %v532_v0 = vld [vmem:[#allocation8 + $0xc8] sm:$0xff] }
  0x93   :  { %3787 = vmatprep.subr.bf16.mxu1 %v5080_v1  ;;  %v5302_v4 = vpack.c.bf16 %v529_v63, %v527_v62  ;;  %v5305_v5 = vpack.c.bf16 %v534_v3, %v532_v0  ;;  %v566_v62 = vld [vmem:[#allocation8 + $0x1d8] sm:$0xff]  ;;  %v5366_v63 = vpack.c.bf16 %v561_v58, %v559_v57  ;;  %v563_v3 = vld [vmem:[#allocation8 + $0x1c0] sm:$0xff]  ;;  %v5083_v57 = vmov 1966171168  }
  0x94   :  { %v5369_v0 = vpack.c.bf16 %v566_v62, %v564_v59  ;;  %v646_v58 = vunpack.c.l.s4 %v5083_v57  ;;  %v1205_v57 = vld [vmem:[#allocation8 + $0xc8] sm:$0xff] }
  0x95   :  { %3763 = vmatpush3.bf16.msra.mxu0 %v3762_v9  ;;  %v538_v9 = vld [vmem:[#allocation8 + $0xf8] sm:$0xff] }
  0x96   :  { %3765 = vmatprep.subr.bf16.mxu0 %v3764_v10  ;;  %3789 = vmatpush3.bf16.msra.mxu1 %v3788_v11  ;;  %v5310_v10 = vpack.c.bf16 %v533_v7, %v531_v6  ;;  %v5313_v11 = vpack.c.bf16 %v538_v9, %v536_v8  ;;  %v565_v6 = vld [vmem:[#allocation8 + $0x1d0] sm:$0xff]  ;;  %v568_v7 = vld [vmem:[#allocation8 + $0x1e8] sm:$0xff]  ;;  %v570_v8 = vld [vmem:[#allocation8 + $0x1f8] sm:$0xff]  ;;  %v647_v59 = vunpack.c.0.s8 %v646_v58 }
  0x97   :  { %3790 = vmatprep.subr.bf16.mxu1 %v5080_v1  ;;  %v5374_v9 = vpack.c.bf16 %v565_v6, %v563_v3  ;;  %v5377_v12 = vpack.c.bf16 %v570_v8, %v568_v7  ;;  %v1207_v58 = vld [vmem:[#allocation8 + $0xd8] sm:$0xff] }
  0x99   :  { %3767 = vmatpush3.bf16.msra.mxu0 %v3766_v18  ;;  %v539_v18 = vld [vmem:[#allocation8 + $0x100] sm:$0xff] }
  0x9a   :  { %3769 = vmatprep.subr.bf16.mxu0 %v3768_v19  ;;  %3792 = vmatpush3.bf16.msra.mxu1 %v3791_v20  ;;  %v541_v19 = vld [vmem:[#allocation8 + $0x110] sm:$0xff]  ;;  %v544_v20 = vld [vmem:[#allocation8 + $0x128] sm:$0xff] }
  0x9b   :  { %3793 = vmatprep.subr.bf16.mxu1 %v5080_v1  ;;  %v5326_v22 = vpack.c.bf16 %v541_v19, %v539_v18  ;;  %v5329_v23 = vpack.c.bf16 %v546_v21, %v544_v20  ;;  %v490_v20 = vld [vmem:[%s6198_s4] sm:$0x3] }
  0x9d   :  { %3771 = vmatpush3.bf16.msra.mxu0 %v3770_v27  ;;  %v550_v27 = vld [vmem:[#allocation8 + $0x158] sm:$0xff] }
  0x9e   :  { %3795 = vmatpush3.bf16.msra.mxu1 %v3794_v28  ;;  %3797 = vmatprep.subr.bf16.mxu0 %v5253_v29  ;;  %v5334_v28 = vpack.c.bf16 %v545_v25, %v543_v24  ;;  %v5337_v30 = vpack.c.bf16 %v550_v27, %v548_v26 }
  0x9f   :  { %3861 = vmatprep.subr.bf16.mxu1 %v5253_v29 }
  0xa0   :  { %415 = vmatmul.mubr.f32.vlgmr.msra.gmra.mrb[2].mxu0 %v299_v34  ;;  %v554_v34 = vld [vmem:[#allocation8 + $0x178] sm:$0xff] }
  0xa1   :  { %3799 = vmatpush1.bf16.msra.mxu0 %v5259_v35  ;;  %3647 = vmatmul.mubr.f32.vlgmr.msra.gmra.mrb[2].mxu1 %v301_v36  ;;  %v5342_v36 = vpack.c.bf16 %v549_v32, %v547_v31  ;;  %v5345_v38 = vpack.c.bf16 %v554_v34, %v552_v33 }
  0xa2   :  { %3801 = vmatprep.subr.bf16.mxu0 %v5265_v37  ;;  %635 = vmatprep.mubr.f32.mxu0 %v5082_v2 }
  0xa3   :  { %3863 = vmatpush1.bf16.msra.mxu1 %v5259_v35 }
  0xa4   :  { %3865 = vmatprep.subr.bf16.mxu1 %v5265_v37 }
  0xa5   :  { %3803 = vmatpush1.bf16.msra.mxu0 %v5269_v42 }
  0xa6   :  { %3805 = vmatprep.subr.bf16.mxu0 %v5272_v43 }
  0xa7   :  { %3867 = vmatpush1.bf16.msra.mxu1 %v5269_v42 }
  0xa8   :  { %3869 = vmatprep.subr.bf16.mxu1 %v5272_v43 }
  0xa9   :  { %3807 = vmatpush1.bf16.msra.mxu0 %v5278_v48 }
  0xaa   :  { %3809 = vmatprep.subr.bf16.mxu0 %v5281_v49 }
  0xab   :  { %3871 = vmatpush1.bf16.msra.mxu1 %v5278_v48 }
  0xac   :  { %3873 = vmatprep.subr.bf16.mxu1 %v5281_v49 }
  0xad   :  { %3811 = vmatpush1.bf16.msra.mxu0 %v5286_v54 }
  0xae   :  { %3813 = vmatprep.subr.bf16.mxu0 %v5289_v55 }
  0xaf   :  { %3875 = vmatpush1.bf16.msra.mxu1 %v5286_v54 }
  0xb0   :  { %3877 = vmatprep.subr.bf16.mxu1 %v5289_v55 }
  0xb1   :  { %3815 = vmatpush1.bf16.msra.mxu0 %v5294_v60 }
  0xb2   :  { %3817 = vmatprep.subr.bf16.mxu0 %v5297_v61 }
  0xb3   :  { %3879 = vmatpush1.bf16.msra.mxu1 %v5294_v60 }
  0xb4   :  { %3881 = vmatprep.subr.bf16.mxu1 %v5297_v61 }
  0xb5   :  { %3819 = vmatpush1.bf16.msra.mxu0 %v5302_v4 }
  0xb6   :  { %3821 = vmatprep.subr.bf16.mxu0 %v5305_v5 }
  0xb7   :  { %3883 = vmatpush1.bf16.msra.mxu1 %v5302_v4 }
  0xb8   :  { %3885 = vmatprep.subr.bf16.mxu1 %v5305_v5 }
  0xb9   :  { %3823 = vmatpush1.bf16.msra.mxu0 %v5310_v10 }
  0xba   :  { %3825 = vmatprep.subr.bf16.mxu0 %v5313_v11 }
  0xbb   :  { %3887 = vmatpush1.bf16.msra.mxu1 %v5310_v10 }
  0xbc   :  { %3889 = vmatprep.subr.bf16.mxu1 %v5313_v11 }
  0xbd   :  { %3827 = vmatpush1.bf16.msra.mxu0 %v5318_v16 }
  0xbe   :  { %3829 = vmatprep.subr.bf16.mxu0 %v5321_v17 }
  0xbf   :  { %3891 = vmatpush1.bf16.msra.mxu1 %v5318_v16 }
  0xc0   :  { %3893 = vmatprep.subr.bf16.mxu1 %v5321_v17 }
  0xc1   :  { %3831 = vmatpush1.bf16.msra.mxu0 %v5326_v22 }
  0xc2   :  { %3833 = vmatprep.subr.bf16.mxu0 %v5329_v23 }
  0xc3   :  { %3895 = vmatpush1.bf16.msra.mxu1 %v5326_v22 }
  0xc4   :  { %3897 = vmatprep.subr.bf16.mxu1 %v5329_v23 }
  0xc5   :  { %3835 = vmatpush1.bf16.msra.mxu0 %v5334_v28 }
  0xc6   :  { %3837 = vmatprep.subr.bf16.mxu0 %v5337_v30 }
  0xc7   :  { %3899 = vmatpush1.bf16.msra.mxu1 %v5334_v28 }
  0xc8   :  { %3901 = vmatprep.subr.bf16.mxu1 %v5337_v30 }
  0xc9   :  { %3839 = vmatpush1.bf16.msra.mxu0 %v5342_v36 }
  0xca   :  { %3841 = vmatprep.subr.bf16.mxu0 %v5345_v38 }
  0xcb   :  { %3903 = vmatpush1.bf16.msra.mxu1 %v5342_v36 }
  0xcc   :  { %3905 = vmatprep.subr.bf16.mxu1 %v5345_v38 }
  0xcd   :  { %3843 = vmatpush1.bf16.msra.mxu0 %v5350_v45 }
  0xce   :  { %3845 = vmatprep.subr.bf16.mxu0 %v5353_v46 }
  0xcf   :  { %3907 = vmatpush1.bf16.msra.mxu1 %v5350_v45 }
  0xd0   :  { %3909 = vmatprep.subr.bf16.mxu1 %v5353_v46 }
  0xd1   :  { %3847 = vmatpush1.bf16.msra.mxu0 %v5358_v53 }
  0xd2   :  { %3849 = vmatprep.subr.bf16.mxu0 %v5361_v56 }
  0xd3   :  { %3911 = vmatpush1.bf16.msra.mxu1 %v5358_v53 }
  0xd4   :  { %3913 = vmatprep.subr.bf16.mxu1 %v5361_v56 }
  0xd5   :  { %3851 = vmatpush1.bf16.msra.mxu0 %v5366_v63 }
  0xd6   :  { %3853 = vmatprep.subr.bf16.mxu0 %v5369_v0 }
  0xd7   :  { %3915 = vmatpush1.bf16.msra.mxu1 %v5366_v63 }
  0xd8   :  { %3917 = vmatprep.subr.bf16.mxu1 %v5369_v0 }
  0xd9   :  { %3855 = vmatpush1.bf16.msra.mxu0 %v5374_v9 }
  0xda   :  { %3857 = vmatprep.subr.bf16.mxu0 %v5377_v12 }
  0xdb   :  { %3919 = vmatpush1.bf16.msra.mxu1 %v5374_v9 }
  0xdc   :  { %3921 = vmatprep.subr.bf16.mxu1 %v5377_v12 }
  0xdd   :  { %3859 = vmatpush1.bf16.msra.mxu0 %v5382_v15 }
  0xde   :  { %3925 = vmatprep.subr.bf16.mxu0 %v5253_v29 }
  0xdf   :  { %3923 = vmatpush1.bf16.msra.mxu1 %v5382_v15 }
  0xe0   :  { %636 = vmatmul.mubr.f32.vlgmr.msra.gmra.mrb[4].mxu0 %v5082_v2  ;;  %3989 = vmatprep.subr.bf16.mxu1 %v5253_v29  ;;  %v492_v29 = vlaneseq }
  0xe1   :  { %3927 = vmatpush1.bf16.msra.mxu0 %v5259_v35 }
  0xe2   :  { %3929 = vmatprep.subr.bf16.mxu0 %v5265_v37  ;;  %v493_v18 = vshrl.u32 %v492_v29, 7  ;;  %vm5436_vm1 = vcmp.lt.s32.totalorder %v492_v29, 256  ;;  %v1192_v29 = vld [vmem:[#allocation8 + $0x60] sm:$0xff] }
  0xe4   :  { %v5423_v19 = vsub.s32 0, %v493_v18  ;;  %v5429_v34 = vsub.s32 1, %v493_v18  ;;  %v5432_v62 = vsub.s32 %v647_v59, %v493_v18 }
  0xe5   :  { %3931 = vmatpush1.bf16.msra.mxu0 %v5269_v42 }
  0xe6   :  { %3933 = vmatprep.subr.bf16.mxu0 %v5272_v43  ;;  %v495_v27 = vrot.slane %v490_v20, %v5423_v19  ;;  %v499_v47 = vrot.slane %v490_v20, %v5429_v34 }
  0xe9   :  { %3935 = vmatpush1.bf16.msra.mxu0 %v5278_v48 }
  0xea   :  { %3937 = vmatprep.subr.bf16.mxu0 %v5281_v49 }
  0xed   :  { %3939 = vmatpush1.bf16.msra.mxu0 %v5286_v54 }
  0xee   :  { %3941 = vmatprep.subr.bf16.mxu0 %v5289_v55 }
  0xf1   :  { %3943 = vmatpush1.bf16.msra.mxu0 %v5294_v60 }
  0xf2   :  { %3945 = vmatprep.subr.bf16.mxu0 %v5297_v61 }
  0xf5   :  { %3947 = vmatpush1.bf16.msra.mxu0 %v5302_v4 }
  0xf6   :  { %3949 = vmatprep.subr.bf16.mxu0 %v5305_v5 }
  0xf9   :  { %3951 = vmatpush1.bf16.msra.mxu0 %v5310_v10 }
  0xfa   :  { %3953 = vmatprep.subr.bf16.mxu0 %v5313_v11 }
  0xfd   :  { %3955 = vmatpush1.bf16.msra.mxu0 %v5318_v16 }
  0xfe   :  { %3957 = vmatprep.subr.bf16.mxu0 %v5321_v17 }
 0x101   :  { %3959 = vmatpush1.bf16.msra.mxu0 %v5326_v22 }
 0x102   :  { %3961 = vmatprep.subr.bf16.mxu0 %v5329_v23 }
 0x105   :  { %3963 = vmatpush1.bf16.msra.mxu0 %v5334_v28 }
 0x106   :  { %3965 = vmatprep.subr.bf16.mxu0 %v5337_v30 }
 0x109   :  { %3967 = vmatpush1.bf16.msra.mxu0 %v5342_v36 }
 0x10a   :  { %3969 = vmatprep.subr.bf16.mxu0 %v5345_v38 }
 0x10d   :  { %3971 = vmatpush1.bf16.msra.mxu0 %v5350_v45 }
 0x10e   :  { %3973 = vmatprep.subr.bf16.mxu0 %v5353_v46 }
 0x111   :  { %3975 = vmatpush1.bf16.msra.mxu0 %v5358_v53 }
 0x112   :  { %3977 = vmatprep.subr.bf16.mxu0 %v5361_v56 }
 0x115   :  { %3979 = vmatpush1.bf16.msra.mxu0 %v5366_v63 }
 0x116   :  { %3981 = vmatprep.subr.bf16.mxu0 %v5369_v0 }
 0x119   :  { %3983 = vmatpush1.bf16.msra.mxu0 %v5374_v9 }
 0x11a   :  { %3985 = vmatprep.subr.bf16.mxu0 %v5377_v12 }
 0x11d   :  { %3987 = vmatpush1.bf16.msra.mxu0 %v5382_v15 }
 0x153   :  { %v3490_v21 = vpop.f32.mrb[0].mxu0 }
 0x154   :  { %v3491_v24 = vpop.f32.mrb[1].mxu0  ;;  %v295_v25 = vpop.f32.mrb[0].mxu1 }
 0x155   :  { %v3492_v26 = vadd.f32 %v3491_v24, %v3490_v21  ;;  %v3613_v31 = vpop.f32.mrb[1].mxu1 }
 0x156   :  { %v1199_v31 = vld [vmem:[#allocation8 + $0x98] sm:$0xff] }
 0x157   :  { %v296_v32 = vadd.f32 %v3492_v26, %v295_v25  ;;  %v1194_v26 = vld [vmem:[#allocation8 + $0x70] sm:$0xff] }
 0x159   :  { %v502_v33 = vadd.f32 %v495_v27, %v296_v32  ;;  %v1197_v27 = vld [vmem:[#allocation8 + $0x88] sm:$0xff]  ;;  %v5502_v32 = vpack.c.bf16 %v1194_v26, %v1192_v29  ;;  %v1220_v26 = vld [vmem:[#allocation8 + $0x140] sm:$0xff] }
 0x15b   :  { %504 = vst [vmem:[#allocation2] sm:$0xff] %v502_v33  ;;  %v5505_v33 = vpack.c.bf16 %v1199_v31, %v1197_v27  ;;  %v1222_v27 = vld [vmem:[#allocation8 + $0x150] sm:$0xff] }
 0x15c   :  { %v5569_v31 = vpack.c.bf16 %v1222_v27, %v1220_v26 }
 0x173   :  { %v3542_v39 = vpop.f32.mrb[2].mxu0 }
 0x174   :  { %v3543_v40 = vpop.f32.mrb[3].mxu0  ;;  %v486_v41 = vpop.f32.mrb[2].mxu1 }
 0x175   :  { %v3544_v44 = vadd.f32 %v3543_v40, %v3542_v39  ;;  %v3648_v50 = vpop.f32.mrb[3].mxu1  ;;  %v1196_v39 = vld [vmem:[#allocation8 + $0x80] sm:$0xff]  ;;  %v1198_v40 = vld [vmem:[#allocation8 + $0x90] sm:$0xff] }
 0x177   :  { %v487_v51 = vadd.f32 %v3544_v44, %v486_v41  ;;  %v1201_v41 = vld [vmem:[#allocation8 + $0xa8] sm:$0xff]  ;;  %v1203_v44 = vld [vmem:[#allocation8 + $0xb8] sm:$0xff] }
 0x178   :  { %v5511_v50 = vpack.c.bf16 %v1203_v44, %v1201_v41  ;;  %v1224_v44 = vld [vmem:[#allocation8 + $0x160] sm:$0xff] }
 0x179   :  { %v503_v52 = vadd.f32 %v499_v47, %v487_v51  ;;  %v5508_v47 = vpack.c.bf16 %v1198_v40, %v1196_v39  ;;  %v1200_v51 = vld [vmem:[#allocation8 + $0xa0] sm:$0xff]  ;;  %v1225_v39 = vld [vmem:[#allocation8 + $0x168] sm:$0xff]  ;;  %v1227_v40 = vld [vmem:[#allocation8 + $0x178] sm:$0xff] }
 0x17a   :  { %v5575_v41 = vpack.c.bf16 %v1227_v40, %v1225_v39 }
 0x17b   :  { %505 = vst [vmem:[#allocation2 + $0x8] sm:$0xff] %v503_v52  ;;  %v1202_v52 = vld [vmem:[#allocation8 + $0xb0] sm:$0xff] }
 0x17c   :  { %v5514_v59 = vpack.c.bf16 %v1202_v52, %v1200_v51  ;;  %v1226_v51 = vld [vmem:[#allocation8 + $0x170] sm:$0xff] }
 0x17d   :  { %v5577_v52 = vpack.c.bf16 %v1226_v51, %v1224_v44 }
 0x182   :  { %v506_v14 = vld [vmem:[#allocation2] ss:$8 sm:$0x3]  ;;  %v1009_v27 = vld [vmem:[#allocation2 + $0x3] ss:$8 sm:$0x3] }
 0x1b3   :  { %v637_v3 = vpop.f32.mrb[4].mxu0 }
 0x1b4   :  { %v639_v6 = vpop.f32.mrb[5].mxu0 }
 0x1b5   :  { %v644_v7 = vcombine.low %v637_v3, %v639_v6  ;;  %v5517_v3 = vpack.c.bf16 %v1207_v58, %v1205_v57  ;;  %v1204_v6 = vld [vmem:[#allocation8 + $0xc0] sm:$0xff]  ;;  %v1229_v57 = vld [vmem:[#allocation8 + $0x188] sm:$0xff]  ;;  %v1231_v58 = vld [vmem:[#allocation8 + $0x198] sm:$0xff] }
 0x1b7   :  { %v651_v8 = vrot.slane %v644_v7, %v5432_v62  ;;  %v1206_v7 = vld [vmem:[#allocation8 + $0xd0] sm:$0xff] }
 0x1b9   :  { %v658_v13 = vrot.slane %v651_v8, %v5432_v62  ;;  %v1209_v8 = vld [vmem:[#allocation8 + $0xe8] sm:$0xff] }
 0x1bb   :  { %v660_v21 = vadd.f32 %v658_v13, %v506_v14  ;;  %v1211_v13 = vld [vmem:[#allocation8 + $0xf8] sm:$0xff]  ;;  %v5520_v14 = vpack.c.bf16 %v1206_v7, %v1204_v6  ;;  %v5583_v6 = vpack.c.bf16 %v1231_v58, %v1229_v57  ;;  %v1228_v7 = vld [vmem:[#allocation8 + $0x180] sm:$0xff] }
 0x1bd   :  { %4921 = vtanh.f32 %v660_v21  ;;  %v5523_v21 = vpack.c.bf16 %v1211_v13, %v1209_v8  ;;  %v1230_v8 = vld [vmem:[#allocation8 + $0x190] sm:$0xff] }
 0x1be   :  { %v5585_v13 = vpack.c.bf16 %v1230_v8, %v1228_v7 }
 0x1c7   :  { %v4922_v24 = vpop.eup %4921 }
 0x1c8   :  { %666 = vst.msk [vmem:[#allocation2] ss:$8 sm:$0x3] %vm5436_vm1, %v4922_v24  ;;  %v742_v18 = vrot.slane %v4922_v24, %v5429_v34  ;;  %v738_v25 = vrot.slane %v4922_v24, %v5423_v19  ;;  %v1208_v24 = vld [vmem:[#allocation8 + $0xe0] sm:$0xff] }
 0x1ca   :  { %809 = vmatprep.mubr.f32.mxu1 %v742_v18  ;;  %v1210_v18 = vld [vmem:[#allocation8 + $0xf0] sm:$0xff] }
 0x1cb   :  { %810 = vmatmul.mubr.f32.vlgmr.msra.gmra.mrb[4].mxu1 %v738_v25  ;;  %v1213_v25 = vld [vmem:[#allocation8 + $0x108] sm:$0xff] }
 0x1cc   :  { %3991 = vmatpush1.bf16.msra.mxu1 %v5259_v35 }
 0x1cd   :  { %3993 = vmatprep.subr.bf16.mxu1 %v5265_v37 }
 0x1d0   :  { %3995 = vmatpush1.bf16.msra.mxu1 %v5269_v42 }
 0x1d1   :  { %3997 = vmatprep.subr.bf16.mxu1 %v5272_v43 }
 0x1d4   :  { %3999 = vmatpush1.bf16.msra.mxu1 %v5278_v48 }
 0x1d5   :  { %4001 = vmatprep.subr.bf16.mxu1 %v5281_v49  ;;  %v669_v49 = vld [vmem:[#allocation2 + $0x1] ss:$8 sm:$0x3] }
 0x1d8   :  { %4003 = vmatpush1.bf16.msra.mxu1 %v5286_v54 }
 0x1d9   :  { %4005 = vmatprep.subr.bf16.mxu1 %v5289_v55 }
 0x1dc   :  { %4007 = vmatpush1.bf16.msra.mxu1 %v5294_v60 }
 0x1dd   :  { %4009 = vmatprep.subr.bf16.mxu1 %v5297_v61 }
 0x1e0   :  { %4011 = vmatpush1.bf16.msra.mxu1 %v5302_v4  ;;  %v1181_v4 = vld [vmem:[#allocation8 + $0x8] sm:$0xff] }
 0x1e1   :  { %4013 = vmatprep.subr.bf16.mxu1 %v5305_v5  ;;  %v1183_v5 = vld [vmem:[#allocation8 + $0x18] sm:$0xff] }
 0x1e4   :  { %4015 = vmatpush1.bf16.msra.mxu1 %v5310_v10  ;;  %v1180_v10 = vld [vmem:[#allocation8] sm:$0xff] }
 0x1e5   :  { %4017 = vmatprep.subr.bf16.mxu1 %v5313_v11  ;;  %v5481_v11 = vpack.c.bf16 %v1183_v5, %v1181_v4  ;;  %v1218_v4 = vld [vmem:[#allocation8 + $0x130] sm:$0xff] }
 0x1e7   :  { %4053 = vmatprep.subr.bf16.mxu0 %v5481_v11 }
 0x1e8   :  { %4019 = vmatpush1.bf16.msra.mxu1 %v5318_v16  ;;  %v1182_v16 = vld [vmem:[#allocation8 + $0x10] sm:$0xff] }
 0x1e9   :  { %4021 = vmatprep.subr.bf16.mxu1 %v5321_v17  ;;  %v1185_v17 = vld [vmem:[#allocation8 + $0x28] sm:$0xff] }
 0x1ec   :  { %4023 = vmatpush1.bf16.msra.mxu1 %v5326_v22  ;;  %v1187_v22 = vld [vmem:[#allocation8 + $0x38] sm:$0xff] }
 0x1ed   :  { %4025 = vmatprep.subr.bf16.mxu1 %v5329_v23  ;;  %v5483_v23 = vpack.c.bf16 %v1182_v16, %v1180_v10 }
 0x1f0   :  { %4027 = vmatpush1.bf16.msra.mxu1 %v5334_v28  ;;  %v5485_v28 = vpack.c.bf16 %v1187_v22, %v1185_v17 }
 0x1f1   :  { %4029 = vmatprep.subr.bf16.mxu1 %v5337_v30  ;;  %v1184_v30 = vld [vmem:[#allocation8 + $0x20] sm:$0xff] }
 0x1f4   :  { %4031 = vmatpush1.bf16.msra.mxu1 %v5342_v36  ;;  %v1186_v36 = vld [vmem:[#allocation8 + $0x30] sm:$0xff] }
 0x1f5   :  { %4033 = vmatprep.subr.bf16.mxu1 %v5345_v38  ;;  %v1189_v38 = vld [vmem:[#allocation8 + $0x48] sm:$0xff] }
 0x1f8   :  { %4035 = vmatpush1.bf16.msra.mxu1 %v5350_v45  ;;  %v1191_v45 = vld [vmem:[#allocation8 + $0x58] sm:$0xff] }
 0x1f9   :  { %4037 = vmatprep.subr.bf16.mxu1 %v5353_v46  ;;  %v5490_v46 = vpack.c.bf16 %v1186_v36, %v1184_v30  ;;  %v839_v36 = vld [vmem:[#allocation2 + $0x2] ss:$8 sm:$0x3] }
 0x1fc   :  { %4039 = vmatpush1.bf16.msra.mxu1 %v5358_v53  ;;  %v5493_v53 = vpack.c.bf16 %v1191_v45, %v1189_v38 }
 0x1fd   :  { %4041 = vmatprep.subr.bf16.mxu1 %v5361_v56  ;;  %v1188_v56 = vld [vmem:[#allocation8 + $0x40] sm:$0xff] }
 0x200   :  { %4043 = vmatpush1.bf16.msra.mxu1 %v5366_v63  ;;  %v1190_v63 = vld [vmem:[#allocation8 + $0x50] sm:$0xff] }
 0x201   :  { %4045 = vmatprep.subr.bf16.mxu1 %v5369_v0  ;;  %v1193_v0 = vld [vmem:[#allocation8 + $0x68] sm:$0xff] }
 0x204   :  { %4047 = vmatpush1.bf16.msra.mxu1 %v5374_v9  ;;  %v1195_v9 = vld [vmem:[#allocation8 + $0x78] sm:$0xff] }
 0x205   :  { %4049 = vmatprep.subr.bf16.mxu1 %v5377_v12  ;;  %v5496_v12 = vpack.c.bf16 %v1190_v63, %v1188_v56 }
 0x208   :  { %4051 = vmatpush1.bf16.msra.mxu1 %v5382_v15  ;;  %v5499_v15 = vpack.c.bf16 %v1195_v9, %v1193_v0  ;;  %v1221_v0 = vld [vmem:[#allocation8 + $0x148] sm:$0xff]  ;;  %v1223_v9 = vld [vmem:[#allocation8 + $0x158] sm:$0xff] }
 0x209   :  { %4117 = vmatprep.subr.bf16.mxu1 %v5481_v11  ;;  %v5567_v29 = vpack.c.bf16 %v1223_v9, %v1221_v0 }
 0x29e   :  { %v811_v35 = vpop.f32.mrb[4].mxu1 }
 0x29f   :  { %v813_v37 = vpop.f32.mrb[5].mxu1 }
 0x2a0   :  { %v818_v42 = vcombine.low %v811_v35, %v813_v37  ;;  %v1215_v35 = vld [vmem:[#allocation8 + $0x118] sm:$0xff]  ;;  %v5526_v37 = vpack.c.bf16 %v1210_v18, %v1208_v24  ;;  %v1233_v24 = vld [vmem:[#allocation8 + $0x1a8] sm:$0xff] }
 0x2a1   :  { %v1235_v18 = vld [vmem:[#allocation8 + $0x1b8] sm:$0xff] }
 0x2a2   :  { %v825_v43 = vrot.slane %v818_v42, %v5432_v62  ;;  %v5529_v42 = vpack.c.bf16 %v1215_v35, %v1213_v25  ;;  %v5591_v25 = vpack.c.bf16 %v1235_v18, %v1233_v24  ;;  %v1232_v35 = vld [vmem:[#allocation8 + $0x1a0] sm:$0xff]  ;;  %v1179_v24 = vld [vmem:[#allocation2 + $0x4] ss:$8 sm:$0x3] }
 0x2a4   :  { %v832_v48 = vrot.slane %v825_v43, %v5432_v62  ;;  %v1212_v43 = vld [vmem:[#allocation8 + $0x100] sm:$0xff] }
 0x2a6   :  { %v834_v54 = vadd.f32 %v832_v48, %v669_v49  ;;  %v1214_v48 = vld [vmem:[#allocation8 + $0x110] sm:$0xff]  ;;  %v1217_v49 = vld [vmem:[#allocation8 + $0x128] sm:$0xff] }
 0x2a8   :  { %4923 = vtanh.f32 %v834_v54  ;;  %v1219_v54 = vld [vmem:[#allocation8 + $0x138] sm:$0xff] }
 0x2b2   :  { %v4924_v55 = vpop.eup %4923 }
 0x2b3   :  { %836 = vst.msk [vmem:[#allocation2 + $0x1] ss:$8 sm:$0x3] %vm5436_vm1, %v4924_v55  ;;  %v912_v60 = vrot.slane %v4924_v55, %v5429_v34  ;;  %v908_v61 = vrot.slane %v4924_v55, %v5423_v19  ;;  %v5532_v55 = vpack.c.bf16 %v1214_v48, %v1212_v43  ;;  %v1234_v43 = vld [vmem:[#allocation8 + $0x1b0] sm:$0xff] }
 0x2b4   :  { %v5593_v48 = vpack.c.bf16 %v1234_v43, %v1232_v35 }
 0x2b5   :  { %979 = vmatprep.mubr.f32.mxu0 %v912_v60  ;;  %v5535_v60 = vpack.c.bf16 %v1219_v54, %v1217_v49  ;;  %v1237_v49 = vld [vmem:[#allocation8 + $0x1c8] sm:$0xff]  ;;  %v1239_v54 = vld [vmem:[#allocation8 + $0x1d8] sm:$0xff] }
 0x2b6   :  { %980 = vmatmul.mubr.f32.vlgmr.msra.gmra.mrb[6].mxu0 %v908_v61  ;;  %v1216_v61 = vld [vmem:[#allocation8 + $0x120] sm:$0xff] }
 0x2b7   :  { %4055 = vmatpush1.bf16.msra.mxu0 %v5483_v23  ;;  %v5538_v5 = vpack.c.bf16 %v1218_v4, %v1216_v61  ;;  %v5599_v61 = vpack.c.bf16 %v1239_v54, %v1237_v49  ;;  %v1236_v4 = vld [vmem:[#allocation8 + $0x1c0] sm:$0xff] }
 0x2b8   :  { %4057 = vmatprep.subr.bf16.mxu0 %v5485_v28 }
 0x2bb   :  { %4059 = vmatpush1.bf16.msra.mxu0 %v5490_v46 }
 0x2bc   :  { %4061 = vmatprep.subr.bf16.mxu0 %v5493_v53 }
 0x2bf   :  { %4063 = vmatpush1.bf16.msra.mxu0 %v5496_v12 }
 0x2c0   :  { %4065 = vmatprep.subr.bf16.mxu0 %v5499_v15 }
 0x2c3   :  { %4067 = vmatpush1.bf16.msra.mxu0 %v5502_v32 }
 0x2c4   :  { %4069 = vmatprep.subr.bf16.mxu0 %v5505_v33 }
 0x2c7   :  { %4071 = vmatpush1.bf16.msra.mxu0 %v5508_v47 }
 0x2c8   :  { %4073 = vmatprep.subr.bf16.mxu0 %v5511_v50 }
 0x2cb   :  { %4075 = vmatpush1.bf16.msra.mxu0 %v5514_v59 }
 0x2cc   :  { %4077 = vmatprep.subr.bf16.mxu0 %v5517_v3 }
 0x2cf   :  { %4079 = vmatpush1.bf16.msra.mxu0 %v5520_v14 }
 0x2d0   :  { %4081 = vmatprep.subr.bf16.mxu0 %v5523_v21 }
 0x2d3   :  { %4083 = vmatpush1.bf16.msra.mxu0 %v5526_v37 }
 0x2d4   :  { %4085 = vmatprep.subr.bf16.mxu0 %v5529_v42 }
 0x2d7   :  { %4087 = vmatpush1.bf16.msra.mxu0 %v5532_v55 }
 0x2d8   :  { %4089 = vmatprep.subr.bf16.mxu0 %v5535_v60 }
 0x2db   :  { %4091 = vmatpush1.bf16.msra.mxu0 %v5538_v5 }
 0x2dc   :  { %4093 = vmatprep.subr.bf16.mxu0 %v5567_v29 }
 0x2df   :  { %4095 = vmatpush1.bf16.msra.mxu0 %v5569_v31 }
 0x2e0   :  { %4097 = vmatprep.subr.bf16.mxu0 %v5575_v41 }
 0x2e3   :  { %4099 = vmatpush1.bf16.msra.mxu0 %v5577_v52 }
 0x2e4   :  { %4101 = vmatprep.subr.bf16.mxu0 %v5583_v6 }
 0x2e7   :  { %4103 = vmatpush1.bf16.msra.mxu0 %v5585_v13 }
 0x2e8   :  { %4105 = vmatprep.subr.bf16.mxu0 %v5591_v25 }
 0x2eb   :  { %4107 = vmatpush1.bf16.msra.mxu0 %v5593_v48 }
 0x2ec   :  { %4109 = vmatprep.subr.bf16.mxu0 %v5599_v61 }
 0x389   :  { %v981_v10 = vpop.f32.mrb[6].mxu0 }
 0x38a   :  { %v983_v16 = vpop.f32.mrb[7].mxu0 }
 0x38b   :  { %v988_v17 = vcombine.low %v981_v10, %v983_v16  ;;  %v1238_v10 = vld [vmem:[#allocation8 + $0x1d0] sm:$0xff] }
 0x38c   :  { %v5601_v16 = vpack.c.bf16 %v1238_v10, %v1236_v4  ;;  %v1870_v4 = vld [vmem:[#allocation9 + $0x50] sm:$0xff]  ;;  %v1873_v10 = vld [vmem:[#allocation9 + $0x68] sm:$0xff] }
 0x38d   :  { %v995_v22 = vrot.slane %v988_v17, %v5432_v62  ;;  %v1241_v17 = vld [vmem:[#allocation8 + $0x1e8] sm:$0xff] }
 0x38e   :  { %4111 = vmatpush1.bf16.msra.mxu0 %v5601_v16 }
 0x38f   :  { %v1002_v30 = vrot.slane %v995_v22, %v5432_v62  ;;  %v1243_v22 = vld [vmem:[#allocation8 + $0x1f8] sm:$0xff] }
 0x391   :  { %v1004_v38 = vadd.f32 %v1002_v30, %v839_v36  ;;  %v5607_v30 = vpack.c.bf16 %v1243_v22, %v1241_v17  ;;  %v1240_v36 = vld [vmem:[#allocation8 + $0x1e0] sm:$0xff] }
 0x393   :  { %4925 = vtanh.f32 %v1004_v38  ;;  %v1242_v38 = vld [vmem:[#allocation8 + $0x1f0] sm:$0xff]  ;;  %4113 = vmatprep.subr.bf16.mxu0 %v5607_v30 }
 0x39d   :  { %v4926_v45 = vpop.eup %4925 }
 0x39e   :  { %1006 = vst.msk [vmem:[#allocation2 + $0x2] ss:$8 sm:$0x3] %vm5436_vm1, %v4926_v45  ;;  %v1082_v56 = vrot.slane %v4926_v45, %v5429_v34  ;;  %v1078_v63 = vrot.slane %v4926_v45, %v5423_v19  ;;  %v5609_v45 = vpack.c.bf16 %v1242_v38, %v1240_v36  ;;  %v1874_v36 = vld [vmem:[#allocation9 + $0x70] sm:$0xff]  ;;  %v1877_v38 = vld [vmem:[#allocation9 + $0x88] sm:$0xff] }
 0x3a0   :  { %1149 = vmatprep.mubr.f32.mxu1 %v1082_v56  ;;  %4115 = vmatpush1.bf16.msra.mxu0 %v5609_v45 }
 0x3a1   :  { %1150 = vmatmul.mubr.f32.vlgmr.msra.gmra.mrb[6].mxu1 %v1078_v63  ;;  %4181 = vmatprep.subr.bf16.mxu0 %v5481_v11 }
 0x3a2   :  { %4119 = vmatpush1.bf16.msra.mxu1 %v5483_v23 }
 0x3a3   :  { %4121 = vmatprep.subr.bf16.mxu1 %v5485_v28 }
 0x3a6   :  { %4123 = vmatpush1.bf16.msra.mxu1 %v5490_v46 }
 0x3a7   :  { %4125 = vmatprep.subr.bf16.mxu1 %v5493_v53 }
 0x3aa   :  { %4127 = vmatpush1.bf16.msra.mxu1 %v5496_v12 }
 0x3ab   :  { %4129 = vmatprep.subr.bf16.mxu1 %v5499_v15 }
 0x3ae   :  { %4131 = vmatpush1.bf16.msra.mxu1 %v5502_v32 }
 0x3af   :  { %4133 = vmatprep.subr.bf16.mxu1 %v5505_v33 }
 0x3b2   :  { %4135 = vmatpush1.bf16.msra.mxu1 %v5508_v47 }
 0x3b3   :  { %4137 = vmatprep.subr.bf16.mxu1 %v5511_v50 }
 0x3b6   :  { %4139 = vmatpush1.bf16.msra.mxu1 %v5514_v59 }
 0x3b7   :  { %4141 = vmatprep.subr.bf16.mxu1 %v5517_v3 }
 0x3ba   :  { %4143 = vmatpush1.bf16.msra.mxu1 %v5520_v14 }
 0x3bb   :  { %4145 = vmatprep.subr.bf16.mxu1 %v5523_v21 }
 0x3be   :  { %4147 = vmatpush1.bf16.msra.mxu1 %v5526_v37 }
 0x3bf   :  { %4149 = vmatprep.subr.bf16.mxu1 %v5529_v42 }
 0x3c2   :  { %4151 = vmatpush1.bf16.msra.mxu1 %v5532_v55 }
 0x3c3   :  { %4153 = vmatprep.subr.bf16.mxu1 %v5535_v60 }
 0x3c6   :  { %4155 = vmatpush1.bf16.msra.mxu1 %v5538_v5 }
 0x3c7   :  { %4157 = vmatprep.subr.bf16.mxu1 %v5567_v29 }
 0x3ca   :  { %4159 = vmatpush1.bf16.msra.mxu1 %v5569_v31 }
 0x3cb   :  { %4161 = vmatprep.subr.bf16.mxu1 %v5575_v41 }
 0x3ce   :  { %4163 = vmatpush1.bf16.msra.mxu1 %v5577_v52 }
 0x3cf   :  { %4165 = vmatprep.subr.bf16.mxu1 %v5583_v6 }
 0x3d2   :  { %4167 = vmatpush1.bf16.msra.mxu1 %v5585_v13 }
 0x3d3   :  { %4169 = vmatprep.subr.bf16.mxu1 %v5591_v25 }
 0x3d6   :  { %4171 = vmatpush1.bf16.msra.mxu1 %v5593_v48 }
 0x3d7   :  { %4173 = vmatprep.subr.bf16.mxu1 %v5599_v61 }
 0x3da   :  { %4175 = vmatpush1.bf16.msra.mxu1 %v5601_v16 }
 0x3db   :  { %4177 = vmatprep.subr.bf16.mxu1 %v5607_v30 }
 0x3de   :  { %4179 = vmatpush1.bf16.msra.mxu1 %v5609_v45 }
 0x3df   :  { %4245 = vmatprep.subr.bf16.mxu1 %v5481_v11 }
 0x474   :  { %v1151_v56 = vpop.f32.mrb[6].mxu1 }
 0x475   :  { %v1153_v63 = vpop.f32.mrb[7].mxu1 }
 0x476   :  { %v1158_v0 = vcombine.low %v1151_v56, %v1153_v63 }
 0x478   :  { %v1165_v9 = vrot.slane %v1158_v0, %v5432_v62  ;;  %v1876_v0 = vld [vmem:[#allocation9 + $0x80] sm:$0xff] }
 0x47a   :  { %v1172_v26 = vrot.slane %v1165_v9, %v5432_v62  ;;  %v1878_v9 = vld [vmem:[#allocation9 + $0x90] sm:$0xff] }
 0x47c   :  { %v1174_v39 = vadd.f32 %v1172_v26, %v1009_v27  ;;  %v1881_v26 = vld [vmem:[#allocation9 + $0xa8] sm:$0xff]  ;;  %v1883_v27 = vld [vmem:[#allocation9 + $0xb8] sm:$0xff] }
 0x47e   :  { %4927 = vtanh.f32 %v1174_v39  ;;  %v4326_v39 = vpack.c.bf16 %v1878_v9, %v1876_v0  ;;  %v2027_v0 = vld [vmem:[#allocation11 + $0x88] sm:$0xff]  ;;  %v2029_v9 = vld [vmem:[#allocation11 + $0x98] sm:$0xff] }
 0x488   :  { %v4928_v40 = vpop.eup %4927 }
 0x489   :  { %1176 = vst.msk [vmem:[#allocation2 + $0x3] ss:$8 sm:$0x3] %vm5436_vm1, %v4928_v40  ;;  %v1252_v44 = vrot.slane %v4928_v40, %v5429_v34  ;;  %v1248_v51 = vrot.slane %v4928_v40, %v5423_v19  ;;  %v4328_v40 = vpack.c.bf16 %v1883_v27, %v1881_v26  ;;  %v5727_v27 = vpack.c.bf16 %v2029_v9, %v2027_v0  ;;  %v1905_v9 = vld [vmem:[#allocation9 + $0x168] sm:$0xff] }
 0x48b   :  { %1319 = vmatprep.mubr.f32.mxu0 %v1252_v44  ;;  %v1880_v44 = vld [vmem:[#allocation9 + $0xa0] sm:$0xff] }
 0x48c   :  { %1320 = vmatmul.mubr.f32.vlgmr.msra.gmra.mrb[8].mxu0 %v1248_v51  ;;  %v1882_v51 = vld [vmem:[#allocation9 + $0xb0] sm:$0xff] }
 0x48d   :  { %4183 = vmatpush1.bf16.msra.mxu0 %v5483_v23 }
 0x48e   :  { %4185 = vmatprep.subr.bf16.mxu0 %v5485_v28 }
 0x491   :  { %4187 = vmatpush1.bf16.msra.mxu0 %v5490_v46 }
 0x492   :  { %4189 = vmatprep.subr.bf16.mxu0 %v5493_v53 }
 0x495   :  { %4191 = vmatpush1.bf16.msra.mxu0 %v5496_v12 }
 0x496   :  { %4193 = vmatprep.subr.bf16.mxu0 %v5499_v15 }
 0x499   :  { %4195 = vmatpush1.bf16.msra.mxu0 %v5502_v32 }
 0x49a   :  { %4197 = vmatprep.subr.bf16.mxu0 %v5505_v33 }
 0x49d   :  { %4199 = vmatpush1.bf16.msra.mxu0 %v5508_v47 }
 0x49e   :  { %4201 = vmatprep.subr.bf16.mxu0 %v5511_v50 }
 0x4a1   :  { %4203 = vmatpush1.bf16.msra.mxu0 %v5514_v59 }
 0x4a2   :  { %4205 = vmatprep.subr.bf16.mxu0 %v5517_v3 }
 0x4a5   :  { %4207 = vmatpush1.bf16.msra.mxu0 %v5520_v14 }
 0x4a6   :  { %4209 = vmatprep.subr.bf16.mxu0 %v5523_v21 }
 0x4a9   :  { %4211 = vmatpush1.bf16.msra.mxu0 %v5526_v37 }
 0x4aa   :  { %4213 = vmatprep.subr.bf16.mxu0 %v5529_v42 }
 0x4ad   :  { %4215 = vmatpush1.bf16.msra.mxu0 %v5532_v55 }
 0x4ae   :  { %4217 = vmatprep.subr.bf16.mxu0 %v5535_v60 }
 0x4b1   :  { %4219 = vmatpush1.bf16.msra.mxu0 %v5538_v5 }
 0x4b2   :  { %4221 = vmatprep.subr.bf16.mxu0 %v5567_v29 }
 0x4b5   :  { %4223 = vmatpush1.bf16.msra.mxu0 %v5569_v31 }
 0x4b6   :  { %4225 = vmatprep.subr.bf16.mxu0 %v5575_v41 }
 0x4b9   :  { %4227 = vmatpush1.bf16.msra.mxu0 %v5577_v52 }
 0x4ba   :  { %4229 = vmatprep.subr.bf16.mxu0 %v5583_v6 }
 0x4bd   :  { %4231 = vmatpush1.bf16.msra.mxu0 %v5585_v13 }
 0x4be   :  { %4233 = vmatprep.subr.bf16.mxu0 %v5591_v25 }
 0x4c1   :  { %4235 = vmatpush1.bf16.msra.mxu0 %v5593_v48 }
 0x4c2   :  { %4237 = vmatprep.subr.bf16.mxu0 %v5599_v61 }
 0x4c5   :  { %4239 = vmatpush1.bf16.msra.mxu0 %v5601_v16 }
 0x4c6   :  { %4241 = vmatprep.subr.bf16.mxu0 %v5607_v30 }
 0x4c9   :  { %4243 = vmatpush1.bf16.msra.mxu0 %v5609_v45 }
 0x55f   :  { %v1321_v11 = vpop.f32.mrb[8].mxu0 }
 0x560   :  { %v1323_v57 = vpop.f32.mrb[9].mxu0 }
 0x561   :  { %v1328_v58 = vcombine.low %v1321_v11, %v1323_v57  ;;  %v1885_v11 = vld [vmem:[#allocation9 + $0xc8] sm:$0xff]  ;;  %v1887_v57 = vld [vmem:[#allocation9 + $0xd8] sm:$0xff] }
 0x563   :  { %v1335_v7 = vrot.slane %v1328_v58, %v5432_v62  ;;  %v4330_v58 = vpack.c.bf16 %v1882_v51, %v1880_v44  ;;  %v2031_v44 = vld [vmem:[#allocation11 + $0xa8] sm:$0xff]  ;;  %v2033_v51 = vld [vmem:[#allocation11 + $0xb8] sm:$0xff] }
 0x565   :  { %v1342_v8 = vrot.slane %v1335_v7, %v5432_v62  ;;  %v4332_v7 = vpack.c.bf16 %v1887_v57, %v1885_v11  ;;  %v5733_v57 = vpack.c.bf16 %v2033_v51, %v2031_v44  ;;  %v2052_v51 = vld [vmem:[#allocation11 + $0x150] sm:$0xff] }
 0x567   :  { %v1344_v18 = vadd.f32 %v1342_v8, %v1179_v24  ;;  %v1884_v8 = vld [vmem:[#allocation9 + $0xc0] sm:$0xff]  ;;  %v1886_v24 = vld [vmem:[#allocation9 + $0xd0] sm:$0xff] }
 0x569   :  { %4929 = vtanh.f32 %v1344_v18  ;;  %v1889_v18 = vld [vmem:[#allocation9 + $0xe8] sm:$0xff] }
 0x573   :  { %v4930_v35 = vpop.eup %4929 }
 0x574   :  { %1346 = vst.msk [vmem:[#allocation2 + $0x4] ss:$8 sm:$0x3] %vm5436_vm1, %v4930_v35  ;;  %v1422_v43 = vrot.slane %v4930_v35, %v5429_v34  ;;  %v1418_v49 = vrot.slane %v4930_v35, %v5423_v19  ;;  %v1891_v35 = vld [vmem:[#allocation9 + $0xf8] sm:$0xff] }
 0x576   :  { %1489 = vmatprep.mubr.f32.mxu1 %v1422_v43  ;;  %v4334_v43 = vpack.c.bf16 %v1886_v24, %v1884_v8  ;;  %v2035_v8 = vld [vmem:[#allocation11 + $0xc8] sm:$0xff]  ;;  %v2037_v24 = vld [vmem:[#allocation11 + $0xd8] sm:$0xff] }
 0x577   :  { %1490 = vmatmul.mubr.f32.vlgmr.msra.gmra.mrb[8].mxu1 %v1418_v49  ;;  %v4336_v49 = vpack.c.bf16 %v1891_v35, %v1889_v18  ;;  %v5739_v35 = vpack.c.bf16 %v2037_v24, %v2035_v8 }
 0x578   :  { %4247 = vmatpush1.bf16.msra.mxu1 %v5483_v23 }
 0x579   :  { %4249 = vmatprep.subr.bf16.mxu1 %v5485_v28 }
 0x57c   :  { %4251 = vmatpush1.bf16.msra.mxu1 %v5490_v46 }
 0x57d   :  { %4253 = vmatprep.subr.bf16.mxu1 %v5493_v53 }
 0x580   :  { %4255 = vmatpush1.bf16.msra.mxu1 %v5496_v12 }
 0x581   :  { %4257 = vmatprep.subr.bf16.mxu1 %v5499_v15  ;;  %v1349_v15 = vld [vmem:[#allocation2 + $0x5] ss:$8 sm:$0x3] }
 0x584   :  { %4259 = vmatpush1.bf16.msra.mxu1 %v5502_v32 }
 0x585   :  { %4261 = vmatprep.subr.bf16.mxu1 %v5505_v33 }
 0x588   :  { %4263 = vmatpush1.bf16.msra.mxu1 %v5508_v47 }
 0x589   :  { %4265 = vmatprep.subr.bf16.mxu1 %v5511_v50 }
 0x58c   :  { %4267 = vmatpush1.bf16.msra.mxu1 %v5514_v59  ;;  %v1861_v59 = vld [vmem:[#allocation9 + $0x8] sm:$0xff] }
 0x58d   :  { %4269 = vmatprep.subr.bf16.mxu1 %v5517_v3  ;;  %v1863_v3 = vld [vmem:[#allocation9 + $0x18] sm:$0xff] }
 0x590   :  { %4271 = vmatpush1.bf16.msra.mxu1 %v5520_v14  ;;  %v1860_v14 = vld [vmem:[#allocation9] sm:$0xff] }
 0x591   :  { %4273 = vmatprep.subr.bf16.mxu1 %v5523_v21  ;;  %v4308_v21 = vpack.c.bf16 %v1863_v3, %v1861_v59 }
 0x593   :  { %4309 = vmatprep.subr.bf16.mxu0 %v4308_v21 }
 0x594   :  { %4275 = vmatpush1.bf16.msra.mxu1 %v5526_v37  ;;  %v1862_v37 = vld [vmem:[#allocation9 + $0x10] sm:$0xff] }
 0x595   :  { %4277 = vmatprep.subr.bf16.mxu1 %v5529_v42  ;;  %v2011_v42 = vld [vmem:[#allocation11 + $0x8] sm:$0xff] }
 0x598   :  { %4279 = vmatpush1.bf16.msra.mxu1 %v5532_v55  ;;  %v2013_v55 = vld [vmem:[#allocation11 + $0x18] sm:$0xff] }
 0x599   :  { %4281 = vmatprep.subr.bf16.mxu1 %v5535_v60  ;;  %v4310_v60 = vpack.c.bf16 %v1862_v37, %v1860_v14  ;;  %v1519_v37 = vld [vmem:[#allocation2 + $0x6] ss:$8 sm:$0x3] }
 0x59c   :  { %4283 = vmatpush1.bf16.msra.mxu1 %v5538_v5  ;;  %v5697_v5 = vpack.c.bf16 %v2013_v55, %v2011_v42  ;;  %v2010_v55 = vld [vmem:[#allocation11] sm:$0xff] }
 0x59d   :  { %4285 = vmatprep.subr.bf16.mxu1 %v5567_v29  ;;  %v1865_v29 = vld [vmem:[#allocation9 + $0x28] sm:$0xff] }
 0x5a0   :  { %4287 = vmatpush1.bf16.msra.mxu1 %v5569_v31  ;;  %v1867_v31 = vld [vmem:[#allocation9 + $0x38] sm:$0xff] }
 0x5a1   :  { %4289 = vmatprep.subr.bf16.mxu1 %v5575_v41  ;;  %v4312_v41 = vpack.c.bf16 %v1867_v31, %v1865_v29  ;;  %v2015_v29 = vld [vmem:[#allocation11 + $0x28] sm:$0xff]  ;;  %v2017_v31 = vld [vmem:[#allocation11 + $0x38] sm:$0xff] }
 0x5a4   :  { %4291 = vmatpush1.bf16.msra.mxu1 %v5577_v52  ;;  %v1864_v52 = vld [vmem:[#allocation9 + $0x20] sm:$0xff] }
 0x5a5   :  { %4293 = vmatprep.subr.bf16.mxu1 %v5583_v6  ;;  %v1866_v6 = vld [vmem:[#allocation9 + $0x30] sm:$0xff] }
 0x5a8   :  { %4295 = vmatpush1.bf16.msra.mxu1 %v5585_v13  ;;  %v4314_v13 = vpack.c.bf16 %v1866_v6, %v1864_v52 }
 0x5a9   :  { %4297 = vmatprep.subr.bf16.mxu1 %v5591_v25  ;;  %v1869_v25 = vld [vmem:[#allocation9 + $0x48] sm:$0xff] }
 0x5ac   :  { %4299 = vmatpush1.bf16.msra.mxu1 %v5593_v48  ;;  %v1871_v48 = vld [vmem:[#allocation9 + $0x58] sm:$0xff] }
 0x5ad   :  { %4301 = vmatprep.subr.bf16.mxu1 %v5599_v61  ;;  %v4316_v54 = vpack.c.bf16 %v1871_v48, %v1869_v25  ;;  %v1868_v61 = vld [vmem:[#allocation9 + $0x40] sm:$0xff]  ;;  %v5708_v25 = vpack.c.bf16 %v2017_v31, %v2015_v29  ;;  %v2047_v31 = vld [vmem:[#allocation11 + $0x128] sm:$0xff] }
 0x5ae   :  { %v4318_v17 = vpack.c.bf16 %v1870_v4, %v1868_v61  ;;  %v2014_v48 = vld [vmem:[#allocation11 + $0x20] sm:$0xff]  ;;  %v2019_v61 = vld [vmem:[#allocation11 + $0x48] sm:$0xff]  ;;  %v2021_v4 = vld [vmem:[#allocation11 + $0x58] sm:$0xff] }
 0x5b0   :  { %4303 = vmatpush1.bf16.msra.mxu1 %v5601_v16  ;;  %v1875_v16 = vld [vmem:[#allocation9 + $0x78] sm:$0xff] }
 0x5b1   :  { %4305 = vmatprep.subr.bf16.mxu1 %v5607_v30  ;;  %v4320_v22 = vpack.c.bf16 %v1875_v16, %v1873_v10  ;;  %v1872_v30 = vld [vmem:[#allocation9 + $0x60] sm:$0xff]  ;;  %v5715_v16 = vpack.c.bf16 %v2021_v4, %v2019_v61  ;;  %v2048_v4 = vld [vmem:[#allocation11 + $0x130] sm:$0xff] }
 0x5b2   :  { %v4322_v56 = vpack.c.bf16 %v1874_v36, %v1872_v30  ;;  %v2023_v30 = vld [vmem:[#allocation11 + $0x68] sm:$0xff]  ;;  %v2025_v36 = vld [vmem:[#allocation11 + $0x78] sm:$0xff] }
 0x5b4   :  { %4307 = vmatpush1.bf16.msra.mxu1 %v5609_v45  ;;  %v1879_v45 = vld [vmem:[#allocation9 + $0x98] sm:$0xff] }
 0x5b5   :  { %4373 = vmatprep.subr.bf16.mxu1 %v5697_v5  ;;  %v4324_v63 = vpack.c.bf16 %v1879_v45, %v1877_v38  ;;  %v5721_v45 = vpack.c.bf16 %v2025_v36, %v2023_v30 }
 0x64a   :  { %v1491_v23 = vpop.f32.mrb[8].mxu1 }
 0x64b   :  { %v1493_v28 = vpop.f32.mrb[9].mxu1 }
 0x64c   :  { %v1498_v46 = vcombine.low %v1491_v23, %v1493_v28  ;;  %v1888_v23 = vld [vmem:[#allocation9 + $0xe0] sm:$0xff]  ;;  %v1890_v28 = vld [vmem:[#allocation9 + $0xf0] sm:$0xff] }
 0x64e   :  { %v1505_v53 = vrot.slane %v1498_v46, %v5432_v62  ;;  %v1893_v46 = vld [vmem:[#allocation9 + $0x108] sm:$0xff] }
 0x650   :  { %v1512_v12 = vrot.slane %v1505_v53, %v5432_v62  ;;  %v1895_v53 = vld [vmem:[#allocation9 + $0x118] sm:$0xff] }
 0x652   :  { %v1514_v32 = vadd.f32 %v1512_v12, %v1349_v15  ;;  %v4338_v12 = vpack.c.bf16 %v1890_v28, %v1888_v23  ;;  %v4340_v15 = vpack.c.bf16 %v1895_v53, %v1893_v46  ;;  %v2039_v23 = vld [vmem:[#allocation11 + $0xe8] sm:$0xff]  ;;  %v2041_v28 = vld [vmem:[#allocation11 + $0xf8] sm:$0xff] }
 0x653   :  { %v5745_v53 = vpack.c.bf16 %v2041_v28, %v2039_v23  ;;  %v1909_v28 = vld [vmem:[#allocation9 + $0x188] sm:$0xff] }
 0x654   :  { %4931 = vtanh.f32 %v1514_v32  ;;  %v1892_v32 = vld [vmem:[#allocation9 + $0x100] sm:$0xff] }
 0x65e   :  { %v4932_v33 = vpop.eup %4931 }
 0x65f   :  { %1516 = vst.msk [vmem:[#allocation2 + $0x5] ss:$8 sm:$0x3] %vm5436_vm1, %v4932_v33  ;;  %v1592_v47 = vrot.slane %v4932_v33, %v5429_v34  ;;  %v1588_v50 = vrot.slane %v4932_v33, %v5423_v19  ;;  %v1894_v33 = vld [vmem:[#allocation9 + $0x110] sm:$0xff] }
 0x661   :  { %1659 = vmatprep.mubr.f32.mxu0 %v1592_v47  ;;  %v4342_v47 = vpack.c.bf16 %v1894_v33, %v1892_v32  ;;  %v2043_v33 = vld [vmem:[#allocation11 + $0x108] sm:$0xff] }
 0x662   :  { %1660 = vmatmul.mubr.f32.vlgmr.msra.gmra.mrb[10].mxu0 %v1588_v50 }
 0x663   :  { %4311 = vmatpush1.bf16.msra.mxu0 %v4310_v60  ;;  %v2012_v60 = vld [vmem:[#allocation11 + $0x10] sm:$0xff] }
 0x664   :  { %4313 = vmatprep.subr.bf16.mxu0 %v4312_v41 }
 0x667   :  { %4315 = vmatpush1.bf16.msra.mxu0 %v4314_v13  ;;  %v5706_v13 = vpack.c.bf16 %v2012_v60, %v2010_v55  ;;  %v1898_v55 = vld [vmem:[#allocation9 + $0x130] sm:$0xff] }
 0x668   :  { %4317 = vmatprep.subr.bf16.mxu0 %v4316_v54  ;;  %v2016_v54 = vld [vmem:[#allocation11 + $0x30] sm:$0xff] }
 0x669   :  { %v5711_v10 = vpack.c.bf16 %v2016_v54, %v2014_v48  ;;  %v1903_v48 = vld [vmem:[#allocation9 + $0x158] sm:$0xff]  ;;  %v2046_v54 = vld [vmem:[#allocation11 + $0x120] sm:$0xff] }
 0x66a   :  { %v5761_v30 = vpack.c.bf16 %v2048_v4, %v2046_v54  ;;  %v1912_v54 = vld [vmem:[#allocation9 + $0x1a0] sm:$0xff] }
 0x66b   :  { %4319 = vmatpush1.bf16.msra.mxu0 %v4318_v17  ;;  %v2018_v17 = vld [vmem:[#allocation11 + $0x40] sm:$0xff] }
 0x66c   :  { %4321 = vmatprep.subr.bf16.mxu0 %v4320_v22  ;;  %v2020_v22 = vld [vmem:[#allocation11 + $0x50] sm:$0xff] }
 0x66d   :  { %v5718_v38 = vpack.c.bf16 %v2020_v22, %v2018_v17  ;;  %v1900_v17 = vld [vmem:[#allocation9 + $0x140] sm:$0xff]  ;;  %v1902_v22 = vld [vmem:[#allocation9 + $0x150] sm:$0xff] }
 0x66e   :  { %v4350_v36 = vpack.c.bf16 %v1902_v22, %v1900_v17  ;;  %v2063_v22 = vld [vmem:[#allocation11 + $0x1a8] sm:$0xff] }
 0x66f   :  { %4323 = vmatpush1.bf16.msra.mxu0 %v4322_v56  ;;  %v2022_v56 = vld [vmem:[#allocation11 + $0x60] sm:$0xff] }
 0x670   :  { %4325 = vmatprep.subr.bf16.mxu0 %v4324_v63  ;;  %v2024_v63 = vld [vmem:[#allocation11 + $0x70] sm:$0xff] }
 0x671   :  { %v5724_v26 = vpack.c.bf16 %v2024_v63, %v2022_v56  ;;  %v2051_v56 = vld [vmem:[#allocation11 + $0x148] sm:$0xff]  ;;  %v2053_v63 = vld [vmem:[#allocation11 + $0x158] sm:$0xff] }
 0x672   :  { %v5764_v0 = vpack.c.bf16 %v2053_v63, %v2051_v56  ;;  %v1917_v56 = vld [vmem:[#allocation9 + $0x1c8] sm:$0xff] }
 0x673   :  { %4327 = vmatpush1.bf16.msra.mxu0 %v4326_v39  ;;  %v2026_v39 = vld [vmem:[#allocation11 + $0x80] sm:$0xff] }
 0x674   :  { %4329 = vmatprep.subr.bf16.mxu0 %v4328_v40  ;;  %v2028_v40 = vld [vmem:[#allocation11 + $0x90] sm:$0xff] }
 0x675   :  { %v5730_v11 = vpack.c.bf16 %v2028_v40, %v2026_v39  ;;  %v1907_v39 = vld [vmem:[#allocation9 + $0x178] sm:$0xff]  ;;  %v2050_v40 = vld [vmem:[#allocation11 + $0x140] sm:$0xff] }
 0x676   :  { %v4352_v44 = vpack.c.bf16 %v1907_v39, %v1905_v9  ;;  %v5767_v8 = vpack.c.bf16 %v2052_v51, %v2050_v40  ;;  %v1919_v9 = vld [vmem:[#allocation9 + $0x1d8] sm:$0xff]  ;;  %v2062_v39 = vld [vmem:[#allocation11 + $0x1a0] sm:$0xff]  ;;  %v2064_v40 = vld [vmem:[#allocation11 + $0x1b0] sm:$0xff] }
 0x677   :  { %4331 = vmatpush1.bf16.msra.mxu0 %v4330_v58  ;;  %v2030_v58 = vld [vmem:[#allocation11 + $0xa0] sm:$0xff]  ;;  %v5784_v51 = vpack.c.bf16 %v2064_v40, %v2062_v39 }
 0x678   :  { %4333 = vmatprep.subr.bf16.mxu0 %v4332_v7  ;;  %v2032_v7 = vld [vmem:[#allocation11 + $0xb0] sm:$0xff] }
 0x679   :  { %v5736_v18 = vpack.c.bf16 %v2032_v7, %v2030_v58  ;;  %v1904_v58 = vld [vmem:[#allocation9 + $0x160] sm:$0xff]  ;;  %v1906_v7 = vld [vmem:[#allocation9 + $0x170] sm:$0xff] }
 0x67a   :  { %v4354_v24 = vpack.c.bf16 %v1906_v7, %v1904_v58  ;;  %v1916_v58 = vld [vmem:[#allocation9 + $0x1c0] sm:$0xff]  ;;  %v1918_v7 = vld [vmem:[#allocation9 + $0x1d0] sm:$0xff] }
 0x67b   :  { %4335 = vmatpush1.bf16.msra.mxu0 %v4334_v43  ;;  %v2034_v43 = vld [vmem:[#allocation11 + $0xc0] sm:$0xff] }
 0x67c   :  { %4337 = vmatprep.subr.bf16.mxu0 %v4336_v49  ;;  %v2036_v49 = vld [vmem:[#allocation11 + $0xd0] sm:$0xff] }
 0x67d   :  { %v5742_v46 = vpack.c.bf16 %v2036_v49, %v2034_v43  ;;  %v2055_v43 = vld [vmem:[#allocation11 + $0x168] sm:$0xff]  ;;  %v2057_v49 = vld [vmem:[#allocation11 + $0x178] sm:$0xff] }
 0x67e   :  { %v5770_v23 = vpack.c.bf16 %v2057_v49, %v2055_v43  ;;  %v4366_v43 = vpack.c.bf16 %v1918_v7, %v1916_v58  ;;  %v2069_v49 = vld [vmem:[#allocation11 + $0x1d8] sm:$0xff] }
 0x67f   :  { %4339 = vmatpush1.bf16.msra.mxu0 %v4338_v12  ;;  %v2038_v12 = vld [vmem:[#allocation11 + $0xe0] sm:$0xff] }
 0x680   :  { %4341 = vmatprep.subr.bf16.mxu0 %v4340_v15  ;;  %v2040_v15 = vld [vmem:[#allocation11 + $0xf0] sm:$0xff] }
 0x681   :  { %v5748_v32 = vpack.c.bf16 %v2040_v15, %v2038_v12  ;;  %v1911_v12 = vld [vmem:[#allocation9 + $0x198] sm:$0xff]  ;;  %v2054_v15 = vld [vmem:[#allocation11 + $0x160] sm:$0xff] }
 0x683   :  { %4343 = vmatpush1.bf16.msra.mxu0 %v4342_v47  ;;  %v2045_v47 = vld [vmem:[#allocation11 + $0x118] sm:$0xff] }
 0x735   :  { %v1661_v50 = vpop.f32.mrb[10].mxu0 }
 0x736   :  { %v1663_v59 = vpop.f32.mrb[11].mxu0 }
 0x737   :  { %v1668_v3 = vcombine.low %v1661_v50, %v1663_v59  ;;  %v5752_v50 = vpack.c.bf16 %v2045_v47, %v2043_v33  ;;  %v1897_v59 = vld [vmem:[#allocation9 + $0x128] sm:$0xff]  ;;  %v4356_v33 = vpack.c.bf16 %v1911_v12, %v1909_v28  ;;  %v2056_v47 = vld [vmem:[#allocation11 + $0x170] sm:$0xff]  ;;  %v1923_v12 = vld [vmem:[#allocation9 + $0x1f8] sm:$0xff] }
 0x738   :  { %v1921_v28 = vld [vmem:[#allocation9 + $0x1e8] sm:$0xff] }
 0x739   :  { %v1675_v14 = vrot.slane %v1668_v3, %v5432_v62  ;;  %v1899_v3 = vld [vmem:[#allocation9 + $0x138] sm:$0xff] }
 0x73b   :  { %v1682_v21 = vrot.slane %v1675_v14, %v5432_v62  ;;  %v2042_v14 = vld [vmem:[#allocation11 + $0x100] sm:$0xff] }
 0x73d   :  { %v1684_v42 = vadd.f32 %v1682_v21, %v1519_v37  ;;  %v4344_v21 = vpack.c.bf16 %v1899_v3, %v1897_v59  ;;  %v2044_v37 = vld [vmem:[#allocation11 + $0x110] sm:$0xff]  ;;  %v1908_v59 = vld [vmem:[#allocation9 + $0x180] sm:$0xff] }
 0x73e   :  { %v5755_v60 = vpack.c.bf16 %v2044_v37, %v2042_v14  ;;  %v1910_v3 = vld [vmem:[#allocation9 + $0x190] sm:$0xff]  ;;  %v5773_v14 = vpack.c.bf16 %v2056_v47, %v2054_v15  ;;  %v2059_v37 = vld [vmem:[#allocation11 + $0x188] sm:$0xff]  ;;  %v2066_v47 = vld [vmem:[#allocation11 + $0x1c0] sm:$0xff] }
 0x73f   :  { %4933 = vtanh.f32 %v1684_v42  ;;  %v1896_v42 = vld [vmem:[#allocation9 + $0x120] sm:$0xff]  ;;  %4345 = vmatprep.subr.bf16.mxu0 %v4344_v21  ;;  %v4358_v21 = vpack.c.bf16 %v1910_v3, %v1908_v59  ;;  %v2068_v59 = vld [vmem:[#allocation11 + $0x1d0] sm:$0xff] }
 0x740   :  { %v4346_v29 = vpack.c.bf16 %v1898_v55, %v1896_v42  ;;  %v2061_v42 = vld [vmem:[#allocation11 + $0x198] sm:$0xff]  ;;  %v1920_v3 = vld [vmem:[#allocation9 + $0x1e0] sm:$0xff] }
 0x741   :  { %v5776_v55 = vpack.c.bf16 %v2061_v42, %v2059_v37  ;;  %v1922_v37 = vld [vmem:[#allocation9 + $0x1f0] sm:$0xff] }
 0x742   :  { %4347 = vmatpush1.bf16.msra.mxu0 %v4346_v29  ;;  %v1913_v29 = vld [vmem:[#allocation9 + $0x1a8] sm:$0xff]  ;;  %v4370_v42 = vpack.c.bf16 %v1922_v37, %v1920_v3  ;;  %v2508_v37 = vld [vmem:[#allocation11 + $0x10] sm:$0xff] }
 0x749   :  { %v4934_v41 = vpop.eup %4933 }
 0x74a   :  { %1686 = vst.msk [vmem:[#allocation2 + $0x6] ss:$8 sm:$0x3] %vm5436_vm1, %v4934_v41  ;;  %v1762_v52 = vrot.slane %v4934_v41, %v5429_v34  ;;  %v1758_v6 = vrot.slane %v4934_v41, %v5423_v19  ;;  %v2049_v41 = vld [vmem:[#allocation11 + $0x138] sm:$0xff] }
 0x74c   :  { %1829 = vmatprep.mubr.f32.mxu1 %v1762_v52  ;;  %v5758_v52 = vpack.c.bf16 %v2049_v41, %v2047_v31  ;;  %v1915_v31 = vld [vmem:[#allocation9 + $0x1b8] sm:$0xff]  ;;  %v2058_v41 = vld [vmem:[#allocation11 + $0x180] sm:$0xff] }
 0x74d   :  { %1830 = vmatmul.mubr.f32.vlgmr.msra.gmra.mrb[10].mxu1 %v1758_v6  ;;  %v1901_v6 = vld [vmem:[#allocation9 + $0x148] sm:$0xff] }
 0x74e   :  { %4375 = vmatpush1.bf16.msra.mxu1 %v5706_v13  ;;  %2138 = vmatprep.mubr.f32.mxu1 %v5082_v2  ;;  %v4348_v61 = vpack.c.bf16 %v1903_v48, %v1901_v6  ;;  %v4360_v6 = vpack.c.bf16 %v1915_v31, %v1913_v29  ;;  %v2060_v48 = vld [vmem:[#allocation11 + $0x190] sm:$0xff]  ;;  %v2071_v29 = vld [vmem:[#allocation11 + $0x1e8] sm:$0xff]  ;;  %v2073_v31 = vld [vmem:[#allocation11 + $0x1f8] sm:$0xff] }
 0x74f   :  { %4377 = vmatprep.subr.bf16.mxu1 %v5708_v25  ;;  %v5779_v4 = vpack.c.bf16 %v2060_v48, %v2058_v41  ;;  %v5794_v41 = vpack.c.bf16 %v2073_v31, %v2071_v29  ;;  %v2072_v48 = vld [vmem:[#allocation11 + $0x1f0] sm:$0xff]  ;;  %v2513_v29 = vld [vmem:[#allocation11 + $0x38] sm:$0xff] }
 0x750   :  { %4349 = vmatprep.subr.bf16.mxu0 %v4348_v61  ;;  %v1914_v61 = vld [vmem:[#allocation9 + $0x1b0] sm:$0xff] }
 0x751   :  { %4351 = vmatpush1.bf16.msra.mxu0 %v4350_v36  ;;  %v4362_v17 = vpack.c.bf16 %v1914_v61, %v1912_v54  ;;  %v2065_v36 = vld [vmem:[#allocation11 + $0x1b8] sm:$0xff] }
 0x752   :  { %4379 = vmatpush1.bf16.msra.mxu1 %v5711_v10  ;;  %4353 = vmatprep.subr.bf16.mxu0 %v4352_v44  ;;  %v5782_v63 = vpack.c.bf16 %v2065_v36, %v2063_v22  ;;  %v4364_v44 = vpack.c.bf16 %v1919_v9, %v1917_v56  ;;  %v1689_v56 = vld [vmem:[#allocation2 + $0x7] ss:$8 sm:$0x3] }
 0x753   :  { %4381 = vmatprep.subr.bf16.mxu1 %v5715_v16 }
 0x755   :  { %4355 = vmatpush1.bf16.msra.mxu0 %v4354_v24  ;;  %v2067_v24 = vld [vmem:[#allocation11 + $0x1c8] sm:$0xff] }
 0x756   :  { %4383 = vmatpush1.bf16.msra.mxu1 %v5718_v38  ;;  %4357 = vmatprep.subr.bf16.mxu0 %v4356_v33  ;;  %v5787_v15 = vpack.c.bf16 %v2069_v49, %v2067_v24  ;;  %v4368_v33 = vpack.c.bf16 %v1923_v12, %v1921_v28 }
 0x757   :  { %4385 = vmatprep.subr.bf16.mxu1 %v5721_v45 }
 0x759   :  { %4359 = vmatpush1.bf16.msra.mxu0 %v4358_v21  ;;  %v5790_v21 = vpack.c.bf16 %v2068_v59, %v2066_v47  ;;  %v2509_v47 = vld [vmem:[#allocation11 + $0x18] sm:$0xff]  ;;  %v2506_v59 = vld [vmem:[#allocation11] sm:$0xff] }
 0x75a   :  { %4387 = vmatpush1.bf16.msra.mxu1 %v5724_v26  ;;  %4361 = vmatprep.subr.bf16.mxu0 %v4360_v6  ;;  %v2070_v6 = vld [vmem:[#allocation11 + $0x1e0] sm:$0xff]  ;;  %v5882_v31 = vpack.c.bf16 %v2508_v37, %v2506_v59 }
 0x75b   :  { %4389 = vmatprep.subr.bf16.mxu1 %v5727_v27  ;;  %v5796_v54 = vpack.c.bf16 %v2072_v48, %v2070_v6  ;;  %v2510_v48 = vld [vmem:[#allocation11 + $0x20] sm:$0xff] }
 0x75c   :  { %v2707_v37 = vld [vmem:[#allocation11 + $0x100] sm:$0xff] }
 0x75d   :  { %4363 = vmatpush1.bf16.msra.mxu0 %v4362_v17 }
 0x75e   :  { %4391 = vmatpush1.bf16.msra.mxu1 %v5730_v11  ;;  %4365 = vmatprep.subr.bf16.mxu0 %v4364_v44 }
 0x75f   :  { %4393 = vmatprep.subr.bf16.mxu1 %v5733_v57 }
 0x761   :  { %4367 = vmatpush1.bf16.msra.mxu0 %v4366_v43 }
 0x762   :  { %4395 = vmatpush1.bf16.msra.mxu1 %v5736_v18  ;;  %4369 = vmatprep.subr.bf16.mxu0 %v4368_v33  ;;  %v2507_v33 = vld [vmem:[#allocation11 + $0x8] sm:$0xff] }
 0x763   :  { %4397 = vmatprep.subr.bf16.mxu1 %v5739_v35  ;;  %v5880_v3 = vpack.c.bf16 %v2509_v47, %v2507_v33  ;;  %v2710_v33 = vld [vmem:[#allocation11 + $0x118] sm:$0xff] }
 0x765   :  { %4371 = vmatpush1.bf16.msra.mxu0 %v4370_v42  ;;  %v2511_v42 = vld [vmem:[#allocation11 + $0x28] sm:$0xff] }
 0x766   :  { %4399 = vmatpush1.bf16.msra.mxu1 %v5742_v46  ;;  %4437 = vmatprep.subr.bf16.mxu0 %v5697_v5  ;;  %v5884_v6 = vpack.c.bf16 %v2513_v29, %v2511_v42  ;;  %v2709_v42 = vld [vmem:[#allocation11 + $0x110] sm:$0xff]  ;;  %v2712_v29 = vld [vmem:[#allocation11 + $0x128] sm:$0xff] }
 0x767   :  { %4401 = vmatprep.subr.bf16.mxu1 %v5745_v53 }
 0x76a   :  { %4403 = vmatpush1.bf16.msra.mxu1 %v5748_v32 }
 0x76b   :  { %4405 = vmatprep.subr.bf16.mxu1 %v5752_v50 }
 0x76e   :  { %4407 = vmatpush1.bf16.msra.mxu1 %v5755_v60 }
 0x76f   :  { %4409 = vmatprep.subr.bf16.mxu1 %v5758_v52 }
 0x772   :  { %4411 = vmatpush1.bf16.msra.mxu1 %v5761_v30 }
 0x773   :  { %4413 = vmatprep.subr.bf16.mxu1 %v5764_v0 }
 0x776   :  { %4415 = vmatpush1.bf16.msra.mxu1 %v5767_v8 }
 0x777   :  { %4417 = vmatprep.subr.bf16.mxu1 %v5770_v23 }
 0x77a   :  { %4419 = vmatpush1.bf16.msra.mxu1 %v5773_v14 }
 0x77b   :  { %4421 = vmatprep.subr.bf16.mxu1 %v5776_v55 }
 0x77e   :  { %4423 = vmatpush1.bf16.msra.mxu1 %v5779_v4 }
 0x77f   :  { %4425 = vmatprep.subr.bf16.mxu1 %v5782_v63 }
 0x782   :  { %4427 = vmatpush1.bf16.msra.mxu1 %v5784_v51 }
 0x783   :  { %4429 = vmatprep.subr.bf16.mxu1 %v5787_v15 }
 0x786   :  { %4431 = vmatpush1.bf16.msra.mxu1 %v5790_v21 }
 0x787   :  { %4433 = vmatprep.subr.bf16.mxu1 %v5794_v41 }
 0x78a   :  { %4435 = vmatpush1.bf16.msra.mxu1 %v5796_v54 }
 0x78b   :  { %4501 = vmatprep.subr.bf16.mxu1 %v5697_v5 }
 0x78d   :  { %2139 = vmatmul.mubr.f32.vlgmr.msra.gmra.mrb[12].mxu1 %v5082_v2 }
 0x78e   :  { %4503 = vmatpush1.bf16.msra.mxu1 %v5706_v13 }
 0x78f   :  { %4505 = vmatprep.subr.bf16.mxu1 %v5708_v25 }
 0x792   :  { %4507 = vmatpush1.bf16.msra.mxu1 %v5711_v10 }
 0x793   :  { %4509 = vmatprep.subr.bf16.mxu1 %v5715_v16 }
 0x796   :  { %4511 = vmatpush1.bf16.msra.mxu1 %v5718_v38 }
 0x797   :  { %4513 = vmatprep.subr.bf16.mxu1 %v5721_v45 }
 0x79a   :  { %4515 = vmatpush1.bf16.msra.mxu1 %v5724_v26 }
 0x79b   :  { %4517 = vmatprep.subr.bf16.mxu1 %v5727_v27 }
 0x79e   :  { %4519 = vmatpush1.bf16.msra.mxu1 %v5730_v11 }
 0x79f   :  { %4521 = vmatprep.subr.bf16.mxu1 %v5733_v57 }
 0x7a2   :  { %4523 = vmatpush1.bf16.msra.mxu1 %v5736_v18 }
 0x7a3   :  { %4525 = vmatprep.subr.bf16.mxu1 %v5739_v35 }
 0x7a6   :  { %4527 = vmatpush1.bf16.msra.mxu1 %v5742_v46 }
 0x7a7   :  { %4529 = vmatprep.subr.bf16.mxu1 %v5745_v53 }
 0x7aa   :  { %4531 = vmatpush1.bf16.msra.mxu1 %v5748_v32 }
 0x7ab   :  { %4533 = vmatprep.subr.bf16.mxu1 %v5752_v50 }
 0x7ae   :  { %4535 = vmatpush1.bf16.msra.mxu1 %v5755_v60 }
 0x7af   :  { %4537 = vmatprep.subr.bf16.mxu1 %v5758_v52 }
 0x7b2   :  { %4539 = vmatpush1.bf16.msra.mxu1 %v5761_v30 }
 0x7b3   :  { %4541 = vmatprep.subr.bf16.mxu1 %v5764_v0 }
 0x7b6   :  { %4543 = vmatpush1.bf16.msra.mxu1 %v5767_v8 }
 0x7b7   :  { %4545 = vmatprep.subr.bf16.mxu1 %v5770_v23 }
 0x7ba   :  { %4547 = vmatpush1.bf16.msra.mxu1 %v5773_v14 }
 0x7bb   :  { %4549 = vmatprep.subr.bf16.mxu1 %v5776_v55 }
 0x7be   :  { %4551 = vmatpush1.bf16.msra.mxu1 %v5779_v4 }
 0x7bf   :  { %4553 = vmatprep.subr.bf16.mxu1 %v5782_v63 }
 0x7c2   :  { %4555 = vmatpush1.bf16.msra.mxu1 %v5784_v51 }
 0x7c3   :  { %4557 = vmatprep.subr.bf16.mxu1 %v5787_v15 }
 0x7c6   :  { %4559 = vmatpush1.bf16.msra.mxu1 %v5790_v21 }
 0x7c7   :  { %4561 = vmatprep.subr.bf16.mxu1 %v5794_v41 }
 0x7ca   :  { %4563 = vmatpush1.bf16.msra.mxu1 %v5796_v54 }
 0x7cb   :  { %4629 = vmatprep.subr.bf16.mxu1 %v5880_v3 }
 0x820   :  { %v1831_v5 = vpop.f32.mrb[10].mxu1 }
 0x821   :  { %v1833_v61 = vpop.f32.mrb[11].mxu1 }
 0x822   :  { %v1838_v17 = vcombine.low %v1831_v5, %v1833_v61  ;;  %v2512_v5 = vld [vmem:[#allocation11 + $0x30] sm:$0xff]  ;;  %v2515_v61 = vld [vmem:[#allocation11 + $0x48] sm:$0xff] }
 0x824   :  { %v1845_v22 = vrot.slane %v1838_v17, %v5432_v62  ;;  %v2517_v17 = vld [vmem:[#allocation11 + $0x58] sm:$0xff] }
 0x826   :  { %v1852_v36 = vrot.slane %v1845_v22, %v5432_v62  ;;  %v5889_v22 = vpack.c.bf16 %v2512_v5, %v2510_v48  ;;  %v2714_v48 = vld [vmem:[#allocation11 + $0x138] sm:$0xff]  ;;  %v5969_v5 = vpack.c.bf16 %v2709_v42, %v2707_v37  ;;  %v2729_v37 = vld [vmem:[#allocation11 + $0x1b0] sm:$0xff] }
 0x828   :  { %v1854_v9 = vadd.f32 %v1852_v36, %v1689_v56  ;;  %v5892_v36 = vpack.c.bf16 %v2517_v17, %v2515_v61  ;;  %v2514_v56 = vld [vmem:[#allocation11 + $0x40] sm:$0xff]  ;;  %v5972_v61 = vpack.c.bf16 %v2714_v48, %v2712_v29  ;;  %v2732_v29 = vld [vmem:[#allocation11 + $0x1c8] sm:$0xff]  ;;  %v2734_v48 = vld [vmem:[#allocation11 + $0x1d8] sm:$0xff] }
 0x829   :  { %v2711_v17 = vld [vmem:[#allocation11 + $0x120] sm:$0xff] }
 0x82a   :  { %4935 = vtanh.f32 %v1854_v9  ;;  %v2516_v9 = vld [vmem:[#allocation11 + $0x50] sm:$0xff] }
 0x834   :  { %v4936_v39 = vpop.eup %4935 }
 0x835   :  { %1856 = vst.msk [vmem:[#allocation2 + $0x7] ss:$8 sm:$0x3] %vm5436_vm1, %v4936_v39  ;;  %v2519_v39 = vld [vmem:[#allocation11 + $0x68] sm:$0xff] }
 0x83c   :  { %v1859_v40 = vld [vmem:[#allocation2 + $0x8] sm:$0xff]  ;;  %v1858_v44 = vld [vmem:[#allocation2] sm:$0xff] }
 0x83d   :  { %2000 = vmatprep.mubr.f32.mxu0 %v1859_v40  ;;  %v2521_v40 = vld [vmem:[#allocation11 + $0x78] sm:$0xff] }
 0x83e   :  { %2001 = vmatmul.mubr.f32.vlgmr.msra.gmra.mrb[12].mxu0 %v1858_v44  ;;  %v5895_v44 = vpack.c.bf16 %v2516_v9, %v2514_v56  ;;  %v2713_v56 = vld [vmem:[#allocation11 + $0x130] sm:$0xff] }
 0x83f   :  { %4439 = vmatpush1.bf16.msra.mxu0 %v5706_v13  ;;  %v5975_v9 = vpack.c.bf16 %v2713_v56, %v2711_v17  ;;  %v6036_v17 = vpack.c.bf16 %v2734_v48, %v2732_v29  ;;  %v2731_v56 = vld [vmem:[#allocation11 + $0x1c0] sm:$0xff]  ;;  %v3188_v48 = vld [vmem:[#allocation11 + $0x30] sm:$0xff] }
 0x840   :  { %4441 = vmatprep.subr.bf16.mxu0 %v5708_v25  ;;  %v3186_v29 = vld [vmem:[#allocation11 + $0x20] sm:$0xff] }
 0x843   :  { %4443 = vmatpush1.bf16.msra.mxu0 %v5711_v10 }
 0x844   :  { %4445 = vmatprep.subr.bf16.mxu0 %v5715_v16  ;;  %v1924_v16 = vld [vmem:[%s6201_s7] sm:$0x3] }
 0x847   :  { %4447 = vmatpush1.bf16.msra.mxu0 %v5718_v38  ;;  %v1929_v38 = vrot.slane %v1924_v16, %v5423_v19 }
 0x848   :  { %4449 = vmatprep.subr.bf16.mxu0 %v5721_v45  ;;  %v1933_v45 = vrot.slane %v1924_v16, %v5429_v34  ;;  %v2523_v16 = vld [vmem:[#allocation11 + $0x88] sm:$0xff] }
 0x84b   :  { %4451 = vmatpush1.bf16.msra.mxu0 %v5724_v26 }
 0x84c   :  { %4453 = vmatprep.subr.bf16.mxu0 %v5727_v27 }
 0x84f   :  { %4455 = vmatpush1.bf16.msra.mxu0 %v5730_v11 }
 0x850   :  { %4457 = vmatprep.subr.bf16.mxu0 %v5733_v57 }
 0x853   :  { %4459 = vmatpush1.bf16.msra.mxu0 %v5736_v18 }
 0x854   :  { %4461 = vmatprep.subr.bf16.mxu0 %v5739_v35 }
 0x857   :  { %4463 = vmatpush1.bf16.msra.mxu0 %v5742_v46 }
 0x858   :  { %4465 = vmatprep.subr.bf16.mxu0 %v5745_v53 }
 0x85b   :  { %4467 = vmatpush1.bf16.msra.mxu0 %v5748_v32 }
 0x85c   :  { %4469 = vmatprep.subr.bf16.mxu0 %v5752_v50 }
 0x85f   :  { %4471 = vmatpush1.bf16.msra.mxu0 %v5755_v60 }
 0x860   :  { %4473 = vmatprep.subr.bf16.mxu0 %v5758_v52  ;;  %v2140_v13 = vpop.f32.mrb[12].mxu1 }
 0x861   :  { %v2142_v25 = vpop.f32.mrb[13].mxu1 }
 0x862   :  { %v2147_v10 = vcombine.low %v2140_v13, %v2142_v25  ;;  %v5898_v13 = vpack.c.bf16 %v2521_v40, %v2519_v39  ;;  %v2518_v25 = vld [vmem:[#allocation11 + $0x60] sm:$0xff] }
 0x863   :  { %4475 = vmatpush1.bf16.msra.mxu0 %v5761_v30 }
 0x864   :  { %4477 = vmatprep.subr.bf16.mxu0 %v5764_v0  ;;  %v2154_v58 = vrot.slane %v2147_v10, %v5432_v62  ;;  %v2520_v10 = vld [vmem:[#allocation11 + $0x70] sm:$0xff] }
 0x866   :  { %v2161_v7 = vrot.slane %v2154_v58, %v5432_v62  ;;  %v2529_v58 = vld [vmem:[#allocation11 + $0xb8] sm:$0xff] }
 0x867   :  { %4479 = vmatpush1.bf16.msra.mxu0 %v5767_v8 }
 0x868   :  { %4481 = vmatprep.subr.bf16.mxu0 %v5770_v23 }
 0x86b   :  { %4483 = vmatpush1.bf16.msra.mxu0 %v5773_v14 }
 0x86c   :  { %4485 = vmatprep.subr.bf16.mxu0 %v5776_v55 }
 0x86f   :  { %4487 = vmatpush1.bf16.msra.mxu0 %v5779_v4 }
 0x870   :  { %4489 = vmatprep.subr.bf16.mxu0 %v5782_v63 }
 0x873   :  { %4491 = vmatpush1.bf16.msra.mxu0 %v5784_v51 }
 0x874   :  { %4493 = vmatprep.subr.bf16.mxu0 %v5787_v15 }
 0x877   :  { %4495 = vmatpush1.bf16.msra.mxu0 %v5790_v21 }
 0x878   :  { %4497 = vmatprep.subr.bf16.mxu0 %v5794_v41 }
 0x87b   :  { %4499 = vmatpush1.bf16.msra.mxu0 %v5796_v54 }
 0x87c   :  { %4565 = vmatprep.subr.bf16.mxu0 %v5880_v3 }
 0x911   :  { %v2002_v26 = vpop.f32.mrb[12].mxu0 }
 0x912   :  { %v2003_v27 = vadd.f32 %v2002_v26, %v1929_v38  ;;  %v2004_v11 = vpop.f32.mrb[13].mxu0  ;;  %v2525_v38 = vld [vmem:[#allocation11 + $0x98] sm:$0xff] }
 0x913   :  { %v2005_v57 = vadd.f32 %v2004_v11, %v1933_v45  ;;  %v5901_v45 = vpack.c.bf16 %v2520_v10, %v2518_v25  ;;  %v5904_v26 = vpack.c.bf16 %v2525_v38, %v2523_v16  ;;  %v2524_v11 = vld [vmem:[#allocation11 + $0x90] sm:$0xff] }
 0x914   :  { %2007 = vst [vmem:[#allocation2] sm:$0xff] %v2003_v27  ;;  %v2522_v27 = vld [vmem:[#allocation11 + $0x80] sm:$0xff] }
 0x915   :  { %2008 = vst [vmem:[#allocation2 + $0x8] sm:$0xff] %v2005_v57  ;;  %v2527_v57 = vld [vmem:[#allocation11 + $0xa8] sm:$0xff] }
 0x91c   :  { %v2009_v24 = vld [vmem:[#allocation2] ss:$8 sm:$0x3]  ;;  %v2336_v38 = vld [vmem:[#allocation2 + $0x2] ss:$8 sm:$0x3] }
 0x91d   :  { %v2163_v43 = vadd.f32 %v2161_v7, %v2009_v24  ;;  %v5907_v7 = vpack.c.bf16 %v2524_v11, %v2522_v27  ;;  %v5910_v24 = vpack.c.bf16 %v2529_v58, %v2527_v57 }
 0x91f   :  { %4937 = vtanh.f32 %v2163_v43 }
 0x929   :  { %v4938_v49 = vpop.eup %4937 }
 0x92a   :  { %2165 = vst.msk [vmem:[#allocation2] ss:$8 sm:$0x3] %vm5436_vm1, %v4938_v49  ;;  %v2240_v28 = vrot.slane %v4938_v49, %v5429_v34  ;;  %v2236_v12 = vrot.slane %v4938_v49, %v5423_v19  ;;  %v2703_v49 = vld [vmem:[#allocation11 + $0xe0] sm:$0xff] }
 0x92c   :  { %2307 = vmatprep.mubr.f32.mxu0 %v2240_v28  ;;  %v2705_v28 = vld [vmem:[#allocation11 + $0xf0] sm:$0xff] }
 0x92d   :  { %2308 = vmatmul.mubr.f32.vlgmr.msra.gmra.mrb[14].mxu0 %v2236_v12  ;;  %v2708_v12 = vld [vmem:[#allocation11 + $0x108] sm:$0xff]  ;;  %v5963_v47 = vpack.c.bf16 %v2705_v28, %v2703_v49  ;;  %v2730_v28 = vld [vmem:[#allocation11 + $0x1b8] sm:$0xff] }
 0x92e   :  { %4567 = vmatpush1.bf16.msra.mxu0 %v5882_v31  ;;  %v5966_v59 = vpack.c.bf16 %v2710_v33, %v2708_v12  ;;  %v2728_v49 = vld [vmem:[#allocation11 + $0x1a8] sm:$0xff]  ;;  %v2727_v33 = vld [vmem:[#allocation11 + $0x1a0] sm:$0xff] }
 0x92f   :  { %4569 = vmatprep.subr.bf16.mxu0 %v5884_v6  ;;  %v6028_v12 = vpack.c.bf16 %v2730_v28, %v2728_v49  ;;  %v6030_v42 = vpack.c.bf16 %v2729_v37, %v2727_v33  ;;  %v3187_v49 = vld [vmem:[#allocation11 + $0x28] sm:$0xff]  ;;  %v3189_v28 = vld [vmem:[#allocation11 + $0x38] sm:$0xff] }
 0x930   :  { %v4824_v37 = vpack.c.bf16 %v3189_v28, %v3187_v49  ;;  %v3364_v49 = vld [vmem:[%s6203_s9 + $0x48] sm:$0xff] }
 0x932   :  { %4571 = vmatpush1.bf16.msra.mxu0 %v5889_v22 }
 0x933   :  { %4573 = vmatprep.subr.bf16.mxu0 %v5892_v36 }
 0x936   :  { %4575 = vmatpush1.bf16.msra.mxu0 %v5895_v44 }
 0x937   :  { %4577 = vmatprep.subr.bf16.mxu0 %v5898_v13 }
 0x93a   :  { %4579 = vmatpush1.bf16.msra.mxu0 %v5901_v45 }
 0x93b   :  { %4581 = vmatprep.subr.bf16.mxu0 %v5904_v26 }
 0x93e   :  { %4583 = vmatpush1.bf16.msra.mxu0 %v5907_v7 }
 0x93f   :  { %4585 = vmatprep.subr.bf16.mxu0 %v5910_v24 }
 0x942   :  { %4587 = vmatpush1.bf16.msra.mxu0 %v5736_v18 }
 0x943   :  { %4589 = vmatprep.subr.bf16.mxu0 %v5739_v35 }
 0x946   :  { %4591 = vmatpush1.bf16.msra.mxu0 %v5742_v46 }
 0x947   :  { %4593 = vmatprep.subr.bf16.mxu0 %v5745_v53 }
 0x94a   :  { %4595 = vmatpush1.bf16.msra.mxu0 %v5748_v32 }
 0x94b   :  { %4597 = vmatprep.subr.bf16.mxu0 %v5752_v50  ;;  %v2167_v50 = vld [vmem:[#allocation2 + $0x1] ss:$8 sm:$0x3] }
 0x94e   :  { %4599 = vmatpush1.bf16.msra.mxu0 %v5755_v60 }
 0x94f   :  { %4601 = vmatprep.subr.bf16.mxu0 %v5758_v52 }
 0x952   :  { %4603 = vmatpush1.bf16.msra.mxu0 %v5761_v30 }
 0x953   :  { %4605 = vmatprep.subr.bf16.mxu0 %v5764_v0 }
 0x956   :  { %4607 = vmatpush1.bf16.msra.mxu0 %v5767_v8  ;;  %v2695_v8 = vld [vmem:[#allocation11 + $0xa0] sm:$0xff] }
 0x957   :  { %4609 = vmatprep.subr.bf16.mxu0 %v5770_v23  ;;  %v2697_v23 = vld [vmem:[#allocation11 + $0xb0] sm:$0xff] }
 0x95a   :  { %4611 = vmatpush1.bf16.msra.mxu0 %v5773_v14  ;;  %v2700_v14 = vld [vmem:[#allocation11 + $0xc8] sm:$0xff] }
 0x95b   :  { %4613 = vmatprep.subr.bf16.mxu0 %v5776_v55  ;;  %v5952_v55 = vpack.c.bf16 %v2697_v23, %v2695_v8  ;;  %v2721_v8 = vld [vmem:[#allocation11 + $0x170] sm:$0xff] }
 0x95e   :  { %4615 = vmatpush1.bf16.msra.mxu0 %v5779_v4  ;;  %v2702_v4 = vld [vmem:[#allocation11 + $0xd8] sm:$0xff] }
 0x95f   :  { %4617 = vmatprep.subr.bf16.mxu0 %v5782_v63  ;;  %v2699_v63 = vld [vmem:[#allocation11 + $0xc0] sm:$0xff] }
 0x962   :  { %4619 = vmatpush1.bf16.msra.mxu0 %v5784_v51  ;;  %v2701_v51 = vld [vmem:[#allocation11 + $0xd0] sm:$0xff] }
 0x963   :  { %4621 = vmatprep.subr.bf16.mxu0 %v5787_v15  ;;  %v5954_v15 = vpack.c.bf16 %v2702_v4, %v2700_v14  ;;  %v2724_v14 = vld [vmem:[#allocation11 + $0x188] sm:$0xff]  ;;  %v2726_v4 = vld [vmem:[#allocation11 + $0x198] sm:$0xff] }
 0x966   :  { %4623 = vmatpush1.bf16.msra.mxu0 %v5790_v21  ;;  %v2704_v21 = vld [vmem:[#allocation11 + $0xe8] sm:$0xff] }
 0x967   :  { %4625 = vmatprep.subr.bf16.mxu0 %v5794_v41  ;;  %v2706_v41 = vld [vmem:[#allocation11 + $0xf8] sm:$0xff] }
 0x968   :  { %v5960_v43 = vpack.c.bf16 %v2706_v41, %v2704_v21  ;;  %v2725_v21 = vld [vmem:[#allocation11 + $0x190] sm:$0xff] }
 0x96a   :  { %4627 = vmatpush1.bf16.msra.mxu0 %v5796_v54  ;;  %v5957_v54 = vpack.c.bf16 %v2701_v51, %v2699_v63  ;;  %v6020_v63 = vpack.c.bf16 %v2726_v4, %v2724_v14  ;;  %v2723_v51 = vld [vmem:[#allocation11 + $0x180] sm:$0xff]  ;;  %v3185_v14 = vld [vmem:[#allocation11 + $0x18] sm:$0xff] }
 0x96b   :  { %4693 = vmatprep.subr.bf16.mxu0 %v5880_v3  ;;  %v6022_v41 = vpack.c.bf16 %v2725_v21, %v2723_v51  ;;  %v3182_v4 = vld [vmem:[#allocation11] sm:$0xff]  ;;  %v3184_v21 = vld [vmem:[#allocation11 + $0x10] sm:$0xff] }
 0x96c   :  { %v4822_v33 = vpack.c.bf16 %v3184_v21, %v3182_v4  ;;  %v3362_v4 = vld [vmem:[%s6203_s9 + $0x38] sm:$0xff]  ;;  %v3363_v21 = vld [vmem:[%s6203_s9 + $0x40] sm:$0xff] }
 0x96d   :  { %v4897_v28 = vpack.c.bf16 %v3364_v49, %v3363_v21 }
 0xa00   :  { %v2309_v18 = vpop.f32.mrb[14].mxu0 }
 0xa01   :  { %v2311_v35 = vpop.f32.mrb[15].mxu0 }
 0xa02   :  { %v2316_v46 = vcombine.low %v2309_v18, %v2311_v35  ;;  %v2716_v18 = vld [vmem:[#allocation11 + $0x148] sm:$0xff]  ;;  %v2718_v35 = vld [vmem:[#allocation11 + $0x158] sm:$0xff] }
 0xa04   :  { %v2323_v53 = vrot.slane %v2316_v46, %v5432_v62  ;;  %v6004_v46 = vpack.c.bf16 %v2718_v35, %v2716_v18 }
 0xa06   :  { %v2330_v32 = vrot.slane %v2323_v53, %v5432_v62  ;;  %v2715_v53 = vld [vmem:[#allocation11 + $0x140] sm:$0xff] }
 0xa08   :  { %v2332_v60 = vadd.f32 %v2330_v32, %v2167_v50  ;;  %v2717_v32 = vld [vmem:[#allocation11 + $0x150] sm:$0xff] }
 0xa09   :  { %v6006_v50 = vpack.c.bf16 %v2717_v32, %v2715_v53  ;;  %v2505_v32 = vld [vmem:[#allocation2 + $0x3] ss:$8 sm:$0x3] }
 0xa0a   :  { %4939 = vtanh.f32 %v2332_v60  ;;  %v2720_v60 = vld [vmem:[#allocation11 + $0x168] sm:$0xff] }
 0xa14   :  { %v4940_v52 = vpop.eup %4939 }
 0xa15   :  { %2334 = vst.msk [vmem:[#allocation2 + $0x1] ss:$8 sm:$0x3] %vm5436_vm1, %v4940_v52  ;;  %v2409_v30 = vrot.slane %v4940_v52, %v5429_v34  ;;  %v2405_v0 = vrot.slane %v4940_v52, %v5423_v19  ;;  %v2722_v52 = vld [vmem:[#allocation11 + $0x178] sm:$0xff] }
 0xa17   :  { %2476 = vmatprep.mubr.f32.mxu1 %v2409_v30  ;;  %v6012_v30 = vpack.c.bf16 %v2722_v52, %v2720_v60 }
 0xa18   :  { %2477 = vmatmul.mubr.f32.vlgmr.msra.gmra.mrb[14].mxu1 %v2405_v0  ;;  %v2719_v0 = vld [vmem:[#allocation11 + $0x160] sm:$0xff] }
 0xa19   :  { %4631 = vmatpush1.bf16.msra.mxu1 %v5882_v31  ;;  %v6014_v23 = vpack.c.bf16 %v2721_v8, %v2719_v0 }
 0xa1a   :  { %4633 = vmatprep.subr.bf16.mxu1 %v5884_v6 }
 0xa1d   :  { %4635 = vmatpush1.bf16.msra.mxu1 %v5889_v22 }
 0xa1e   :  { %4637 = vmatprep.subr.bf16.mxu1 %v5892_v36 }
 0xa21   :  { %4639 = vmatpush1.bf16.msra.mxu1 %v5895_v44 }
 0xa22   :  { %4641 = vmatprep.subr.bf16.mxu1 %v5898_v13 }
 0xa25   :  { %4643 = vmatpush1.bf16.msra.mxu1 %v5901_v45 }
 0xa26   :  { %4645 = vmatprep.subr.bf16.mxu1 %v5904_v26 }
 0xa29   :  { %4647 = vmatpush1.bf16.msra.mxu1 %v5907_v7 }
 0xa2a   :  { %4649 = vmatprep.subr.bf16.mxu1 %v5910_v24 }
 0xa2d   :  { %4651 = vmatpush1.bf16.msra.mxu1 %v5952_v55 }
 0xa2e   :  { %4653 = vmatprep.subr.bf16.mxu1 %v5954_v15 }
 0xa31   :  { %4655 = vmatpush1.bf16.msra.mxu1 %v5957_v54 }
 0xa32   :  { %4657 = vmatprep.subr.bf16.mxu1 %v5960_v43 }
 0xa35   :  { %4659 = vmatpush1.bf16.msra.mxu1 %v5963_v47 }
 0xa36   :  { %4661 = vmatprep.subr.bf16.mxu1 %v5966_v59 }
 0xa39   :  { %4663 = vmatpush1.bf16.msra.mxu1 %v5969_v5 }
 0xa3a   :  { %4665 = vmatprep.subr.bf16.mxu1 %v5972_v61 }
 0xa3d   :  { %4667 = vmatpush1.bf16.msra.mxu1 %v5975_v9 }
 0xa3e   :  { %4669 = vmatprep.subr.bf16.mxu1 %v6004_v46 }
 0xa41   :  { %4671 = vmatpush1.bf16.msra.mxu1 %v6006_v50 }
 0xa42   :  { %4673 = vmatprep.subr.bf16.mxu1 %v6012_v30 }
 0xa45   :  { %4675 = vmatpush1.bf16.msra.mxu1 %v6014_v23 }
 0xa46   :  { %4677 = vmatprep.subr.bf16.mxu1 %v6020_v63 }
 0xa49   :  { %4679 = vmatpush1.bf16.msra.mxu1 %v6022_v41 }
 0xa4a   :  { %4681 = vmatprep.subr.bf16.mxu1 %v6028_v12 }
 0xa4d   :  { %4683 = vmatpush1.bf16.msra.mxu1 %v6030_v42 }
 0xa4e   :  { %4685 = vmatprep.subr.bf16.mxu1 %v6036_v17 }
 0xaeb   :  { %v2478_v39 = vpop.f32.mrb[14].mxu1 }
 0xaec   :  { %v2480_v40 = vpop.f32.mrb[15].mxu1 }
 0xaed   :  { %v2485_v25 = vcombine.low %v2478_v39, %v2480_v40  ;;  %v2733_v39 = vld [vmem:[#allocation11 + $0x1d0] sm:$0xff] }
 0xaee   :  { %v6038_v40 = vpack.c.bf16 %v2733_v39, %v2731_v56  ;;  %v3191_v56 = vld [vmem:[#allocation11 + $0x48] sm:$0xff]  ;;  %v3193_v39 = vld [vmem:[#allocation11 + $0x58] sm:$0xff] }
 0xaef   :  { %v2492_v10 = vrot.slane %v2485_v25, %v5432_v62  ;;  %v2736_v25 = vld [vmem:[#allocation11 + $0x1e8] sm:$0xff] }
 0xaf0   :  { %4687 = vmatpush1.bf16.msra.mxu1 %v6038_v40 }
 0xaf1   :  { %v2499_v16 = vrot.slane %v2492_v10, %v5432_v62  ;;  %v2738_v10 = vld [vmem:[#allocation11 + $0x1f8] sm:$0xff] }
 0xaf3   :  { %v2501_v27 = vadd.f32 %v2499_v16, %v2336_v38  ;;  %v6044_v16 = vpack.c.bf16 %v2738_v10, %v2736_v25  ;;  %v2735_v38 = vld [vmem:[#allocation11 + $0x1e0] sm:$0xff]  ;;  %v4826_v25 = vpack.c.bf16 %v3188_v48, %v3186_v29  ;;  %v4828_v10 = vpack.c.bf16 %v3193_v39, %v3191_v56  ;;  %v3367_v48 = vld [vmem:[%s6203_s9 + $0x60] sm:$0xff]  ;;  %v3368_v56 = vld [vmem:[%s6203_s9 + $0x68] sm:$0xff] }
 0xaf4   :  { %v4903_v39 = vpack.c.bf16 %v3368_v56, %v3367_v48 }
 0xaf5   :  { %4941 = vtanh.f32 %v2501_v27  ;;  %v2737_v27 = vld [vmem:[#allocation11 + $0x1f0] sm:$0xff]  ;;  %4689 = vmatprep.subr.bf16.mxu1 %v6044_v16 }
 0xaff   :  { %v4942_v11 = vpop.eup %4941 }
 0xb00   :  { %2503 = vst.msk [vmem:[#allocation2 + $0x2] ss:$8 sm:$0x3] %vm5436_vm1, %v4942_v11  ;;  %v2578_v57 = vrot.slane %v4942_v11, %v5429_v34  ;;  %v2574_v58 = vrot.slane %v4942_v11, %v5423_v19  ;;  %v6046_v11 = vpack.c.bf16 %v2737_v27, %v2735_v38  ;;  %v3190_v38 = vld [vmem:[#allocation11 + $0x40] sm:$0xff]  ;;  %v3192_v27 = vld [vmem:[#allocation11 + $0x50] sm:$0xff] }
 0xb02   :  { %2645 = vmatprep.mubr.f32.mxu0 %v2578_v57  ;;  %4691 = vmatpush1.bf16.msra.mxu1 %v6046_v11 }
 0xb03   :  { %2646 = vmatmul.mubr.f32.vlgmr.msra.gmra.mrb[16].mxu0 %v2574_v58  ;;  %4757 = vmatprep.subr.bf16.mxu1 %v5880_v3 }
 0xb04   :  { %4695 = vmatpush1.bf16.msra.mxu0 %v5882_v31 }
 0xb05   :  { %4697 = vmatprep.subr.bf16.mxu0 %v5884_v6 }
 0xb08   :  { %4699 = vmatpush1.bf16.msra.mxu0 %v5889_v22 }
 0xb09   :  { %4701 = vmatprep.subr.bf16.mxu0 %v5892_v36 }
 0xb0c   :  { %4703 = vmatpush1.bf16.msra.mxu0 %v5895_v44 }
 0xb0d   :  { %4705 = vmatprep.subr.bf16.mxu0 %v5898_v13 }
 0xb10   :  { %4707 = vmatpush1.bf16.msra.mxu0 %v5901_v45 }
 0xb11   :  { %4709 = vmatprep.subr.bf16.mxu0 %v5904_v26 }
 0xb14   :  { %4711 = vmatpush1.bf16.msra.mxu0 %v5907_v7 }
 0xb15   :  { %4713 = vmatprep.subr.bf16.mxu0 %v5910_v24 }
 0xb18   :  { %4715 = vmatpush1.bf16.msra.mxu0 %v5952_v55 }
 0xb19   :  { %4717 = vmatprep.subr.bf16.mxu0 %v5954_v15 }
 0xb1c   :  { %4719 = vmatpush1.bf16.msra.mxu0 %v5957_v54 }
 0xb1d   :  { %4721 = vmatprep.subr.bf16.mxu0 %v5960_v43 }
 0xb20   :  { %4723 = vmatpush1.bf16.msra.mxu0 %v5963_v47 }
 0xb21   :  { %4725 = vmatprep.subr.bf16.mxu0 %v5966_v59 }
 0xb24   :  { %4727 = vmatpush1.bf16.msra.mxu0 %v5969_v5 }
 0xb25   :  { %4729 = vmatprep.subr.bf16.mxu0 %v5972_v61 }
 0xb28   :  { %4731 = vmatpush1.bf16.msra.mxu0 %v5975_v9 }
 0xb29   :  { %4733 = vmatprep.subr.bf16.mxu0 %v6004_v46 }
 0xb2c   :  { %4735 = vmatpush1.bf16.msra.mxu0 %v6006_v50 }
 0xb2d   :  { %4737 = vmatprep.subr.bf16.mxu0 %v6012_v30 }
 0xb30   :  { %4739 = vmatpush1.bf16.msra.mxu0 %v6014_v23 }
 0xb31   :  { %4741 = vmatprep.subr.bf16.mxu0 %v6020_v63 }
 0xb34   :  { %4743 = vmatpush1.bf16.msra.mxu0 %v6022_v41 }
 0xb35   :  { %4745 = vmatprep.subr.bf16.mxu0 %v6028_v12 }
 0xb38   :  { %4747 = vmatpush1.bf16.msra.mxu0 %v6030_v42 }
 0xb39   :  { %4749 = vmatprep.subr.bf16.mxu0 %v6036_v17 }
 0xb3c   :  { %4751 = vmatpush1.bf16.msra.mxu0 %v6038_v40 }
 0xb3d   :  { %4753 = vmatprep.subr.bf16.mxu0 %v6044_v16 }
 0xb40   :  { %4755 = vmatpush1.bf16.msra.mxu0 %v6046_v11 }
 0xbd6   :  { %v2647_v57 = vpop.f32.mrb[16].mxu0 }
 0xbd7   :  { %v2649_v58 = vpop.f32.mrb[17].mxu0 }
 0xbd8   :  { %v2654_v18 = vcombine.low %v2647_v57, %v2649_v58  ;;  %v3195_v57 = vld [vmem:[#allocation11 + $0x68] sm:$0xff]  ;;  %v3197_v58 = vld [vmem:[#allocation11 + $0x78] sm:$0xff] }
 0xbda   :  { %v2661_v35 = vrot.slane %v2654_v18, %v5432_v62  ;;  %v4830_v18 = vpack.c.bf16 %v3192_v27, %v3190_v38 }
 0xbdc   :  { %v2668_v53 = vrot.slane %v2661_v35, %v5432_v62  ;;  %v4832_v35 = vpack.c.bf16 %v3197_v58, %v3195_v57 }
 0xbde   :  { %v2670_v60 = vadd.f32 %v2668_v53, %v2505_v32  ;;  %v3194_v53 = vld [vmem:[#allocation11 + $0x60] sm:$0xff]  ;;  %v3196_v32 = vld [vmem:[#allocation11 + $0x70] sm:$0xff] }
 0xbe0   :  { %4943 = vtanh.f32 %v2670_v60  ;;  %v3199_v60 = vld [vmem:[#allocation11 + $0x88] sm:$0xff] }
 0xbea   :  { %v4944_v52 = vpop.eup %4943 }
 0xbeb   :  { %2672 = vst.msk [vmem:[#allocation2 + $0x3] ss:$8 sm:$0x3] %vm5436_vm1, %v4944_v52  ;;  %v2747_v0 = vrot.slane %v4944_v52, %v5429_v34  ;;  %v2743_v8 = vrot.slane %v4944_v52, %v5423_v19  ;;  %v3201_v52 = vld [vmem:[#allocation11 + $0x98] sm:$0xff] }
 0xbed   :  { %2814 = vmatprep.mubr.f32.mxu1 %v2747_v0  ;;  %v4834_v0 = vpack.c.bf16 %v3196_v32, %v3194_v53  ;;  %v3181_v53 = vld [vmem:[#allocation2 + $0x7] ss:$8 sm:$0x3] }
 0xbee   :  { %2815 = vmatmul.mubr.f32.vlgmr.msra.gmra.mrb[16].mxu1 %v2743_v8  ;;  %v4836_v8 = vpack.c.bf16 %v3201_v52, %v3199_v60 }
 0xbef   :  { %4759 = vmatpush1.bf16.msra.mxu1 %v5882_v31 }
 0xbf0   :  { %4761 = vmatprep.subr.bf16.mxu1 %v5884_v6 }
 0xbf3   :  { %4763 = vmatpush1.bf16.msra.mxu1 %v5889_v22 }
 0xbf4   :  { %4765 = vmatprep.subr.bf16.mxu1 %v5892_v36 }
 0xbf7   :  { %4767 = vmatpush1.bf16.msra.mxu1 %v5895_v44  ;;  %v2674_v44 = vld [vmem:[#allocation2 + $0x4] ss:$8 sm:$0x3] }
 0xbf8   :  { %4769 = vmatprep.subr.bf16.mxu1 %v5898_v13 }
 0xbfb   :  { %4771 = vmatpush1.bf16.msra.mxu1 %v5901_v45 }
 0xbfc   :  { %4773 = vmatprep.subr.bf16.mxu1 %v5904_v26 }
 0xbff   :  { %4775 = vmatpush1.bf16.msra.mxu1 %v5907_v7 }
 0xc00   :  { %4777 = vmatprep.subr.bf16.mxu1 %v5910_v24  ;;  %v3183_v24 = vld [vmem:[#allocation11 + $0x8] sm:$0xff] }
 0xc01   :  { %v4820_v51 = vpack.c.bf16 %v3185_v14, %v3183_v24  ;;  %v3361_v24 = vld [vmem:[%s6203_s9 + $0x30] sm:$0xff] }
 0xc03   :  { %4779 = vmatpush1.bf16.msra.mxu1 %v5952_v55  ;;  %4821 = vmatprep.subr.bf16.mxu0 %v4820_v51  ;;  %v4894_v51 = vpack.c.bf16 %v3362_v4, %v3361_v24 }
 0xc04   :  { %4781 = vmatprep.subr.bf16.mxu1 %v5954_v15 }
 0xc07   :  { %4783 = vmatpush1.bf16.msra.mxu1 %v5957_v54 }
 0xc08   :  { %4785 = vmatprep.subr.bf16.mxu1 %v5960_v43 }
 0xc0b   :  { %4787 = vmatpush1.bf16.msra.mxu1 %v5963_v47 }
 0xc0c   :  { %4789 = vmatprep.subr.bf16.mxu1 %v5966_v59 }
 0xc0f   :  { %4791 = vmatpush1.bf16.msra.mxu1 %v5969_v5 }
 0xc10   :  { %4793 = vmatprep.subr.bf16.mxu1 %v5972_v61 }
 0xc13   :  { %4795 = vmatpush1.bf16.msra.mxu1 %v5975_v9 }
 0xc14   :  { %4797 = vmatprep.subr.bf16.mxu1 %v6004_v46 }
 0xc17   :  { %4799 = vmatpush1.bf16.msra.mxu1 %v6006_v50 }
 0xc18   :  { %4801 = vmatprep.subr.bf16.mxu1 %v6012_v30 }
 0xc1b   :  { %4803 = vmatpush1.bf16.msra.mxu1 %v6014_v23 }
 0xc1c   :  { %4805 = vmatprep.subr.bf16.mxu1 %v6020_v63 }
 0xc1f   :  { %4807 = vmatpush1.bf16.msra.mxu1 %v6022_v41 }
 0xc20   :  { %4809 = vmatprep.subr.bf16.mxu1 %v6028_v12 }
 0xc23   :  { %4811 = vmatpush1.bf16.msra.mxu1 %v6030_v42 }
 0xc24   :  { %4813 = vmatprep.subr.bf16.mxu1 %v6036_v17 }
 0xc27   :  { %4815 = vmatpush1.bf16.msra.mxu1 %v6038_v40 }
 0xc28   :  { %4817 = vmatprep.subr.bf16.mxu1 %v6044_v16 }
 0xc2b   :  { %4819 = vmatpush1.bf16.msra.mxu1 %v6046_v11 }
 0xc2c   :  { %4884 = vmatprep.subr.bf16.mxu1 %v5080_v1 }
 0xcc1   :  { %v2816_v3 = vpop.f32.mrb[16].mxu1 }
 0xcc2   :  { %v2818_v31 = vpop.f32.mrb[17].mxu1 }
 0xcc3   :  { %v2823_v6 = vcombine.low %v2816_v3, %v2818_v31  ;;  %v3198_v3 = vld [vmem:[#allocation11 + $0x80] sm:$0xff]  ;;  %v3200_v31 = vld [vmem:[#allocation11 + $0x90] sm:$0xff] }
 0xcc5   :  { %v2830_v22 = vrot.slane %v2823_v6, %v5432_v62  ;;  %v3203_v6 = vld [vmem:[#allocation11 + $0xa8] sm:$0xff] }
 0xcc7   :  { %v2837_v36 = vrot.slane %v2830_v22, %v5432_v62  ;;  %v3205_v22 = vld [vmem:[#allocation11 + $0xb8] sm:$0xff] }
 0xcc9   :  { %v2839_v13 = vadd.f32 %v2837_v36, %v2674_v44  ;;  %v4838_v36 = vpack.c.bf16 %v3200_v31, %v3198_v3  ;;  %v4840_v44 = vpack.c.bf16 %v3205_v22, %v3203_v6  ;;  %v3457_v31 = vld [vmem:[#allocation3] ss:$0 sm:$0xff] }
 0xccb   :  { %4945 = vtanh.f32 %v2839_v13 }
 0xcd5   :  { %v4946_v45 = vpop.eup %4945 }
 0xcd6   :  { %2841 = vst.msk [vmem:[#allocation2 + $0x4] ss:$8 sm:$0x3] %vm5436_vm1, %v4946_v45  ;;  %v2916_v26 = vrot.slane %v4946_v45, %v5429_v34  ;;  %v2912_v7 = vrot.slane %v4946_v45, %v5423_v19 }
 0xcd8   :  { %2983 = vmatprep.mubr.f32.mxu0 %v2916_v26  ;;  %v3359_v26 = vld [vmem:[%s6203_s9 + $0x20] sm:$0xff] }
 0xcd9   :  { %2984 = vmatmul.mubr.f32.vlgmr.msra.gmra.mrb[18].mxu0 %v2912_v7  ;;  %v3360_v7 = vld [vmem:[%s6203_s9 + $0x28] sm:$0xff] }
 0xcda   :  { %4823 = vmatpush1.bf16.msra.mxu0 %v4822_v33  ;;  %v4891_v14 = vpack.c.bf16 %v3360_v7, %v3359_v26  ;;  %v3365_v33 = vld [vmem:[%s6203_s9 + $0x50] sm:$0xff] }
 0xcdb   :  { %4825 = vmatprep.subr.bf16.mxu0 %v4824_v37  ;;  %v3366_v37 = vld [vmem:[%s6203_s9 + $0x58] sm:$0xff] }
 0xcdc   :  { %v4900_v29 = vpack.c.bf16 %v3366_v37, %v3365_v33 }
 0xcde   :  { %4827 = vmatpush1.bf16.msra.mxu0 %v4826_v25  ;;  %v3369_v25 = vld [vmem:[%s6203_s9 + $0x70] sm:$0xff] }
 0xcdf   :  { %4829 = vmatprep.subr.bf16.mxu0 %v4828_v10  ;;  %v3370_v10 = vld [vmem:[%s6203_s9 + $0x78] sm:$0xff] }
 0xce0   :  { %v4906_v38 = vpack.c.bf16 %v3370_v10, %v3369_v25 }
 0xce2   :  { %4831 = vmatpush1.bf16.msra.mxu0 %v4830_v18 }
 0xce3   :  { %4833 = vmatprep.subr.bf16.mxu0 %v4832_v35 }
 0xce6   :  { %4835 = vmatpush1.bf16.msra.mxu0 %v4834_v0 }
 0xce7   :  { %4837 = vmatprep.subr.bf16.mxu0 %v4836_v8 }
 0xcea   :  { %4839 = vmatpush1.bf16.msra.mxu0 %v4838_v36 }
 0xceb   :  { %4841 = vmatprep.subr.bf16.mxu0 %v4840_v44 }
 0xcee   :  { %4843 = vmatpush1.bf16.msra.mxu0 %v5952_v55 }
 0xcef   :  { %4845 = vmatprep.subr.bf16.mxu0 %v5954_v15 }
 0xcf2   :  { %4847 = vmatpush1.bf16.msra.mxu0 %v5957_v54 }
 0xcf3   :  { %4849 = vmatprep.subr.bf16.mxu0 %v5960_v43 }
 0xcf6   :  { %4851 = vmatpush1.bf16.msra.mxu0 %v5963_v47 }
 0xcf7   :  { %4853 = vmatprep.subr.bf16.mxu0 %v5966_v59  ;;  %v2843_v59 = vld [vmem:[#allocation2 + $0x5] ss:$8 sm:$0x3] }
 0xcfa   :  { %4855 = vmatpush1.bf16.msra.mxu0 %v5969_v5 }
 0xcfb   :  { %4857 = vmatprep.subr.bf16.mxu0 %v5972_v61 }
 0xcfe   :  { %4859 = vmatpush1.bf16.msra.mxu0 %v5975_v9 }
 0xcff   :  { %4861 = vmatprep.subr.bf16.mxu0 %v6004_v46 }
 0xd02   :  { %4863 = vmatpush1.bf16.msra.mxu0 %v6006_v50 }
 0xd03   :  { %4865 = vmatprep.subr.bf16.mxu0 %v6012_v30 }
 0xd06   :  { %4867 = vmatpush1.bf16.msra.mxu0 %v6014_v23 }
 0xd07   :  { %4869 = vmatprep.subr.bf16.mxu0 %v6020_v63 }
 0xd0a   :  { %4871 = vmatpush1.bf16.msra.mxu0 %v6022_v41 }
 0xd0b   :  { %4873 = vmatprep.subr.bf16.mxu0 %v6028_v12  ;;  %v3012_v12 = vld [vmem:[#allocation2 + $0x6] ss:$8 sm:$0x3] }
 0xd0e   :  { %4875 = vmatpush1.bf16.msra.mxu0 %v6030_v42 }
 0xd0f   :  { %4877 = vmatprep.subr.bf16.mxu0 %v6036_v17 }
 0xd12   :  { %4879 = vmatpush1.bf16.msra.mxu0 %v6038_v40 }
 0xd13   :  { %4881 = vmatprep.subr.bf16.mxu0 %v6044_v16 }
 0xd16   :  { %4883 = vmatpush1.bf16.msra.mxu0 %v6046_v11  ;;  %v3356_v11 = vld [vmem:[%s6203_s9 + $0x8] sm:$0xff] }
 0xdac   :  { %v2985_v55 = vpop.f32.mrb[18].mxu0 }
 0xdad   :  { %v2987_v15 = vpop.f32.mrb[19].mxu0 }
 0xdae   :  { %v2992_v54 = vcombine.low %v2985_v55, %v2987_v15 }
 0xdb0   :  { %v2999_v43 = vrot.slane %v2992_v54, %v5432_v62 }
 0xdb2   :  { %v3006_v47 = vrot.slane %v2999_v43, %v5432_v62 }
 0xdb4   :  { %v3008_v5 = vadd.f32 %v3006_v47, %v2843_v59 }
 0xdb6   :  { %4947 = vtanh.f32 %v3008_v5 }
 0xdc0   :  { %v4948_v61 = vpop.eup %4947 }
 0xdc1   :  { %3010 = vst.msk [vmem:[#allocation2 + $0x5] ss:$8 sm:$0x3] %vm5436_vm1, %v4948_v61  ;;  %v3085_v9 = vrot.slane %v4948_v61, %v5429_v34  ;;  %v3081_v46 = vrot.slane %v4948_v61, %v5423_v19 }
 0xdc3   :  { %3152 = vmatprep.mubr.f32.mxu1 %v3085_v9 }
 0xdc4   :  { %3153 = vmatmul.mubr.f32.vlgmr.msra.gmra.mrb[18].mxu1 %v3081_v46 }
 0xdc5   :  { %3681 = vmatprep.mubr.msk.f32.mxu1 %vm5081_vm0, %v5082_v2  ;;  %v3355_v2 = vld [vmem:[%s6203_s9] sm:$0xff] }
 0xdc6   :  { %v4885_v13 = vpack.c.bf16 %v3356_v11, %v3355_v2 }
 0xdc8   :  { %4886 = vmatpush3.bf16.msra.mxu1 %v4885_v13 }
 0xdc9   :  { %4887 = vmatprep.subr.bf16.mxu1 %v5080_v1 }
 0xe97   :  { %v3154_v50 = vpop.f32.mrb[18].mxu1 }
 0xe98   :  { %v3156_v30 = vpop.f32.mrb[19].mxu1 }
 0xe99   :  { %v3161_v23 = vcombine.low %v3154_v50, %v3156_v30 }
 0xe9b   :  { %v3168_v63 = vrot.slane %v3161_v23, %v5432_v62 }
 0xe9d   :  { %v3175_v41 = vrot.slane %v3168_v63, %v5432_v62 }
 0xe9f   :  { %v3177_v42 = vadd.f32 %v3175_v41, %v3012_v12 }
 0xea1   :  { %4949 = vtanh.f32 %v3177_v42 }
 0xeab   :  { %v4950_v17 = vpop.eup %4949 }
 0xeac   :  { %3179 = vst.msk [vmem:[#allocation2 + $0x6] ss:$8 sm:$0x3] %vm5436_vm1, %v4950_v17  ;;  %v3254_v40 = vrot.slane %v4950_v17, %v5429_v34  ;;  %v3250_v16 = vrot.slane %v4950_v17, %v5423_v19  ;;  %v3357_v34 = vld [vmem:[%s6203_s9 + $0x10] sm:$0xff]  ;;  %v3358_v19 = vld [vmem:[%s6203_s9 + $0x18] sm:$0xff] }
 0xead   :  { %v4888_v45 = vpack.c.bf16 %v3358_v19, %v3357_v34 }
 0xeae   :  { %3321 = vmatprep.mubr.f32.mxu0 %v3254_v40 }
 0xeaf   :  { %3322 = vmatmul.mubr.f32.vlgmr.msra.gmra.mrb[20].mxu0 %v3250_v16  ;;  %4889 = vmatpush3.bf16.msra.mxu1 %v4888_v45 }
 0xeb0   :  { %4890 = vmatprep.subr.bf16.mxu1 %v5080_v1 }
 0xeb3   :  { %4892 = vmatpush3.bf16.msra.mxu1 %v4891_v14 }
 0xeb4   :  { %4893 = vmatprep.subr.bf16.mxu1 %v5080_v1 }
 0xeb7   :  { %4895 = vmatpush3.bf16.msra.mxu1 %v4894_v51 }
 0xeb8   :  { %4896 = vmatprep.subr.bf16.mxu1 %v5080_v1 }
 0xebb   :  { %4898 = vmatpush3.bf16.msra.mxu1 %v4897_v28 }
 0xebc   :  { %4899 = vmatprep.subr.bf16.mxu1 %v5080_v1 }
 0xebf   :  { %4901 = vmatpush3.bf16.msra.mxu1 %v4900_v29 }
 0xec0   :  { %4902 = vmatprep.subr.bf16.mxu1 %v5080_v1 }
 0xec3   :  { %4904 = vmatpush3.bf16.msra.mxu1 %v4903_v39 }
 0xec4   :  { %4905 = vmatprep.subr.bf16.mxu1 %v5080_v1 }
 0xec7   :  { %4907 = vmatpush3.bf16.msra.mxu1 %v4906_v38 }
 0xf82   :  { %v3323_v27 = vpop.f32.mrb[20].mxu0 }
 0xf83   :  { %v3325_v57 = vpop.f32.mrb[21].mxu0 }
 0xf84   :  { %v3330_v58 = vcombine.low %v3323_v27, %v3325_v57 }
 0xf86   :  { %v3337_v18 = vrot.slane %v3330_v58, %v5432_v62 }
 0xf88   :  { %v3344_v35 = vrot.slane %v3337_v18, %v5432_v62 }
 0xf8a   :  { %v3346_v32 = vadd.f32 %v3344_v35, %v3181_v53 }
 0xf8c   :  { %4951 = vtanh.f32 %v3346_v32 }
 0xf96   :  { %v4952_v60 = vpop.eup %4951 }
 0xf97   :  { %3348 = vst.msk [vmem:[#allocation2 + $0x7] ss:$8 sm:$0x3] %vm5436_vm1, %v4952_v60 }
 0xf9e   :  { %v3350_v52 = vld [vmem:[#allocation2] sm:$0xff]  ;;  %v3351_v0 = vld [vmem:[#allocation2 + $0x8] sm:$0xff] }
 0xf9f   :  { %v3352_v8 = vadd.f32 %v3351_v0, %v3350_v52 }
 0xfa1   :  { %v3353_v3 = vmul.f32 0.5, %v3352_v8 }
 0xfa3   :  { %4953 = vtanh.f32 %v3353_v3 }
 0xfad   :  { %v4954_v1 = vpop.eup %4953 }
 0xfae   :  { %3682 = vmatmul.mubr.f32.vlgmr.msra.gmra.mrb[20].mxu1 %v4954_v1 }
0x1081   :  { %v3444_v6 = vpop.f32.mrb[20].mxu1 }
0x1082   :  { %v3445_v22 = vadd.f32 %v3457_v31, %v3444_v6  ;;  %v3683_v36 = vpop.f32.mrb[21].mxu1 }
0x1084   :  { %3449 = vst.msk [vmem:[%s6205_s11] sm:$0xff] %vm3448_vm2, %v3445_v22 }
0x1085   :  { %3454 = vsyncpa [#allocation5], 1 }
0x1086   :  { %3455 = vsyncpa [#allocation7], 1 }
0x1087   :  { %3456 = vsyncpa [#allocation10], 1 }

</bundles_post_ra>
